<compile_context>
chip_gen: v6e
topology: v6e:2x2x1
jax: 0.10.0
libtpu: 0.0.40
codegen_flags: <defaults>
</compile_context>

<pallas_src>
import jax
import jax.numpy as jnp
from jax.experimental import pallas as pl
from jax.experimental.pallas import tpu as pltpu

_CONV_CFG = (
    # (C_in, C_out, K, stride, padding)
    (1, 16, 4, 2, 2),
    (16, 32, 5, 2, 2),
    (32, 64, 5, 2, 2),
    (64, 128, 5, 2, 2),
)
_L_IN = 344    # input length implied by Linear(2816, 1): 344 -> 173 -> 87 -> 44 -> 22
_SLOPE = 0.2   # LeakyReLU negative slope


def _layer_dims(l_in):
    """Per conv layer: (L_out, L_padded_in)."""
    dims, l = [], l_in
    for (_ci, _co, k, s, p) in _CONV_CFG:
        lp = l + 2 * p
        lo = (lp - k) // s + 1
        dims.append((lo, lp))
        l = lo
    return tuple(dims)


_DIMS = _layer_dims(_L_IN)            # ((173, 348), (87, 177), (44, 91), (22, 48))
_L_FINAL = _DIMS[-1][0]               # 22
_C_FINAL = _CONV_CFG[-1][1]           # 128
_FLAT = _C_FINAL * _L_FINAL           # 2816


def _leaky_relu(x):
    return jnp.where(x > 0, x, _SLOPE * x)


def _fused_disc_kernel(x_ref, w1, b1, w2, b2, w3, b3, w4, b4, fcw, fcb,
                       o_ref, a0, a1, a2, a3, a4):
    """Entire discriminator forward for one batch element (grid axis = batch).

    Activations stay in VMEM scratch in a lane-dense (L, C) layout.  Each conv is
    computed as K accumulated per-tap matmuls over stride-2 views of the zero-padded
    activation (pl.ds strided slices); no im2col tensor is materialised.
    """
    pad_bufs = (a0, a1, a2, a3)       # zero-padded conv inputs, shape (L_pad, C_in)
    out_bufs = (a1, a2, a3, a4)       # where each layer writes its activation
    w_refs = (w1, w2, w3, w4)         # tap-major weights, shape (K, C_in, C_out)
    b_refs = (b1, b2, b3, b4)         # biases, shape (1, C_out)

    # Pad rows must be zero on every grid step (scratch persists across steps/cores).
    for buf in pad_bufs:
        buf[...] = jnp.zeros_like(buf)

    # Stage the raw (L, 1) input into the padded layer-0 buffer.
    p0 = _CONV_CFG[0][4]
    a0[p0:p0 + _L_IN, :] = x_ref[...]

    for li, (c_in, c_out, k, stride, _pad) in enumerate(_CONV_CFG):
        l_out = _DIMS[li][0]
        src, dst = pad_bufs[li], out_bufs[li]
        acc = jnp.zeros((l_out, c_out), jnp.float32)
        for tap in range(k):                                    # K is 4 or 5, unrolled
            xk = src[pl.ds(tap, l_out, stride=stride), :]       # (l_out, c_in) strided tap
            wk = w_refs[li][tap]                                # (c_in, c_out)
            if c_in == 1:
                acc = acc + xk * wk                             # outer product on the VPU
            else:
                acc = acc + jnp.dot(xk, wk, preferred_element_type=jnp.float32)
        y = _leaky_relu(acc + b_refs[li][...])                  # bias (1, c_out) broadcasts
        if li + 1 < len(_CONV_CFG):
            npad = _CONV_CFG[li + 1][4]
            dst[npad:npad + l_out, :] = y                       # write into next pad buffer
        else:
            dst[...] = y                                        # a4: (22, 128), no padding

    # Final Linear(2816, 1): the fc weight was pre-permuted into the same (L, C) layout,
    # so torch's Flatten + mat-vec collapse to a VPU multiply + full reduce.
    v = jnp.sum(a4[...] * fcw[...]) + fcb[0, 0]
    o_ref[...] = jnp.broadcast_to(v, o_ref.shape)               # lane-dense (1, 128) store


def _const_spec(shape):
    n = len(shape)
    return pl.BlockSpec(tuple(shape), lambda b, _n=n: (0,) * _n)


@jax.jit
def discriminator_conv1d_forward(params, z):
    """z: (B, 1, 344) -> validity (B, 1)."""
    b_sz, c_in, l_in = z.shape
    assert (c_in, l_in) == (1, _L_IN), z.shape
    x = z.reshape(b_sz, l_in, 1)      # NCL -> (B, L, C); C_in == 1, so a free reshape

    operands = [x]
    in_specs = [pl.BlockSpec((None, l_in, 1), lambda b: (b, 0, 0))]
    for w_t, bias in zip(params["conv_w"], params["conv_b"]):
        operands += [w_t, bias]
        in_specs += [_const_spec(w_t.shape), _const_spec(bias.shape)]
    operands += [params["fc_w"], params["fc_b"]]
    in_specs += [_const_spec(params["fc_w"].shape), _const_spec(params["fc_b"].shape)]

    scratch_shapes = [
        pltpu.VMEM((_DIMS[i][1], _CONV_CFG[i][0]), jnp.float32) for i in range(4)
    ] + [pltpu.VMEM((_L_FINAL, _C_FINAL), jnp.float32)]

    out = pl.pallas_call(
        _fused_disc_kernel,
        out_shape=jax.ShapeDtypeStruct((b_sz, 1, 128), jnp.float32),
        grid=(b_sz,),
        in_specs=in_specs,
        out_specs=pl.BlockSpec((None, 1, 128), lambda b: (b, 0, 0)),
        scratch_shapes=scratch_shapes,
        compiler_params=pltpu.CompilerParams(dimension_semantics=("parallel",)),
    )(*operands)
    return out[:, 0, :1]


def init_params(key):
    """Deterministic synthetic parameters.  Spectral norm (W / sigma) is a forward-time
    weight rescale, absorbed here.  All layout preprocessing is hoisted out of jit."""
    params = {"conv_w": [], "conv_b": []}
    keys = jax.random.split(key, 2 * len(_CONV_CFG) + 2)
    ki = 0
    for (c_in, c_out, k, _s, _p) in _CONV_CFG:
        bound = 1.0 / (c_in * k) ** 0.5
        w = jax.random.uniform(keys[ki], (c_out, c_in, k), jnp.float32, -bound, bound)
        ki += 1
        b = jax.random.uniform(keys[ki], (c_out,), jnp.float32, -bound, bound)
        ki += 1
        params["conv_w"].append(jnp.transpose(w, (2, 1, 0)))    # tap-major (K, C_in, C_out)
        params["conv_b"].append(b.reshape(1, c_out))
    bound = 1.0 / _FLAT ** 0.5
    fc_w = jax.random.uniform(keys[ki], (_FLAT,), jnp.float32, -bound, bound)
    ki += 1
    fc_b = jax.random.uniform(keys[ki], (1,), jnp.float32, -bound, bound)
    # Torch Flatten order is (C, L); permute the Linear weight into the kernel's (L, C)
    # activation layout so the flatten is free inside the kernel.
    params["fc_w"] = fc_w.reshape(_C_FINAL, _L_FINAL).T          # (22, 128)
    params["fc_b"] = fc_b.reshape(1, 1)
    return params


def _reference_forward(params, z):
    """Plain-JAX reference with the module's semantics (im2col conv per layer)."""
    x = z
    for (c_in, c_out, k, stride, pad), w_t, b2 in zip(
            _CONV_CFG, params["conv_w"], params["conv_b"]):
        w = jnp.transpose(w_t, (2, 1, 0))                   # back to torch (C_out, C_in, K)
        b = b2[0]
        bsz, _, l = x.shape
        l_out = (l + 2 * pad - k) // stride + 1
        xp = jnp.pad(x, ((0, 0), (0, 0), (pad, pad)))
        taps = jnp.stack([xp[:, :, t:t + stride * l_out:stride] for t in range(k)],
                         axis=-1)                           # (B, C_in, L_out, K)
        patches = taps.transpose(0, 2, 1, 3).reshape(bsz * l_out, c_in * k)
        y = jnp.dot(patches, w.reshape(c_out, c_in * k).T,
                    precision=jax.lax.Precision.HIGHEST) + b
        y = jnp.where(y > 0, y, _SLOPE * y)
        x = y.reshape(bsz, l_out, c_out).transpose(0, 2, 1)  # NCL
    bsz = x.shape[0]
    flat = x.reshape(bsz, -1)                               # torch .view order (C, L)
    fc_vec = params["fc_w"].T.reshape(-1)                   # undo the (L, C) permutation
    return jnp.dot(flat, fc_vec[:, None],
                   precision=jax.lax.Precision.HIGHEST) + params["fc_b"][0, 0]


if __name__ == "__main__":
    key = jax.random.PRNGKey(0)
    pkey, zkey = jax.random.split(key)
    params = init_params(pkey)

    # Input length must be 344 so that four conv layers yield (128, 22) -> 2816 features.
    B = 2
    z = jax.random.normal(zkey, (B, 1, _L_IN), jnp.float32)

    validity = discriminator_conv1d_forward(params, z)
    jax.block_until_ready(validity)
    assert validity.shape == (B, 1), validity.shape

    # Sanity check against a plain-JAX reference of the same module.
    ref = _reference_forward(params, z)
    err = float(jnp.max(jnp.abs(validity - ref)))
    assert err < 5e-2, f"max |pallas - reference| = {err}"

    print("KERNEL_OK")
</pallas_src>

<mosaic_0001>
module attributes {stable_mosaic.version = 11 : i64} {
  func.func @_fused_disc_kernel(%arg0: i32, %arg1: memref<1x344x1xf32, #tpu.memory_space<vmem>>, %arg2: memref<4x1x16xf32, #tpu.memory_space<vmem>>, %arg3: memref<1x16xf32, #tpu.memory_space<vmem>>, %arg4: memref<5x16x32xf32, #tpu.memory_space<vmem>>, %arg5: memref<1x32xf32, #tpu.memory_space<vmem>>, %arg6: memref<5x32x64xf32, #tpu.memory_space<vmem>>, %arg7: memref<1x64xf32, #tpu.memory_space<vmem>>, %arg8: memref<5x64x128xf32, #tpu.memory_space<vmem>>, %arg9: memref<1x128xf32, #tpu.memory_space<vmem>>, %arg10: memref<22x128xf32, #tpu.memory_space<vmem>>, %arg11: memref<1x1xf32, #tpu.memory_space<vmem>>, %arg12: memref<1x1x128xf32, #tpu.memory_space<vmem>>, %arg13: memref<348x1xf32, #tpu.memory_space<vmem>>, %arg14: memref<177x16xf32, #tpu.memory_space<vmem>>, %arg15: memref<91x32xf32, #tpu.memory_space<vmem>>, %arg16: memref<48x64xf32, #tpu.memory_space<vmem>>, %arg17: memref<22x128xf32, #tpu.memory_space<vmem>>) attributes {dimension_semantics = [#tpu.dimension_semantics<parallel>], iteration_bounds = array<i64: 2>, scalar_prefetch = 0 : i64, scratch_operands = 5 : i64, tpu.core_type = #tpu.core_type<tc>, window_params = [{transform_indices = @transform_0, window_bounds = array<i64: 1, 344, 1>}, {pipeline_mode = #tpu.pipeline_mode<synchronous>, transform_indices = @transform_1, window_bounds = array<i64: 4, 1, 16>}, {pipeline_mode = #tpu.pipeline_mode<synchronous>, transform_indices = @transform_2, window_bounds = array<i64: 1, 16>}, {pipeline_mode = #tpu.pipeline_mode<synchronous>, transform_indices = @transform_3, window_bounds = array<i64: 5, 16, 32>}, {pipeline_mode = #tpu.pipeline_mode<synchronous>, transform_indices = @transform_4, window_bounds = array<i64: 1, 32>}, {pipeline_mode = #tpu.pipeline_mode<synchronous>, transform_indices = @transform_5, window_bounds = array<i64: 5, 32, 64>}, {pipeline_mode = #tpu.pipeline_mode<synchronous>, transform_indices = @transform_6, window_bounds = array<i64: 1, 64>}, {pipeline_mode = #tpu.pipeline_mode<synchronous>, transform_indices = @transform_7, window_bounds = array<i64: 5, 64, 128>}, {pipeline_mode = #tpu.pipeline_mode<synchronous>, transform_indices = @transform_8, window_bounds = array<i64: 1, 128>}, {pipeline_mode = #tpu.pipeline_mode<synchronous>, transform_indices = @transform_9, window_bounds = array<i64: 22, 128>}, {pipeline_mode = #tpu.pipeline_mode<synchronous>, transform_indices = @transform_10, window_bounds = array<i64: 1, 1>}, {transform_indices = @transform_11, window_bounds = array<i64: 1, 1, 128>}]} {
    %cst = arith.constant 0.000000e+00 : f32
    %0 = vector.broadcast %cst : f32 to vector<348x1xf32>
    %c0 = arith.constant 0 : index
    %c0_0 = arith.constant 0 : index
    %1 = vector.load %arg13[%c0, %c0_0] : memref<348x1xf32, #tpu.memory_space<vmem>>, vector<348x1xf32>
    tpu.vector_store %arg13[%c0, %c0_0], %0 {strides = array<i32>} : memref<348x1xf32, #tpu.memory_space<vmem>>, vector<348x1xf32>,
    %cst_1 = arith.constant 0.000000e+00 : f32
    %2 = vector.broadcast %cst_1 : f32 to vector<177x16xf32>
    %c0_2 = arith.constant 0 : index
    %c0_3 = arith.constant 0 : index
    %3 = vector.load %arg14[%c0_2, %c0_3] : memref<177x16xf32, #tpu.memory_space<vmem>>, vector<177x16xf32>
    tpu.vector_store %arg14[%c0_2, %c0_3], %2 {strides = array<i32>} : memref<177x16xf32, #tpu.memory_space<vmem>>, vector<177x16xf32>,
    %cst_4 = arith.constant 0.000000e+00 : f32
    %4 = vector.broadcast %cst_4 : f32 to vector<91x32xf32>
    %c0_5 = arith.constant 0 : index
    %c0_6 = arith.constant 0 : index
    %5 = vector.load %arg15[%c0_5, %c0_6] : memref<91x32xf32, #tpu.memory_space<vmem>>, vector<91x32xf32>
    tpu.vector_store %arg15[%c0_5, %c0_6], %4 {strides = array<i32>} : memref<91x32xf32, #tpu.memory_space<vmem>>, vector<91x32xf32>,
    %cst_7 = arith.constant 0.000000e+00 : f32
    %6 = vector.broadcast %cst_7 : f32 to vector<48x64xf32>
    %c0_8 = arith.constant 0 : index
    %c0_9 = arith.constant 0 : index
    %7 = vector.load %arg16[%c0_8, %c0_9] : memref<48x64xf32, #tpu.memory_space<vmem>>, vector<48x64xf32>
    tpu.vector_store %arg16[%c0_8, %c0_9], %6 {strides = array<i32>} : memref<48x64xf32, #tpu.memory_space<vmem>>, vector<48x64xf32>,
    %c0_10 = arith.constant 0 : index
    %c0_11 = arith.constant 0 : index
    %c0_12 = arith.constant 0 : index
    %8 = vector.load %arg1[%c0_10, %c0_11, %c0_12] : memref<1x344x1xf32, #tpu.memory_space<vmem>>, vector<1x344x1xf32>
    %9 = vector.shape_cast %8 : vector<1x344x1xf32> to vector<344x1xf32>
    %c2 = arith.constant 2 : index
    %c0_13 = arith.constant 0 : index
    %10 = vector.load %arg13[%c2, %c0_13] : memref<348x1xf32, #tpu.memory_space<vmem>>, vector<344x1xf32>
    tpu.vector_store %arg13[%c2, %c0_13], %9 {strides = array<i32>} : memref<348x1xf32, #tpu.memory_space<vmem>>, vector<344x1xf32>,
    %cst_14 = arith.constant 0.000000e+00 : f32
    %11 = vector.broadcast %cst_14 : f32 to vector<173x16xf32>
    %c0_15 = arith.constant 0 : index
    %c0_16 = arith.constant 0 : index
    %12 = tpu.strided_load %arg13[%c0_15, %c0_16] {strides = array<i32: 2, 1>} : memref<348x1xf32, #tpu.memory_space<vmem>>, vector<173x1xf32>
    %c0_17 = arith.constant 0 : index
    %c0_18 = arith.constant 0 : index
    %c0_19 = arith.constant 0 : index
    %13 = vector.load %arg2[%c0_17, %c0_18, %c0_19] : memref<4x1x16xf32, #tpu.memory_space<vmem>>, vector<1x1x16xf32>
    %14 = vector.shape_cast %13 : vector<1x1x16xf32> to vector<1x16xf32>
    %15 = vector.broadcast %12 : vector<173x1xf32> to vector<173x16xf32>
    %16 = vector.broadcast %14 : vector<1x16xf32> to vector<173x16xf32>
    %17 = arith.mulf %15, %16 : vector<173x16xf32>
    %18 = arith.addf %11, %17 : vector<173x16xf32>
    %c1 = arith.constant 1 : index
    %c0_20 = arith.constant 0 : index
    %19 = tpu.strided_load %arg13[%c1, %c0_20] {strides = array<i32: 2, 1>} : memref<348x1xf32, #tpu.memory_space<vmem>>, vector<173x1xf32>
    %c1_21 = arith.constant 1 : index
    %c0_22 = arith.constant 0 : index
    %c0_23 = arith.constant 0 : index
    %20 = vector.load %arg2[%c1_21, %c0_22, %c0_23] : memref<4x1x16xf32, #tpu.memory_space<vmem>>, vector<1x1x16xf32>
    %21 = vector.shape_cast %20 : vector<1x1x16xf32> to vector<1x16xf32>
    %22 = vector.broadcast %19 : vector<173x1xf32> to vector<173x16xf32>
    %23 = vector.broadcast %21 : vector<1x16xf32> to vector<173x16xf32>
    %24 = arith.mulf %22, %23 : vector<173x16xf32>
    %25 = arith.addf %18, %24 : vector<173x16xf32>
    %c2_24 = arith.constant 2 : index
    %c0_25 = arith.constant 0 : index
    %26 = tpu.strided_load %arg13[%c2_24, %c0_25] {strides = array<i32: 2, 1>} : memref<348x1xf32, #tpu.memory_space<vmem>>, vector<173x1xf32>
    %c2_26 = arith.constant 2 : index
    %c0_27 = arith.constant 0 : index
    %c0_28 = arith.constant 0 : index
    %27 = vector.load %arg2[%c2_26, %c0_27, %c0_28] : memref<4x1x16xf32, #tpu.memory_space<vmem>>, vector<1x1x16xf32>
    %28 = vector.shape_cast %27 : vector<1x1x16xf32> to vector<1x16xf32>
    %29 = vector.broadcast %26 : vector<173x1xf32> to vector<173x16xf32>
    %30 = vector.broadcast %28 : vector<1x16xf32> to vector<173x16xf32>
    %31 = arith.mulf %29, %30 : vector<173x16xf32>
    %32 = arith.addf %25, %31 : vector<173x16xf32>
    %c3 = arith.constant 3 : index
    %c0_29 = arith.constant 0 : index
    %33 = tpu.strided_load %arg13[%c3, %c0_29] {strides = array<i32: 2, 1>} : memref<348x1xf32, #tpu.memory_space<vmem>>, vector<173x1xf32>
    %c3_30 = arith.constant 3 : index
    %c0_31 = arith.constant 0 : index
    %c0_32 = arith.constant 0 : index
    %34 = vector.load %arg2[%c3_30, %c0_31, %c0_32] : memref<4x1x16xf32, #tpu.memory_space<vmem>>, vector<1x1x16xf32>
    %35 = vector.shape_cast %34 : vector<1x1x16xf32> to vector<1x16xf32>
    %36 = vector.broadcast %33 : vector<173x1xf32> to vector<173x16xf32>
    %37 = vector.broadcast %35 : vector<1x16xf32> to vector<173x16xf32>
    %38 = arith.mulf %36, %37 : vector<173x16xf32>
    %39 = arith.addf %32, %38 : vector<173x16xf32>
    %c0_33 = arith.constant 0 : index
    %c0_34 = arith.constant 0 : index
    %40 = vector.load %arg3[%c0_33, %c0_34] : memref<1x16xf32, #tpu.memory_space<vmem>>, vector<1x16xf32>
    %41 = vector.broadcast %40 : vector<1x16xf32> to vector<173x16xf32>
    %42 = arith.addf %39, %41 : vector<173x16xf32>
    %cst_35 = arith.constant 0.000000e+00 : f32
    %43 = vector.broadcast %cst_35 : f32 to vector<173x16xf32>
    %44 = arith.cmpf ogt, %42, %43 : vector<173x16xf32>
    %cst_36 = arith.constant 2.000000e-01 : f32
    %45 = vector.broadcast %cst_36 : f32 to vector<173x16xf32>
    %46 = arith.mulf %45, %42 : vector<173x16xf32>
    %47 = arith.select %44, %42, %46 : vector<173x16xi1>, vector<173x16xf32>
    %c2_37 = arith.constant 2 : index
    %c0_38 = arith.constant 0 : index
    %48 = vector.load %arg14[%c2_37, %c0_38] : memref<177x16xf32, #tpu.memory_space<vmem>>, vector<173x16xf32>
    tpu.vector_store %arg14[%c2_37, %c0_38], %47 {strides = array<i32>} : memref<177x16xf32, #tpu.memory_space<vmem>>, vector<173x16xf32>,
    %cst_39 = arith.constant 0.000000e+00 : f32
    %49 = vector.broadcast %cst_39 : f32 to vector<87x32xf32>
    %c0_40 = arith.constant 0 : index
    %c0_41 = arith.constant 0 : index
    %50 = tpu.strided_load %arg14[%c0_40, %c0_41] {strides = array<i32: 2, 1>} : memref<177x16xf32, #tpu.memory_space<vmem>>, vector<87x16xf32>
    %c0_42 = arith.constant 0 : index
    %c0_43 = arith.constant 0 : index
    %c0_44 = arith.constant 0 : index
    %51 = vector.load %arg4[%c0_42, %c0_43, %c0_44] : memref<5x16x32xf32, #tpu.memory_space<vmem>>, vector<1x16x32xf32>
    %52 = vector.shape_cast %51 : vector<1x16x32xf32> to vector<16x32xf32>
    %cst_45 = arith.constant dense<0.000000e+00> : vector<87x32xf32>
    %53 = tpu.matmul %50, %52, %cst_45 {dimension_numbers = #tpu.dot_dimension_numbers<[1], [0], [0], [1], [0, 0, 1, 1], [], []>} : vector<87x16xf32>, vector<16x32xf32>, vector<87x32xf32> -> vector<87x32xf32>
    %54 = arith.addf %49, %53 : vector<87x32xf32>
    %c1_46 = arith.constant 1 : index
    %c0_47 = arith.constant 0 : index
    %55 = tpu.strided_load %arg14[%c1_46, %c0_47] {strides = array<i32: 2, 1>} : memref<177x16xf32, #tpu.memory_space<vmem>>, vector<87x16xf32>
    %c1_48 = arith.constant 1 : index
    %c0_49 = arith.constant 0 : index
    %c0_50 = arith.constant 0 : index
    %56 = vector.load %arg4[%c1_48, %c0_49, %c0_50] : memref<5x16x32xf32, #tpu.memory_space<vmem>>, vector<1x16x32xf32>
    %57 = vector.shape_cast %56 : vector<1x16x32xf32> to vector<16x32xf32>
    %cst_51 = arith.constant dense<0.000000e+00> : vector<87x32xf32>
    %58 = tpu.matmul %55, %57, %cst_51 {dimension_numbers = #tpu.dot_dimension_numbers<[1], [0], [0], [1], [0, 0, 1, 1], [], []>} : vector<87x16xf32>, vector<16x32xf32>, vector<87x32xf32> -> vector<87x32xf32>
    %59 = arith.addf %54, %58 : vector<87x32xf32>
    %c2_52 = arith.constant 2 : index
    %c0_53 = arith.constant 0 : index
    %60 = tpu.strided_load %arg14[%c2_52, %c0_53] {strides = array<i32: 2, 1>} : memref<177x16xf32, #tpu.memory_space<vmem>>, vector<87x16xf32>
    %c2_54 = arith.constant 2 : index
    %c0_55 = arith.constant 0 : index
    %c0_56 = arith.constant 0 : index
    %61 = vector.load %arg4[%c2_54, %c0_55, %c0_56] : memref<5x16x32xf32, #tpu.memory_space<vmem>>, vector<1x16x32xf32>
    %62 = vector.shape_cast %61 : vector<1x16x32xf32> to vector<16x32xf32>
    %cst_57 = arith.constant dense<0.000000e+00> : vector<87x32xf32>
    %63 = tpu.matmul %60, %62, %cst_57 {dimension_numbers = #tpu.dot_dimension_numbers<[1], [0], [0], [1], [0, 0, 1, 1], [], []>} : vector<87x16xf32>, vector<16x32xf32>, vector<87x32xf32> -> vector<87x32xf32>
    %64 = arith.addf %59, %63 : vector<87x32xf32>
    %c3_58 = arith.constant 3 : index
    %c0_59 = arith.constant 0 : index
    %65 = tpu.strided_load %arg14[%c3_58, %c0_59] {strides = array<i32: 2, 1>} : memref<177x16xf32, #tpu.memory_space<vmem>>, vector<87x16xf32>
    %c3_60 = arith.constant 3 : index
    %c0_61 = arith.constant 0 : index
    %c0_62 = arith.constant 0 : index
    %66 = vector.load %arg4[%c3_60, %c0_61, %c0_62] : memref<5x16x32xf32, #tpu.memory_space<vmem>>, vector<1x16x32xf32>
    %67 = vector.shape_cast %66 : vector<1x16x32xf32> to vector<16x32xf32>
    %cst_63 = arith.constant dense<0.000000e+00> : vector<87x32xf32>
    %68 = tpu.matmul %65, %67, %cst_63 {dimension_numbers = #tpu.dot_dimension_numbers<[1], [0], [0], [1], [0, 0, 1, 1], [], []>} : vector<87x16xf32>, vector<16x32xf32>, vector<87x32xf32> -> vector<87x32xf32>
    %69 = arith.addf %64, %68 : vector<87x32xf32>
    %c4 = arith.constant 4 : index
    %c0_64 = arith.constant 0 : index
    %70 = tpu.strided_load %arg14[%c4, %c0_64] {strides = array<i32: 2, 1>} : memref<177x16xf32, #tpu.memory_space<vmem>>, vector<87x16xf32>
    %c4_65 = arith.constant 4 : index
    %c0_66 = arith.constant 0 : index
    %c0_67 = arith.constant 0 : index
    %71 = vector.load %arg4[%c4_65, %c0_66, %c0_67] : memref<5x16x32xf32, #tpu.memory_space<vmem>>, vector<1x16x32xf32>
    %72 = vector.shape_cast %71 : vector<1x16x32xf32> to vector<16x32xf32>
    %cst_68 = arith.constant dense<0.000000e+00> : vector<87x32xf32>
    %73 = tpu.matmul %70, %72, %cst_68 {dimension_numbers = #tpu.dot_dimension_numbers<[1], [0], [0], [1], [0, 0, 1, 1], [], []>} : vector<87x16xf32>, vector<16x32xf32>, vector<87x32xf32> -> vector<87x32xf32>
    %74 = arith.addf %69, %73 : vector<87x32xf32>
    %c0_69 = arith.constant 0 : index
    %c0_70 = arith.constant 0 : index
    %75 = vector.load %arg5[%c0_69, %c0_70] : memref<1x32xf32, #tpu.memory_space<vmem>>, vector<1x32xf32>
    %76 = vector.broadcast %75 : vector<1x32xf32> to vector<87x32xf32>
    %77 = arith.addf %74, %76 : vector<87x32xf32>
    %cst_71 = arith.constant 0.000000e+00 : f32
    %78 = vector.broadcast %cst_71 : f32 to vector<87x32xf32>
    %79 = arith.cmpf ogt, %77, %78 : vector<87x32xf32>
    %cst_72 = arith.constant 2.000000e-01 : f32
    %80 = vector.broadcast %cst_72 : f32 to vector<87x32xf32>
    %81 = arith.mulf %80, %77 : vector<87x32xf32>
    %82 = arith.select %79, %77, %81 : vector<87x32xi1>, vector<87x32xf32>
    %c2_73 = arith.constant 2 : index
    %c0_74 = arith.constant 0 : index
    %83 = vector.load %arg15[%c2_73, %c0_74] : memref<91x32xf32, #tpu.memory_space<vmem>>, vector<87x32xf32>
    tpu.vector_store %arg15[%c2_73, %c0_74], %82 {strides = array<i32>} : memref<91x32xf32, #tpu.memory_space<vmem>>, vector<87x32xf32>,
    %cst_75 = arith.constant 0.000000e+00 : f32
    %84 = vector.broadcast %cst_75 : f32 to vector<44x64xf32>
    %c0_76 = arith.constant 0 : index
    %c0_77 = arith.constant 0 : index
    %85 = tpu.strided_load %arg15[%c0_76, %c0_77] {strides = array<i32: 2, 1>} : memref<91x32xf32, #tpu.memory_space<vmem>>, vector<44x32xf32>
    %c0_78 = arith.constant 0 : index
    %c0_79 = arith.constant 0 : index
    %c0_80 = arith.constant 0 : index
    %86 = vector.load %arg6[%c0_78, %c0_79, %c0_80] : memref<5x32x64xf32, #tpu.memory_space<vmem>>, vector<1x32x64xf32>
    %87 = vector.shape_cast %86 : vector<1x32x64xf32> to vector<32x64xf32>
    %cst_81 = arith.constant dense<0.000000e+00> : vector<44x64xf32>
    %88 = tpu.matmul %85, %87, %cst_81 {dimension_numbers = #tpu.dot_dimension_numbers<[1], [0], [0], [1], [0, 0, 1, 1], [], []>} : vector<44x32xf32>, vector<32x64xf32>, vector<44x64xf32> -> vector<44x64xf32>
    %89 = arith.addf %84, %88 : vector<44x64xf32>
    %c1_82 = arith.constant 1 : index
    %c0_83 = arith.constant 0 : index
    %90 = tpu.strided_load %arg15[%c1_82, %c0_83] {strides = array<i32: 2, 1>} : memref<91x32xf32, #tpu.memory_space<vmem>>, vector<44x32xf32>
    %c1_84 = arith.constant 1 : index
    %c0_85 = arith.constant 0 : index
    %c0_86 = arith.constant 0 : index
    %91 = vector.load %arg6[%c1_84, %c0_85, %c0_86] : memref<5x32x64xf32, #tpu.memory_space<vmem>>, vector<1x32x64xf32>
    %92 = vector.shape_cast %91 : vector<1x32x64xf32> to vector<32x64xf32>
    %cst_87 = arith.constant dense<0.000000e+00> : vector<44x64xf32>
    %93 = tpu.matmul %90, %92, %cst_87 {dimension_numbers = #tpu.dot_dimension_numbers<[1], [0], [0], [1], [0, 0, 1, 1], [], []>} : vector<44x32xf32>, vector<32x64xf32>, vector<44x64xf32> -> vector<44x64xf32>
    %94 = arith.addf %89, %93 : vector<44x64xf32>
    %c2_88 = arith.constant 2 : index
    %c0_89 = arith.constant 0 : index
    %95 = tpu.strided_load %arg15[%c2_88, %c0_89] {strides = array<i32: 2, 1>} : memref<91x32xf32, #tpu.memory_space<vmem>>, vector<44x32xf32>
    %c2_90 = arith.constant 2 : index
    %c0_91 = arith.constant 0 : index
    %c0_92 = arith.constant 0 : index
    %96 = vector.load %arg6[%c2_90, %c0_91, %c0_92] : memref<5x32x64xf32, #tpu.memory_space<vmem>>, vector<1x32x64xf32>
    %97 = vector.shape_cast %96 : vector<1x32x64xf32> to vector<32x64xf32>
    %cst_93 = arith.constant dense<0.000000e+00> : vector<44x64xf32>
    %98 = tpu.matmul %95, %97, %cst_93 {dimension_numbers = #tpu.dot_dimension_numbers<[1], [0], [0], [1], [0, 0, 1, 1], [], []>} : vector<44x32xf32>, vector<32x64xf32>, vector<44x64xf32> -> vector<44x64xf32>
    %99 = arith.addf %94, %98 : vector<44x64xf32>
    %c3_94 = arith.constant 3 : index
    %c0_95 = arith.constant 0 : index
    %100 = tpu.strided_load %arg15[%c3_94, %c0_95] {strides = array<i32: 2, 1>} : memref<91x32xf32, #tpu.memory_space<vmem>>, vector<44x32xf32>
    %c3_96 = arith.constant 3 : index
    %c0_97 = arith.constant 0 : index
    %c0_98 = arith.constant 0 : index
    %101 = vector.load %arg6[%c3_96, %c0_97, %c0_98] : memref<5x32x64xf32, #tpu.memory_space<vmem>>, vector<1x32x64xf32>
    %102 = vector.shape_cast %101 : vector<1x32x64xf32> to vector<32x64xf32>
    %cst_99 = arith.constant dense<0.000000e+00> : vector<44x64xf32>
    %103 = tpu.matmul %100, %102, %cst_99 {dimension_numbers = #tpu.dot_dimension_numbers<[1], [0], [0], [1], [0, 0, 1, 1], [], []>} : vector<44x32xf32>, vector<32x64xf32>, vector<44x64xf32> -> vector<44x64xf32>
    %104 = arith.addf %99, %103 : vector<44x64xf32>
    %c4_100 = arith.constant 4 : index
    %c0_101 = arith.constant 0 : index
    %105 = tpu.strided_load %arg15[%c4_100, %c0_101] {strides = array<i32: 2, 1>} : memref<91x32xf32, #tpu.memory_space<vmem>>, vector<44x32xf32>
    %c4_102 = arith.constant 4 : index
    %c0_103 = arith.constant 0 : index
    %c0_104 = arith.constant 0 : index
    %106 = vector.load %arg6[%c4_102, %c0_103, %c0_104] : memref<5x32x64xf32, #tpu.memory_space<vmem>>, vector<1x32x64xf32>
    %107 = vector.shape_cast %106 : vector<1x32x64xf32> to vector<32x64xf32>
    %cst_105 = arith.constant dense<0.000000e+00> : vector<44x64xf32>
    %108 = tpu.matmul %105, %107, %cst_105 {dimension_numbers = #tpu.dot_dimension_numbers<[1], [0], [0], [1], [0, 0, 1, 1], [], []>} : vector<44x32xf32>, vector<32x64xf32>, vector<44x64xf32> -> vector<44x64xf32>
    %109 = arith.addf %104, %108 : vector<44x64xf32>
    %c0_106 = arith.constant 0 : index
    %c0_107 = arith.constant 0 : index
    %110 = vector.load %arg7[%c0_106, %c0_107] : memref<1x64xf32, #tpu.memory_space<vmem>>, vector<1x64xf32>
    %111 = vector.broadcast %110 : vector<1x64xf32> to vector<44x64xf32>
    %112 = arith.addf %109, %111 : vector<44x64xf32>
    %cst_108 = arith.constant 0.000000e+00 : f32
    %113 = vector.broadcast %cst_108 : f32 to vector<44x64xf32>
    %114 = arith.cmpf ogt, %112, %113 : vector<44x64xf32>
    %cst_109 = arith.constant 2.000000e-01 : f32
    %115 = vector.broadcast %cst_109 : f32 to vector<44x64xf32>
    %116 = arith.mulf %115, %112 : vector<44x64xf32>
    %117 = arith.select %114, %112, %116 : vector<44x64xi1>, vector<44x64xf32>
    %c2_110 = arith.constant 2 : index
    %c0_111 = arith.constant 0 : index
    %118 = vector.load %arg16[%c2_110, %c0_111] : memref<48x64xf32, #tpu.memory_space<vmem>>, vector<44x64xf32>
    tpu.vector_store %arg16[%c2_110, %c0_111], %117 {strides = array<i32>} : memref<48x64xf32, #tpu.memory_space<vmem>>, vector<44x64xf32>,
    %cst_112 = arith.constant 0.000000e+00 : f32
    %119 = vector.broadcast %cst_112 : f32 to vector<22x128xf32>
    %c0_113 = arith.constant 0 : index
    %c0_114 = arith.constant 0 : index
    %120 = tpu.strided_load %arg16[%c0_113, %c0_114] {strides = array<i32: 2, 1>} : memref<48x64xf32, #tpu.memory_space<vmem>>, vector<22x64xf32>
    %c0_115 = arith.constant 0 : index
    %c0_116 = arith.constant 0 : index
    %c0_117 = arith.constant 0 : index
    %121 = vector.load %arg8[%c0_115, %c0_116, %c0_117] : memref<5x64x128xf32, #tpu.memory_space<vmem>>, vector<1x64x128xf32>
    %122 = vector.shape_cast %121 : vector<1x64x128xf32> to vector<64x128xf32>
    %cst_118 = arith.constant dense<0.000000e+00> : vector<22x128xf32>
    %123 = tpu.matmul %120, %122, %cst_118 {dimension_numbers = #tpu.dot_dimension_numbers<[1], [0], [0], [1], [0, 0, 1, 1], [], []>} : vector<22x64xf32>, vector<64x128xf32>, vector<22x128xf32> -> vector<22x128xf32>
    %124 = arith.addf %119, %123 : vector<22x128xf32>
    %c1_119 = arith.constant 1 : index
    %c0_120 = arith.constant 0 : index
    %125 = tpu.strided_load %arg16[%c1_119, %c0_120] {strides = array<i32: 2, 1>} : memref<48x64xf32, #tpu.memory_space<vmem>>, vector<22x64xf32>
    %c1_121 = arith.constant 1 : index
    %c0_122 = arith.constant 0 : index
    %c0_123 = arith.constant 0 : index
    %126 = vector.load %arg8[%c1_121, %c0_122, %c0_123] : memref<5x64x128xf32, #tpu.memory_space<vmem>>, vector<1x64x128xf32>
    %127 = vector.shape_cast %126 : vector<1x64x128xf32> to vector<64x128xf32>
    %cst_124 = arith.constant dense<0.000000e+00> : vector<22x128xf32>
    %128 = tpu.matmul %125, %127, %cst_124 {dimension_numbers = #tpu.dot_dimension_numbers<[1], [0], [0], [1], [0, 0, 1, 1], [], []>} : vector<22x64xf32>, vector<64x128xf32>, vector<22x128xf32> -> vector<22x128xf32>
    %129 = arith.addf %124, %128 : vector<22x128xf32>
    %c2_125 = arith.constant 2 : index
    %c0_126 = arith.constant 0 : index
    %130 = tpu.strided_load %arg16[%c2_125, %c0_126] {strides = array<i32: 2, 1>} : memref<48x64xf32, #tpu.memory_space<vmem>>, vector<22x64xf32>
    %c2_127 = arith.constant 2 : index
    %c0_128 = arith.constant 0 : index
    %c0_129 = arith.constant 0 : index
    %131 = vector.load %arg8[%c2_127, %c0_128, %c0_129] : memref<5x64x128xf32, #tpu.memory_space<vmem>>, vector<1x64x128xf32>
    %132 = vector.shape_cast %131 : vector<1x64x128xf32> to vector<64x128xf32>
    %cst_130 = arith.constant dense<0.000000e+00> : vector<22x128xf32>
    %133 = tpu.matmul %130, %132, %cst_130 {dimension_numbers = #tpu.dot_dimension_numbers<[1], [0], [0], [1], [0, 0, 1, 1], [], []>} : vector<22x64xf32>, vector<64x128xf32>, vector<22x128xf32> -> vector<22x128xf32>
    %134 = arith.addf %129, %133 : vector<22x128xf32>
    %c3_131 = arith.constant 3 : index
    %c0_132 = arith.constant 0 : index
    %135 = tpu.strided_load %arg16[%c3_131, %c0_132] {strides = array<i32: 2, 1>} : memref<48x64xf32, #tpu.memory_space<vmem>>, vector<22x64xf32>
    %c3_133 = arith.constant 3 : index
    %c0_134 = arith.constant 0 : index
    %c0_135 = arith.constant 0 : index
    %136 = vector.load %arg8[%c3_133, %c0_134, %c0_135] : memref<5x64x128xf32, #tpu.memory_space<vmem>>, vector<1x64x128xf32>
    %137 = vector.shape_cast %136 : vector<1x64x128xf32> to vector<64x128xf32>
    %cst_136 = arith.constant dense<0.000000e+00> : vector<22x128xf32>
    %138 = tpu.matmul %135, %137, %cst_136 {dimension_numbers = #tpu.dot_dimension_numbers<[1], [0], [0], [1], [0, 0, 1, 1], [], []>} : vector<22x64xf32>, vector<64x128xf32>, vector<22x128xf32> -> vector<22x128xf32>
    %139 = arith.addf %134, %138 : vector<22x128xf32>
    %c4_137 = arith.constant 4 : index
    %c0_138 = arith.constant 0 : index
    %140 = tpu.strided_load %arg16[%c4_137, %c0_138] {strides = array<i32: 2, 1>} : memref<48x64xf32, #tpu.memory_space<vmem>>, vector<22x64xf32>
    %c4_139 = arith.constant 4 : index
    %c0_140 = arith.constant 0 : index
    %c0_141 = arith.constant 0 : index
    %141 = vector.load %arg8[%c4_139, %c0_140, %c0_141] : memref<5x64x128xf32, #tpu.memory_space<vmem>>, vector<1x64x128xf32>
    %142 = vector.shape_cast %141 : vector<1x64x128xf32> to vector<64x128xf32>
    %cst_142 = arith.constant dense<0.000000e+00> : vector<22x128xf32>
    %143 = tpu.matmul %140, %142, %cst_142 {dimension_numbers = #tpu.dot_dimension_numbers<[1], [0], [0], [1], [0, 0, 1, 1], [], []>} : vector<22x64xf32>, vector<64x128xf32>, vector<22x128xf32> -> vector<22x128xf32>
    %144 = arith.addf %139, %143 : vector<22x128xf32>
    %c0_143 = arith.constant 0 : index
    %c0_144 = arith.constant 0 : index
    %145 = vector.load %arg9[%c0_143, %c0_144] : memref<1x128xf32, #tpu.memory_space<vmem>>, vector<1x128xf32>
    %146 = vector.broadcast %145 : vector<1x128xf32> to vector<22x128xf32>
    %147 = arith.addf %144, %146 : vector<22x128xf32>
    %cst_145 = arith.constant 0.000000e+00 : f32
    %148 = vector.broadcast %cst_145 : f32 to vector<22x128xf32>
    %149 = arith.cmpf ogt, %147, %148 : vector<22x128xf32>
    %cst_146 = arith.constant 2.000000e-01 : f32
    %150 = vector.broadcast %cst_146 : f32 to vector<22x128xf32>
    %151 = arith.mulf %150, %147 : vector<22x128xf32>
    %152 = arith.select %149, %147, %151 : vector<22x128xi1>, vector<22x128xf32>
    %c0_147 = arith.constant 0 : index
    %c0_148 = arith.constant 0 : index
    %153 = vector.load %arg17[%c0_147, %c0_148] : memref<22x128xf32, #tpu.memory_space<vmem>>, vector<22x128xf32>
    tpu.vector_store %arg17[%c0_147, %c0_148], %152 {strides = array<i32>} : memref<22x128xf32, #tpu.memory_space<vmem>>, vector<22x128xf32>,
    %c0_149 = arith.constant 0 : index
    %c0_150 = arith.constant 0 : index
    %154 = vector.load %arg17[%c0_149, %c0_150] : memref<22x128xf32, #tpu.memory_space<vmem>>, vector<22x128xf32>
    %c0_151 = arith.constant 0 : index
    %c0_152 = arith.constant 0 : index
    %155 = vector.load %arg10[%c0_151, %c0_152] : memref<22x128xf32, #tpu.memory_space<vmem>>, vector<22x128xf32>
    %156 = arith.mulf %154, %155 : vector<22x128xf32>
    %157 = vector.shape_cast %156 : vector<22x128xf32> to vector<1x22x128xf32>
    %cst_153 = arith.constant dense<0.000000e+00> : vector<1xf32>
    %158 = vector.multi_reduction <add>, %157, %cst_153 [1, 2] : vector<1x22x128xf32> to vector<1xf32>
    %159 = vector.shape_cast %158 : vector<1xf32> to vector<1x1x1xf32>
    %160 = vector.extract %159[0, 0, 0] : f32 from vector<1x1x1xf32>
    %c0_154 = arith.constant 0 : index
    %c0_155 = arith.constant 0 : index
    %161 = vector.load %arg11[%c0_154, %c0_155] : memref<1x1xf32, #tpu.memory_space<vmem>>, vector<1x1xf32>
    %162 = vector.extract %161[0, 0] : f32 from vector<1x1xf32>
    %163 = arith.addf %160, %162 : f32
    %164 = vector.broadcast %163 : f32 to vector<1x128xf32>
    %c0_156 = arith.constant 0 : index
    %c0_157 = arith.constant 0 : index
    %c0_158 = arith.constant 0 : index
    %165 = vector.load %arg12[%c0_156, %c0_157, %c0_158] : memref<1x1x128xf32, #tpu.memory_space<vmem>>, vector<1x1x128xf32>
    %166 = vector.shape_cast %165 : vector<1x1x128xf32> to vector<1x128xf32>
    %167 = vector.shape_cast %164 : vector<1x128xf32> to vector<1x1x128xf32>
    tpu.vector_store %arg12[%c0_156, %c0_157, %c0_158], %167 {strides = array<i32>} : memref<1x1x128xf32, #tpu.memory_space<vmem>>, vector<1x1x128xf32>,
    return
  }
  func.func @transform_0(%arg0: i32) -> (i32, i32, i32) {
    %c0_i32 = arith.constant 0 : i32
    %c0_i32_0 = arith.constant 0 : i32
    %c0_i32_1 = arith.constant 0 : i32
    return %arg0, %c0_i32, %c0_i32_0 : i32, i32, i32
  }
  func.func @transform_1(%arg0: i32) -> (i32, i32, i32) {
    %c0_i32 = arith.constant 0 : i32
    %c0_i32_0 = arith.constant 0 : i32
    %c0_i32_1 = arith.constant 0 : i32
    %c0_i32_2 = arith.constant 0 : i32
    return %c0_i32, %c0_i32_0, %c0_i32_1 : i32, i32, i32
  }
  func.func @transform_2(%arg0: i32) -> (i32, i32) {
    %c0_i32 = arith.constant 0 : i32
    %c0_i32_0 = arith.constant 0 : i32
    %c0_i32_1 = arith.constant 0 : i32
    return %c0_i32, %c0_i32_0 : i32, i32
  }
  func.func @transform_3(%arg0: i32) -> (i32, i32, i32) {
    %c0_i32 = arith.constant 0 : i32
    %c0_i32_0 = arith.constant 0 : i32
    %c0_i32_1 = arith.constant 0 : i32
    %c0_i32_2 = arith.constant 0 : i32
    return %c0_i32, %c0_i32_0, %c0_i32_1 : i32, i32, i32
  }
  func.func @transform_4(%arg0: i32) -> (i32, i32) {
    %c0_i32 = arith.constant 0 : i32
    %c0_i32_0 = arith.constant 0 : i32
    %c0_i32_1 = arith.constant 0 : i32
    return %c0_i32, %c0_i32_0 : i32, i32
  }
  func.func @transform_5(%arg0: i32) -> (i32, i32, i32) {
    %c0_i32 = arith.constant 0 : i32
    %c0_i32_0 = arith.constant 0 : i32
    %c0_i32_1 = arith.constant 0 : i32
    %c0_i32_2 = arith.constant 0 : i32
    return %c0_i32, %c0_i32_0, %c0_i32_1 : i32, i32, i32
  }
  func.func @transform_6(%arg0: i32) -> (i32, i32) {
    %c0_i32 = arith.constant 0 : i32
    %c0_i32_0 = arith.constant 0 : i32
    %c0_i32_1 = arith.constant 0 : i32
    return %c0_i32, %c0_i32_0 : i32, i32
  }
  func.func @transform_7(%arg0: i32) -> (i32, i32, i32) {
    %c0_i32 = arith.constant 0 : i32
    %c0_i32_0 = arith.constant 0 : i32
    %c0_i32_1 = arith.constant 0 : i32
    %c0_i32_2 = arith.constant 0 : i32
    return %c0_i32, %c0_i32_0, %c0_i32_1 : i32, i32, i32
  }
  func.func @transform_8(%arg0: i32) -> (i32, i32) {
    %c0_i32 = arith.constant 0 : i32
    %c0_i32_0 = arith.constant 0 : i32
    %c0_i32_1 = arith.constant 0 : i32
    return %c0_i32, %c0_i32_0 : i32, i32
  }
  func.func @transform_9(%arg0: i32) -> (i32, i32) {
    %c0_i32 = arith.constant 0 : i32
    %c0_i32_0 = arith.constant 0 : i32
    %c0_i32_1 = arith.constant 0 : i32
    return %c0_i32, %c0_i32_0 : i32, i32
  }
  func.func @transform_10(%arg0: i32) -> (i32, i32) {
    %c0_i32 = arith.constant 0 : i32
    %c0_i32_0 = arith.constant 0 : i32
    %c0_i32_1 = arith.constant 0 : i32
    return %c0_i32, %c0_i32_0 : i32, i32
  }
  func.func @transform_11(%arg0: i32) -> (i32, i32, i32) {
    %c0_i32 = arith.constant 0 : i32
    %c0_i32_0 = arith.constant 0 : i32
    %c0_i32_1 = arith.constant 0 : i32
    return %arg0, %c0_i32, %c0_i32_0 : i32, i32, i32
  }
}

</mosaic_0001>

<bundles_post_ra>
// kernel: discriminator_conv1d_forward.1
= control target key start
LH: loop header
LB: loop body
LE: loop exit
PB: predicated region body
PF: predicated region fallthrough
CT: control target
= control target key end

     0   :  { %s4650_s19 = smov 0   ;;  %s5727_s0 = inlined_call_operand.vmem [shape: f32[2,344,1], index: 0, kind: input, shape index: {}]   ;;  %s5728_s1 = inlined_call_operand.vmem [shape: f32[4,1,16], index: 1, kind: input, shape index: {}]   ;;  %s5729_s2 = inlined_call_operand.vmem [shape: f32[1,16], index: 2, kind: input, shape index: {}]   ;;  %s5730_s3 = inlined_call_operand.vmem [shape: f32[5,16,32], index: 3, kind: input, shape index: {}]   ;;  %s5731_s4 = inlined_call_operand.vmem [shape: f32[1,32], index: 4, kind: input, shape index: {}]   ;;  %s5732_s5 = inlined_call_operand.vmem [shape: f32[5,32,64], index: 5, kind: input, shape index: {}]   ;;  %s5733_s6 = inlined_call_operand.vmem [shape: f32[1,64], index: 6, kind: input, shape index: {}]   ;;  %s5734_s7 = inlined_call_operand.vmem [shape: f32[5,64,128], index: 7, kind: input, shape index: {}]   ;;  %s5735_s8 = inlined_call_operand.vmem [shape: f32[1,128], index: 8, kind: input, shape index: {}]   ;;  %s5736_s9 = inlined_call_operand.vmem [shape: f32[22,128], index: 9, kind: input, shape index: {}]   ;;  %s5737_s10 = inlined_call_operand.<no memory space> [shape: f32[1,1], index: 10, kind: input, shape index: {}]   ;;  %s5738_s11 = inlined_call_operand.vmem [shape: f32[2,1,128], index: 11, kind: output, shape index: {}]  }
   0x1   :  { %v16_v0 = vstv %s5737_s10 }
   0x2   :  { %17 = vst [vmem:[#allocation7] sm:$0x1] %v16_v0 }
   0x3 LB: > { %s3814_s20 = sadd.s32 4294967295, %s4582_s19   ;;  %p3818_p0 = scmp.ge.s32.totalorder %s4582_s19, 1  ;;  %s4582_s19 = sphi %s4650_s19, %s23_s19  }
   0x4   : > { %p339_p1 = scmp.lt.s32.totalorder %s4582_s19, 3 }
   0x6   : > { %p340_p2 = pnand %p3818_p0, %p339_p1 }
   0x7   : > { %p4660_p3 = scmp.lt.s32.totalorder (!%p340_p2), %s3814_s20, 1 }
   0x8   : > { %343 = sbr.rel (%p340_p2) target bundleno = 1362 (0x552), region = 64 }
   0xd   : > { %vm385_vm0 = vcmask 7168   ;;  %v4584_v1 = vmov 0   ;;  %v4585_v2 = vmov 0.0   ;;  %s5741_s20 = smov (!%p4660_p3, %s3814_s20), 1  ;;  %vm431_vm1 = vcmask 130048  }
   0xe   : > { %4575 = vset.pattern.permute.xlu1 %v4584_v1  ;;  %4574 = vset.pattern.permute.xlu0 %v4584_v1  ;;  %386 = vst.msk [vmem:[#allocation2] sm:$0xff] %vm385_vm0, %v4585_v2  ;;  %387 = vst.msk [vmem:[#allocation2 + $0x8] sm:$0xff] %vm385_vm0, %v4585_v2  ;;  %s4558_s21 = smul.u32 344, %s5741_s20  ;;  %vm429_vm2 = vcmask 3072   ;;  %vm4586_vm3 = vmmov 0   ;;  %vm454_vm8 = vcmask 122880   ;;  %s384_s29 = scalar_lea.vmem %s5738_s11, %s5741_s20 }
   0xf   : > { %388 = vst.msk [vmem:[#allocation2 + $0x10] sm:$0xff] %vm385_vm0, %v4585_v2  ;;  %389 = vst.msk [vmem:[#allocation2 + $0x18] sm:$0xff] %vm385_vm0, %v4585_v2  ;;  %4159 = vmatprep.subr.mxu0 %v4585_v2  ;;  %4554 = vmatprep.subr.mxu1 %v4585_v2 }
  0x10   : > { %390 = vst.msk [vmem:[#allocation2 + $0x20] sm:$0xff] %vm385_vm0, %v4585_v2  ;;  %391 = vst.msk [vmem:[#allocation2 + $0x28] sm:$0xff] %vm385_vm0, %v4585_v2  ;;  %s4762_s24 = scalar_lea.vmem %s5727_s0, %s4558_s21  ;;  %4163 = vmatprep.mubr.msk.f32.mxu0 %vm4586_vm3, %v4585_v2  ;;  %4203 = vmatprep.mubr.msk.f32.mxu1 %vm4586_vm3, %v4585_v2 }
  0x11   : > { %392 = vst.msk [vmem:[#allocation2 + $0x30] sm:$0xff] %vm385_vm0, %v4585_v2  ;;  %393 = vst.msk [vmem:[#allocation2 + $0x38] sm:$0xff] %vm385_vm0, %v4585_v2  ;;  %v477_v3 = vld [vmem:[%s4762_s24] sm:$0xff]  ;;  %v478_v4 = vld [vmem:[%s4762_s24 + $0x8] sm:$0xff] }
  0x12   : > { %394 = vst.msk [vmem:[#allocation2 + $0x40] sm:$0xff] %vm385_vm0, %v4585_v2  ;;  %395 = vst.msk [vmem:[#allocation2 + $0x48] sm:$0xff] %vm385_vm0, %v4585_v2  ;;  %v479_v5 = vld [vmem:[%s4762_s24 + $0x10] sm:$0xff]  ;;  %v480_v6 = vld [vmem:[%s4762_s24 + $0x18] sm:$0xff] }
  0x13   : > { %396 = vst.msk [vmem:[#allocation2 + $0x50] sm:$0xff] %vm385_vm0, %v4585_v2  ;;  %397 = vst.msk [vmem:[#allocation2 + $0x58] sm:$0xff] %vm385_vm0, %v4585_v2  ;;  %v482_v7 = vld [vmem:[%s4762_s24 + $0x28] sm:$0xff]  ;;  %v483_v8 = vld [vmem:[%s4762_s24 + $0x30] sm:$0xff] }
  0x14   : > { %398 = vst.msk [vmem:[#allocation2 + $0x60] sm:$0xff] %vm385_vm0, %v4585_v2  ;;  %399 = vst.msk [vmem:[#allocation2 + $0x68] sm:$0xff] %vm385_vm0, %v4585_v2  ;;  %v484_v9 = vld [vmem:[%s4762_s24 + $0x38] sm:$0xff]  ;;  %v481_v10 = vld [vmem:[%s4762_s24 + $0x20] sm:$0xff] }
  0x15   : > { %400 = vst.msk [vmem:[#allocation2 + $0x70] sm:$0xff] %vm385_vm0, %v4585_v2  ;;  %401 = vst.msk [vmem:[#allocation2 + $0x78] sm:$0xff] %vm385_vm0, %v4585_v2  ;;  %v486_v11 = vld [vmem:[%s4762_s24 + $0x48] sm:$0xff]  ;;  %v487_v12 = vld [vmem:[%s4762_s24 + $0x50] sm:$0xff] }
  0x16   : > { %402 = vst.msk [vmem:[#allocation2 + $0x80] sm:$0xff] %vm385_vm0, %v4585_v2  ;;  %403 = vst.msk [vmem:[#allocation2 + $0x88] sm:$0xff] %vm385_vm0, %v4585_v2  ;;  %v488_v13 = vld [vmem:[%s4762_s24 + $0x58] sm:$0xff]  ;;  %v485_v14 = vld [vmem:[%s4762_s24 + $0x40] sm:$0xff] }
  0x17   : > { %404 = vst.msk [vmem:[#allocation2 + $0x90] sm:$0xff] %vm385_vm0, %v4585_v2  ;;  %405 = vst.msk [vmem:[#allocation2 + $0x98] sm:$0xff] %vm385_vm0, %v4585_v2  ;;  %v490_v15 = vld [vmem:[%s4762_s24 + $0x68] sm:$0xff]  ;;  %v491_v16 = vld [vmem:[%s4762_s24 + $0x70] sm:$0xff] }
  0x18   : > { %406 = vst.msk [vmem:[#allocation2 + $0xa0] sm:$0xff] %vm385_vm0, %v4585_v2  ;;  %407 = vst.msk [vmem:[#allocation2 + $0xa8] sm:$0xff] %vm385_vm0, %v4585_v2  ;;  %v492_v17 = vld [vmem:[%s4762_s24 + $0x78] sm:$0xff]  ;;  %v489_v18 = vld [vmem:[%s4762_s24 + $0x60] sm:$0xff] }
  0x19   : > { %408 = vst.msk [vmem:[#allocation2 + $0xb0] sm:$0xff] %vm385_vm0, %v4585_v2  ;;  %409 = vst.msk [vmem:[#allocation2 + $0xb8] sm:$0xff] %vm385_vm0, %v4585_v2  ;;  %v494_v19 = vld [vmem:[%s4762_s24 + $0x88] sm:$0xff]  ;;  %v495_v20 = vld [vmem:[%s4762_s24 + $0x90] sm:$0xff] }
  0x1a   : > { %410 = vst.msk [vmem:[#allocation2 + $0xc0] sm:$0xff] %vm385_vm0, %v4585_v2  ;;  %411 = vst.msk [vmem:[#allocation2 + $0xc8] sm:$0xff] %vm385_vm0, %v4585_v2  ;;  %v496_v21 = vld [vmem:[%s4762_s24 + $0x98] sm:$0xff]  ;;  %v493_v22 = vld [vmem:[%s4762_s24 + $0x80] sm:$0xff] }
  0x1b   : > { %412 = vst.msk [vmem:[#allocation2 + $0xd0] sm:$0xff] %vm385_vm0, %v4585_v2  ;;  %413 = vst.msk [vmem:[#allocation2 + $0xd8] sm:$0xff] %vm385_vm0, %v4585_v2  ;;  %v498_v23 = vld [vmem:[%s4762_s24 + $0xa8] sm:$0xff]  ;;  %v499_v24 = vld [vmem:[%s4762_s24 + $0xb0] sm:$0xff] }
  0x1c   : > { %414 = vst.msk [vmem:[#allocation2 + $0xe0] sm:$0xff] %vm385_vm0, %v4585_v2  ;;  %415 = vst.msk [vmem:[#allocation2 + $0xe8] sm:$0xff] %vm385_vm0, %v4585_v2  ;;  %v500_v25 = vld [vmem:[%s4762_s24 + $0xb8] sm:$0xff]  ;;  %v497_v26 = vld [vmem:[%s4762_s24 + $0xa0] sm:$0xff] }
  0x1d   : > { %416 = vst.msk [vmem:[#allocation2 + $0xf0] sm:$0xff] %vm385_vm0, %v4585_v2  ;;  %417 = vst.msk [vmem:[#allocation2 + $0xf8] sm:$0xff] %vm385_vm0, %v4585_v2  ;;  %v502_v37 = vld [vmem:[%s4762_s24 + $0xc8] sm:$0xff]  ;;  %v503_v38 = vld [vmem:[%s4762_s24 + $0xd0] sm:$0xff] }
  0x1e   : > { %418 = vst.msk [vmem:[#allocation2 + $0x100] sm:$0xff] %vm385_vm0, %v4585_v2  ;;  %419 = vst.msk [vmem:[#allocation2 + $0x108] sm:$0xff] %vm385_vm0, %v4585_v2  ;;  %v504_v39 = vld [vmem:[%s4762_s24 + $0xd8] sm:$0xff]  ;;  %v501_v40 = vld [vmem:[%s4762_s24 + $0xc0] sm:$0xff] }
  0x1f   : > { %420 = vst.msk [vmem:[#allocation2 + $0x110] sm:$0xff] %vm385_vm0, %v4585_v2  ;;  %421 = vst.msk [vmem:[#allocation2 + $0x118] sm:$0xff] %vm385_vm0, %v4585_v2  ;;  %v506_v42 = vld [vmem:[%s4762_s24 + $0xe8] sm:$0xff]  ;;  %v507_v43 = vld [vmem:[%s4762_s24 + $0xf0] sm:$0xff] }
  0x20   : > { %422 = vst.msk [vmem:[#allocation2 + $0x120] sm:$0xff] %vm385_vm0, %v4585_v2  ;;  %423 = vst.msk [vmem:[#allocation2 + $0x128] sm:$0xff] %vm385_vm0, %v4585_v2  ;;  %v508_v45 = vld [vmem:[%s4762_s24 + $0xf8] sm:$0xff]  ;;  %v505_v46 = vld [vmem:[%s4762_s24 + $0xe0] sm:$0xff] }
  0x21   : > { %424 = vst.msk [vmem:[#allocation2 + $0x130] sm:$0xff] %vm385_vm0, %v4585_v2  ;;  %425 = vst.msk [vmem:[#allocation2 + $0x138] sm:$0xff] %vm385_vm0, %v4585_v2  ;;  %v510_v47 = vld [vmem:[%s4762_s24 + $0x108] sm:$0xff]  ;;  %v511_v48 = vld [vmem:[%s4762_s24 + $0x110] sm:$0xff] }
  0x22   : > { %426 = vst.msk [vmem:[#allocation2 + $0x140] sm:$0xff] %vm385_vm0, %v4585_v2  ;;  %427 = vst.msk [vmem:[#allocation2 + $0x148] sm:$0xff] %vm385_vm0, %v4585_v2  ;;  %v512_v49 = vld [vmem:[%s4762_s24 + $0x118] sm:$0xff]  ;;  %v509_v50 = vld [vmem:[%s4762_s24 + $0x100] sm:$0xff] }
  0x23   : > { %428 = vst.msk [vmem:[#allocation2 + $0x150] sm:$0xff] %vm385_vm0, %v4585_v2  ;;  %520 = vst.msk [vmem:[#allocation2 + $0x2] sm:$0xff] %vm385_vm0, %v477_v3  ;;  %v514_v51 = vld [vmem:[%s4762_s24 + $0x128] sm:$0xff]  ;;  %v515_v52 = vld [vmem:[%s4762_s24 + $0x130] sm:$0xff] }
  0x24   : > { %521 = vst.msk [vmem:[#allocation2 + $0xa] sm:$0xff] %vm385_vm0, %v478_v4  ;;  %522 = vst.msk [vmem:[#allocation2 + $0x12] sm:$0xff] %vm385_vm0, %v479_v5  ;;  %v516_v53 = vld [vmem:[%s4762_s24 + $0x138] sm:$0xff]  ;;  %v513_v56 = vld [vmem:[%s4762_s24 + $0x120] sm:$0xff] }
  0x25   : > { %523 = vst.msk [vmem:[#allocation2 + $0x1a] sm:$0xff] %vm385_vm0, %v480_v6  ;;  %525 = vst.msk [vmem:[#allocation2 + $0x2a] sm:$0xff] %vm385_vm0, %v482_v7  ;;  %v518_v57 = vld [vmem:[%s4762_s24 + $0x148] sm:$0xff]  ;;  %v519_v58 = vld [vmem:[%s4762_s24 + $0x150] sm:$0xff] }
  0x26   : > { %526 = vst.msk [vmem:[#allocation2 + $0x32] sm:$0xff] %vm385_vm0, %v483_v8  ;;  %527 = vst.msk [vmem:[#allocation2 + $0x3a] sm:$0xff] %vm385_vm0, %v484_v9  ;;  %v517_v59 = vld [vmem:[%s4762_s24 + $0x140] sm:$0xff]  ;;  %v3829_v3 = vld [vmem:[%s5730_s3 + $0x18] sm:$0xff] }
  0x27   : > { %524 = vst.msk [vmem:[#allocation2 + $0x22] sm:$0xff] %vm385_vm0, %v481_v10  ;;  %529 = vst.msk [vmem:[#allocation2 + $0x4a] sm:$0xff] %vm385_vm0, %v486_v11  ;;  %4160 = vmatpush3.msra.mxu0 %v3829_v3  ;;  %v3828_v4 = vld [vmem:[%s5730_s3 + $0x10] sm:$0xff]  ;;  %v4910_v11 = vld [vmem:[%s5730_s3 + $0x8] sm:$0xff] }
  0x28   : > { %530 = vst.msk [vmem:[#allocation2 + $0x52] sm:$0xff] %vm385_vm0, %v487_v12  ;;  %531 = vst.msk [vmem:[#allocation2 + $0x5a] sm:$0xff] %vm385_vm0, %v488_v13  ;;  %4161 = vmatprep.subr.mxu0 %v4585_v2  ;;  %4556 = vmatpush3.msra.mxu1 %v4910_v11  ;;  %v4916_v12 = vld [vmem:[%s5730_s3] sm:$0xff] }
  0x29   : > { %528 = vst.msk [vmem:[#allocation2 + $0x42] sm:$0xff] %vm385_vm0, %v485_v14  ;;  %533 = vst.msk [vmem:[#allocation2 + $0x6a] sm:$0xff] %vm385_vm0, %v490_v15  ;;  %4162 = vmatpush3.msra.mxu0 %v3828_v4  ;;  %4555 = vmatprep.subr.mxu1 %v4585_v2  ;;  %v4934_v4 = vld [vmem:[%s5728_s1 + $0x2] ss:$0 sm:$0xff] }
  0x2a   : > { %534 = vst.msk [vmem:[#allocation2 + $0x72] sm:$0xff] %vm385_vm0, %v491_v16  ;;  %535 = vst.msk [vmem:[#allocation2 + $0x7a] sm:$0xff] %vm385_vm0, %v492_v17  ;;  %4196 = vmatprep.subr.mxu0 %v4585_v2  ;;  %4557 = vmatpush3.msra.mxu1 %v4916_v12 }
  0x2b   : > { %532 = vst.msk [vmem:[#allocation2 + $0x62] sm:$0xff] %vm385_vm0, %v489_v18  ;;  %537 = vst.msk [vmem:[#allocation2 + $0x8a] sm:$0xff] %vm385_vm0, %v494_v19  ;;  %v768_v27 = vld [vmem:[#allocation2 + $0x1] ss:$2 sm:$0xff]  ;;  %v563_v28 = vld [vmem:[#allocation2] ss:$2 sm:$0xff]  ;;  %4270 = vmatprep.subr.mxu1 %v4585_v2 }
  0x2c   : > { %538 = vst.msk [vmem:[#allocation2 + $0x92] sm:$0xff] %vm385_vm0, %v495_v20  ;;  %539 = vst.msk [vmem:[#allocation2 + $0x9a] sm:$0xff] %vm385_vm0, %v496_v21  ;;  %815 = vperm.xlu1 %4575, %v768_v27   ;;  %609 = vperm.xlu0 %4574, %v563_v28   ;;  %v770_v29 = vld [vmem:[#allocation2 + $0x11] ss:$2 sm:$0xff]  ;;  %v565_v30 = vld [vmem:[#allocation2 + $0x10] ss:$2 sm:$0xff] }
  0x2d   : > { %536 = vst.msk [vmem:[#allocation2 + $0x82] sm:$0xff] %vm385_vm0, %v493_v22  ;;  %541 = vst.msk [vmem:[#allocation2 + $0xaa] sm:$0xff] %vm385_vm0, %v498_v23  ;;  %v976_v31 = vld [vmem:[#allocation2 + $0x12] ss:$2 sm:$0xff]  ;;  %v974_v32 = vld [vmem:[#allocation2 + $0x2] ss:$2 sm:$0xff] }
  0x2e   : > { %542 = vst.msk [vmem:[#allocation2 + $0xb2] sm:$0xff] %vm385_vm0, %v499_v24  ;;  %543 = vst.msk [vmem:[#allocation2 + $0xba] sm:$0xff] %vm385_vm0, %v500_v25  ;;  %v569_v33 = vld [vmem:[#allocation2 + $0x30] ss:$2 sm:$0xff]  ;;  %v567_v34 = vld [vmem:[#allocation2 + $0x20] ss:$2 sm:$0xff] }
  0x2f   : > { %540 = vst.msk [vmem:[#allocation2 + $0xa2] sm:$0xff] %vm385_vm0, %v497_v26  ;;  %v774_v35 = vld [vmem:[#allocation2 + $0x31] ss:$2 sm:$0xff]  ;;  %v772_v36 = vld [vmem:[#allocation2 + $0x21] ss:$2 sm:$0xff]  ;;  %545 = vst.msk [vmem:[#allocation2 + $0xca] sm:$0xff] %vm385_vm0, %v502_v37 }
  0x30   : > { %820 = vperm.xlu1 %4575, %v770_v29   ;;  %614 = vperm.xlu0 %4574, %v565_v30   ;;  %546 = vst.msk [vmem:[#allocation2 + $0xd2] sm:$0xff] %vm385_vm0, %v503_v38  ;;  %v1182_v41 = vld [vmem:[#allocation2 + $0x13] ss:$2 sm:$0xff]  ;;  %547 = vst.msk [vmem:[#allocation2 + $0xda] sm:$0xff] %vm385_vm0, %v504_v39  ;;  %v1180_v44 = vld [vmem:[#allocation2 + $0x3] ss:$2 sm:$0xff] }
  0x31   : > { %433 = vst.msk [vmem:[#allocation3 + $0x8] sm:$0xff] %vm431_vm1, %v4585_v2  ;;  %434 = vst.msk [vmem:[#allocation3 + $0x10] sm:$0xff] %vm431_vm1, %v4585_v2  ;;  %v980_v54 = vld [vmem:[#allocation2 + $0x32] ss:$2 sm:$0xff]  ;;  %v978_v55 = vld [vmem:[#allocation2 + $0x22] ss:$2 sm:$0xff] }
  0x32   : > { %432 = vst.msk [vmem:[#allocation3] sm:$0xff] %vm431_vm1, %v4585_v2  ;;  %435 = vst.msk [vmem:[#allocation3 + $0x18] sm:$0xff] %vm431_vm1, %v4585_v2  ;;  %v573_v60 = vld [vmem:[#allocation2 + $0x50] ss:$2 sm:$0xff]  ;;  %v571_v61 = vld [vmem:[#allocation2 + $0x40] ss:$2 sm:$0xff] }
  0x33   : > { %436 = vst.msk [vmem:[#allocation3 + $0x20] sm:$0xff] %vm431_vm1, %v4585_v2  ;;  %437 = vst.msk [vmem:[#allocation3 + $0x28] sm:$0xff] %vm431_vm1, %v4585_v2  ;;  %v778_v62 = vld [vmem:[#allocation2 + $0x51] ss:$2 sm:$0xff]  ;;  %v776_v63 = vld [vmem:[#allocation2 + $0x41] ss:$2 sm:$0xff] }
  0x34   : > { %1026 = vperm.xlu1 %4575, %v976_v31   ;;  %1021 = vperm.xlu0 %4574, %v974_v32   ;;  %438 = vst.msk [vmem:[#allocation3 + $0x30] sm:$0xff] %vm431_vm1, %v4585_v2  ;;  %439 = vst.msk [vmem:[#allocation3 + $0x38] sm:$0xff] %vm431_vm1, %v4585_v2  ;;  %v1186_v0 = vld [vmem:[#allocation2 + $0x33] ss:$2 sm:$0xff]  ;;  %v1184_v1 = vld [vmem:[#allocation2 + $0x23] ss:$2 sm:$0xff] }
  0x35   : > { %440 = vst.msk [vmem:[#allocation3 + $0x40] sm:$0xff] %vm431_vm1, %v4585_v2  ;;  %441 = vst.msk [vmem:[#allocation3 + $0x48] sm:$0xff] %vm431_vm1, %v4585_v2  ;;  %v984_v5 = vld [vmem:[#allocation2 + $0x52] ss:$2 sm:$0xff]  ;;  %v982_v6 = vld [vmem:[#allocation2 + $0x42] ss:$2 sm:$0xff] }
  0x36   : > { %442 = vst.msk [vmem:[#allocation3 + $0x50] sm:$0xff] %vm431_vm1, %v4585_v2  ;;  %443 = vst.msk [vmem:[#allocation3 + $0x58] sm:$0xff] %vm431_vm1, %v4585_v2  ;;  %v577_v7 = vld [vmem:[#allocation2 + $0x70] ss:$2 sm:$0xff]  ;;  %v575_v8 = vld [vmem:[#allocation2 + $0x60] ss:$2 sm:$0xff] }
  0x37   : > { %444 = vst.msk [vmem:[#allocation3 + $0x60] sm:$0xff] %vm431_vm1, %v4585_v2  ;;  %445 = vst.msk [vmem:[#allocation3 + $0x68] sm:$0xff] %vm431_vm1, %v4585_v2  ;;  %v782_v9 = vld [vmem:[#allocation2 + $0x71] ss:$2 sm:$0xff]  ;;  %v780_v10 = vld [vmem:[#allocation2 + $0x61] ss:$2 sm:$0xff] }
  0x38   : > { %624 = vperm.xlu1 %4575, %v569_v33   ;;  %619 = vperm.xlu0 %4574, %v567_v34   ;;  %446 = vst.msk [vmem:[#allocation3 + $0x70] sm:$0xff] %vm431_vm1, %v4585_v2  ;;  %447 = vst.msk [vmem:[#allocation3 + $0x78] sm:$0xff] %vm431_vm1, %v4585_v2  ;;  %v1190_v13 = vld [vmem:[#allocation2 + $0x53] ss:$2 sm:$0xff]  ;;  %v1188_v14 = vld [vmem:[#allocation2 + $0x43] ss:$2 sm:$0xff] }
  0x39   : > { %448 = vst.msk [vmem:[#allocation3 + $0x80] sm:$0xff] %vm431_vm1, %v4585_v2  ;;  %449 = vst.msk [vmem:[#allocation3 + $0x88] sm:$0xff] %vm431_vm1, %v4585_v2  ;;  %v988_v15 = vld [vmem:[#allocation2 + $0x72] ss:$2 sm:$0xff]  ;;  %v986_v16 = vld [vmem:[#allocation2 + $0x62] ss:$2 sm:$0xff] }
  0x3a   : > { %450 = vst.msk [vmem:[#allocation3 + $0x90] sm:$0xff] %vm431_vm1, %v4585_v2  ;;  %451 = vst.msk [vmem:[#allocation3 + $0x98] sm:$0xff] %vm431_vm1, %v4585_v2  ;;  %v581_v17 = vld [vmem:[#allocation2 + $0x90] ss:$2 sm:$0xff]  ;;  %v579_v18 = vld [vmem:[#allocation2 + $0x80] ss:$2 sm:$0xff] }
  0x3b   : > { %452 = vst.msk [vmem:[#allocation3 + $0xa0] sm:$0xff] %vm431_vm1, %v4585_v2  ;;  %453 = vst.msk [vmem:[#allocation3 + $0xa8] sm:$0xff] %vm431_vm1, %v4585_v2  ;;  %v786_v19 = vld [vmem:[#allocation2 + $0x91] ss:$2 sm:$0xff]  ;;  %v784_v20 = vld [vmem:[#allocation2 + $0x81] ss:$2 sm:$0xff] }
  0x3c   : > { %830 = vperm.xlu1 %4575, %v774_v35   ;;  %825 = vperm.xlu0 %4574, %v772_v36   ;;  %544 = vst.msk [vmem:[#allocation2 + $0xc2] sm:$0xff] %vm385_vm0, %v501_v40  ;;  %549 = vst.msk [vmem:[#allocation2 + $0xea] sm:$0xff] %vm385_vm0, %v506_v42  ;;  %v1194_v21 = vld [vmem:[#allocation2 + $0x73] ss:$2 sm:$0xff]  ;;  %v1192_v22 = vld [vmem:[#allocation2 + $0x63] ss:$2 sm:$0xff] }
  0x3d   : > { %550 = vst.msk [vmem:[#allocation2 + $0xf2] sm:$0xff] %vm385_vm0, %v507_v43  ;;  %551 = vst.msk [vmem:[#allocation2 + $0xfa] sm:$0xff] %vm385_vm0, %v508_v45  ;;  %v992_v23 = vld [vmem:[#allocation2 + $0x92] ss:$2 sm:$0xff]  ;;  %v990_v24 = vld [vmem:[#allocation2 + $0x82] ss:$2 sm:$0xff] }
  0x3e   : > { %548 = vst.msk [vmem:[#allocation2 + $0xe2] sm:$0xff] %vm385_vm0, %v505_v46  ;;  %553 = vst.msk [vmem:[#allocation2 + $0x10a] sm:$0xff] %vm385_vm0, %v510_v47  ;;  %v585_v25 = vld [vmem:[#allocation2 + $0xb0] ss:$2 sm:$0xff]  ;;  %v583_v26 = vld [vmem:[#allocation2 + $0xa0] ss:$2 sm:$0xff] }
  0x3f   : > { %554 = vst.msk [vmem:[#allocation2 + $0x112] sm:$0xff] %vm385_vm0, %v511_v48  ;;  %555 = vst.msk [vmem:[#allocation2 + $0x11a] sm:$0xff] %vm385_vm0, %v512_v49  ;;  %v790_v27 = vld [vmem:[#allocation2 + $0xb1] ss:$2 sm:$0xff]  ;;  %v788_v28 = vld [vmem:[#allocation2 + $0xa1] ss:$2 sm:$0xff] }
  0x40   : > { %1232 = vperm.xlu1 %4575, %v1182_v41   ;;  %1227 = vperm.xlu0 %4574, %v1180_v44   ;;  %552 = vst.msk [vmem:[#allocation2 + $0x102] sm:$0xff] %vm385_vm0, %v509_v50  ;;  %557 = vst.msk [vmem:[#allocation2 + $0x12a] sm:$0xff] %vm385_vm0, %v514_v51  ;;  %v1198_v29 = vld [vmem:[#allocation2 + $0x93] ss:$2 sm:$0xff]  ;;  %v1196_v30 = vld [vmem:[#allocation2 + $0x83] ss:$2 sm:$0xff] }
  0x41   : > { %430 = vst.msk [vmem:[#allocation2 + $0x158] sm:$0xf] %vm429_vm2, %v4585_v2  ;;  %v996_v31 = vld [vmem:[#allocation2 + $0xb2] ss:$2 sm:$0xff]  ;;  %v994_v32 = vld [vmem:[#allocation2 + $0xa2] ss:$2 sm:$0xff] }
  0x42   : > { %558 = vst.msk [vmem:[#allocation2 + $0x132] sm:$0xff] %vm385_vm0, %v515_v52  ;;  %559 = vst.msk [vmem:[#allocation2 + $0x13a] sm:$0xff] %vm385_vm0, %v516_v53  ;;  %v589_v33 = vld [vmem:[#allocation2 + $0xd0] ss:$2 sm:$0xff]  ;;  %v794_v35 = vld [vmem:[#allocation2 + $0xd1] ss:$2 sm:$0xff] }
  0x43   : > { %556 = vst.msk [vmem:[#allocation2 + $0x122] sm:$0xff] %vm385_vm0, %v513_v56  ;;  %561 = vst.msk [vmem:[#allocation2 + $0x14a] sm:$0xff] %vm385_vm0, %v518_v57  ;;  %v587_v34 = vld [vmem:[#allocation2 + $0xc0] ss:$2 sm:$0xff]  ;;  %v792_v36 = vld [vmem:[#allocation2 + $0xc1] ss:$2 sm:$0xff] }
  0x44   : > { %562 = vst.msk [vmem:[#allocation2 + $0x152] sm:$0xff] %vm385_vm0, %v519_v58  ;;  %560 = vst.msk [vmem:[#allocation2 + $0x142] sm:$0xff] %vm385_vm0, %v517_v59  ;;  %1036 = vperm.xlu1 %4575, %v980_v54   ;;  %1031 = vperm.xlu0 %4574, %v978_v55   ;;  %v1202_v37 = vld [vmem:[#allocation2 + $0xb3] ss:$2 sm:$0xff]  ;;  %v1200_v38 = vld [vmem:[#allocation2 + $0xa3] ss:$2 sm:$0xff] }
  0x45   : > { %v1000_v39 = vld [vmem:[#allocation2 + $0xd2] ss:$2 sm:$0xff]  ;;  %v998_v40 = vld [vmem:[#allocation2 + $0xc2] ss:$2 sm:$0xff]  ;;  %v798_v43 = vld [vmem:[#allocation2 + $0xf1] ss:$2 sm:$0xff] }
  0x46   : > { %v593_v41 = vld [vmem:[#allocation2 + $0xf0] ss:$2 sm:$0xff]  ;;  %v591_v42 = vld [vmem:[#allocation2 + $0xe0] ss:$2 sm:$0xff]  ;;  %v796_v44 = vld [vmem:[#allocation2 + $0xe1] ss:$2 sm:$0xff] }
  0x47   : > { %v1206_v45 = vld [vmem:[#allocation2 + $0xd3] ss:$2 sm:$0xff]  ;;  %v1204_v46 = vld [vmem:[#allocation2 + $0xc3] ss:$2 sm:$0xff]  ;;  %v1004_v47 = vld [vmem:[#allocation2 + $0xf2] ss:$2 sm:$0xff] }
  0x48   : > { %634 = vperm.xlu1 %4575, %v573_v60   ;;  %629 = vperm.xlu0 %4574, %v571_v61   ;;  %v1002_v48 = vld [vmem:[#allocation2 + $0xe2] ss:$2 sm:$0xff]  ;;  %v802_v53 = vld [vmem:[#allocation2 + $0x111] ss:$2 sm:$0xff]  ;;  %v800_v54 = vld [vmem:[#allocation2 + $0x101] ss:$2 sm:$0xff] }
  0x49   : > { %v597_v49 = vld [vmem:[#allocation2 + $0x110] ss:$2 sm:$0xff]  ;;  %v595_v50 = vld [vmem:[#allocation2 + $0x100] ss:$2 sm:$0xff]  ;;  %v1210_v57 = vld [vmem:[#allocation2 + $0xf3] ss:$2 sm:$0xff] }
  0x4a   : > { %v1208_v58 = vld [vmem:[#allocation2 + $0xe3] ss:$2 sm:$0xff]  ;;  %v1008_v61 = vld [vmem:[#allocation2 + $0x112] ss:$2 sm:$0xff]  ;;  %455 = vst.msk [vmem:[#allocation3 + $0xb0] sm:$0x1] %vm454_vm8, %v4585_v2 }
  0x4c   : > { %840 = vperm.xlu1 %4575, %v778_v62   ;;  %835 = vperm.xlu0 %4574, %v776_v63   ;;  %v1006_v62 = vld [vmem:[#allocation2 + $0x102] ss:$2 sm:$0xff]  ;;  %v4924_v63 = vld [vmem:[%s5728_s1 + $0x1] ss:$0 sm:$0xff] }
  0x50   : > { %1242 = vperm.xlu1 %4575, %v1186_v0   ;;  %1237 = vperm.xlu0 %4574, %v1184_v1   ;;  %v4929_v0 = vld [vmem:[%s5728_s1] ss:$0 sm:$0xff] }
  0x54   : > { %1046 = vperm.xlu1 %4575, %v984_v5   ;;  %1041 = vperm.xlu0 %4574, %v982_v6  }
  0x58   : > { %644 = vperm.xlu1 %4575, %v577_v7   ;;  %639 = vperm.xlu0 %4574, %v575_v8   ;;  %v601_v7 = vld [vmem:[#allocation2 + $0x130] ss:$2 sm:$0xff]  ;;  %v599_v8 = vld [vmem:[#allocation2 + $0x120] ss:$2 sm:$0xff] }
  0x5c   : > { %850 = vperm.xlu1 %4575, %v782_v9   ;;  %845 = vperm.xlu0 %4574, %v780_v10  }
  0x60   : > { %1252 = vperm.xlu1 %4575, %v1190_v13   ;;  %1247 = vperm.xlu0 %4574, %v1188_v14  }
  0x64   : > { %1056 = vperm.xlu1 %4575, %v988_v15   ;;  %1051 = vperm.xlu0 %4574, %v986_v16  }
  0x68   : > { %654 = vperm.xlu1 %4575, %v581_v17   ;;  %649 = vperm.xlu0 %4574, %v579_v18   ;;  %v4945_v18 = vld [vmem:[%s5728_s1 + $0x3] ss:$0 sm:$0xff] }
  0x6c   : > { %860 = vperm.xlu1 %4575, %v786_v19   ;;  %855 = vperm.xlu0 %4574, %v784_v20   ;;  %v806_v19 = vld [vmem:[#allocation2 + $0x131] ss:$2 sm:$0xff]  ;;  %v804_v20 = vld [vmem:[#allocation2 + $0x121] ss:$2 sm:$0xff] }
  0x70   : > { %1262 = vperm.xlu1 %4575, %v1194_v21   ;;  %1257 = vperm.xlu0 %4574, %v1192_v22  }
  0x74   : > { %1066 = vperm.xlu1 %4575, %v992_v23   ;;  %1061 = vperm.xlu0 %4574, %v990_v24  }
  0x78   : > { %664 = vperm.xlu1 %4575, %v585_v25   ;;  %659 = vperm.xlu0 %4574, %v583_v26  }
  0x7c   : > { %870 = vperm.xlu1 %4575, %v790_v27   ;;  %865 = vperm.xlu0 %4574, %v788_v28   ;;  %v4952_v28 = vld [vmem:[%s5729_s2] ss:$0 sm:$0xff] }
  0x80   : > { %1272 = vperm.xlu1 %4575, %v1198_v29   ;;  %1267 = vperm.xlu0 %4574, %v1196_v30   ;;  %v1214_v29 = vld [vmem:[#allocation2 + $0x113] ss:$2 sm:$0xff] }
  0x84   : > { %1076 = vperm.xlu1 %4575, %v996_v31   ;;  %1071 = vperm.xlu0 %4574, %v994_v32   ;;  %v1212_v32 = vld [vmem:[#allocation2 + $0x103] ss:$2 sm:$0xff] }
  0x88   : > { %674 = vperm.xlu1 %4575, %v589_v33   ;;  %669 = vperm.xlu0 %4574, %v587_v34  }
  0x8c   : > { %880 = vperm.xlu1 %4575, %v794_v35   ;;  %875 = vperm.xlu0 %4574, %v792_v36  }
  0x90   : > { %1282 = vperm.xlu1 %4575, %v1202_v37   ;;  %1277 = vperm.xlu0 %4574, %v1200_v38   ;;  %v1012_v37 = vld [vmem:[#allocation2 + $0x132] ss:$2 sm:$0xff]  ;;  %v1010_v38 = vld [vmem:[#allocation2 + $0x122] ss:$2 sm:$0xff] }
  0x94   : > { %1086 = vperm.xlu1 %4575, %v1000_v39   ;;  %1081 = vperm.xlu0 %4574, %v998_v40  }
  0x98   : > { %684 = vperm.xlu1 %4575, %v593_v41   ;;  %679 = vperm.xlu0 %4574, %v591_v42  }
  0x9c   : > { %890 = vperm.xlu1 %4575, %v798_v43   ;;  %885 = vperm.xlu0 %4574, %v796_v44  }
  0xa0   : > { %1292 = vperm.xlu1 %4575, %v1206_v45   ;;  %1287 = vperm.xlu0 %4574, %v1204_v46   ;;  %v605_v45 = vld [vmem:[#allocation2 + $0x150] ss:$2 sm:$0x1f] }
  0xa4   : > { %1096 = vperm.xlu1 %4575, %v1004_v47   ;;  %1091 = vperm.xlu0 %4574, %v1002_v48   ;;  %v603_v48 = vld [vmem:[#allocation2 + $0x140] ss:$2 sm:$0xff] }
  0xa7   : > { %v816_v51 = vpop.permute.xlu1 %815  ;;  %v610_v52 = vpop.permute.xlu0 %609 }
  0xa8   : > { %694 = vperm.xlu1 %4575, %v597_v49   ;;  %689 = vperm.xlu0 %4574, %v595_v50   ;;  %v929_v9 = vmul.f32 %v4924_v63, %v816_v51  ;;  %v723_v10 = vmul.f32 %v4929_v0, %v610_v52 }
  0xaa   : > { %v951_v21 = vadd.f32 %v929_v9, %v723_v10  ;;  %v1216_v9 = vld [vmem:[#allocation2 + $0x123] ss:$2 sm:$0xff] }
  0xab   : > { %v821_v55 = vpop.permute.xlu1 %820  ;;  %v615_v56 = vpop.permute.xlu0 %614 }
  0xac   : > { %900 = vperm.xlu1 %4575, %v802_v53   ;;  %895 = vperm.xlu0 %4574, %v800_v54   ;;  %v930_v5 = vmul.f32 %v4924_v63, %v821_v55  ;;  %v724_v6 = vmul.f32 %v4929_v0, %v615_v56  ;;  %v810_v55 = vld [vmem:[#allocation2 + $0x151] ss:$2 sm:$0x1f] }
  0xae   : > { %v952_v17 = vadd.f32 %v930_v5, %v724_v6  ;;  %v1218_v6 = vld [vmem:[#allocation2 + $0x133] ss:$2 sm:$0xff] }
  0xaf   : > { %v1027_v59 = vpop.permute.xlu1 %1026  ;;  %v1022_v60 = vpop.permute.xlu0 %1021 }
  0xb0   : > { %1302 = vperm.xlu1 %4575, %v1210_v57   ;;  %1297 = vperm.xlu0 %4574, %v1208_v58   ;;  %v1136_v13 = vmul.f32 %v4934_v4, %v1027_v59  ;;  %v1135_v16 = vmul.f32 %v4934_v4, %v1022_v60  ;;  %v808_v58 = vld [vmem:[#allocation2 + $0x141] ss:$2 sm:$0xff] }
  0xb2   : > { %v1158_v22 = vadd.f32 %v1136_v13, %v952_v17  ;;  %v1157_v25 = vadd.f32 %v1135_v16, %v951_v21  ;;  %v1016_v16 = vld [vmem:[#allocation2 + $0x152] ss:$2 sm:$0x1f]  ;;  %v1014_v17 = vld [vmem:[#allocation2 + $0x142] ss:$2 sm:$0xff] }
  0xb3   : > { %v625_v1 = vpop.permute.xlu1 %624  ;;  %v620_v3 = vpop.permute.xlu0 %619 }
  0xb4   : > { %1106 = vperm.xlu1 %4575, %v1008_v61   ;;  %1101 = vperm.xlu0 %4574, %v1006_v62   ;;  %v726_v51 = vmul.f32 %v4929_v0, %v625_v1  ;;  %v725_v52 = vmul.f32 %v4929_v0, %v620_v3 }
  0xb7   : > { %v831_v14 = vpop.permute.xlu1 %830  ;;  %v826_v15 = vpop.permute.xlu0 %825 }
  0xb8   : > { %704 = vperm.xlu1 %4575, %v601_v7   ;;  %699 = vperm.xlu0 %4574, %v599_v8   ;;  %v932_v46 = vmul.f32 %v4924_v63, %v831_v14  ;;  %v931_v47 = vmul.f32 %v4924_v63, %v826_v15 }
  0xba   : > { %v954_v56 = vadd.f32 %v932_v46, %v726_v51  ;;  %v953_v57 = vadd.f32 %v931_v47, %v725_v52 }
  0xbb   : > { %v1233_v23 = vpop.permute.xlu1 %1232  ;;  %v1228_v24 = vpop.permute.xlu0 %1227 }
  0xbc   : > { %v1342_v26 = vmul.f32 %v4945_v18, %v1233_v23  ;;  %v1341_v27 = vmul.f32 %v4945_v18, %v1228_v24  ;;  %910 = vperm.xlu1 %4575, %v806_v19   ;;  %905 = vperm.xlu0 %4574, %v804_v20   ;;  %v1222_v24 = vld [vmem:[#allocation2 + $0x153] ss:$2 sm:$0x1f] }
  0xbe   : > { %v1364_v30 = vadd.f32 %v1342_v26, %v1158_v22  ;;  %v1363_v31 = vadd.f32 %v1341_v27, %v1157_v25  ;;  %v1220_v26 = vld [vmem:[#allocation2 + $0x143] ss:$2 sm:$0xff] }
  0xbf   : > { %v1037_v33 = vpop.permute.xlu1 %1036  ;;  %v1032_v34 = vpop.permute.xlu0 %1031 }
  0xc0   : > { %v1393_v35 = vadd.f32 %v4952_v28, %v1364_v30  ;;  %v1392_v36 = vadd.f32 %v4952_v28, %v1363_v31  ;;  %1312 = vperm.xlu1 %4575, %v1214_v29   ;;  %1307 = vperm.xlu0 %4574, %v1212_v32   ;;  %v1138_v53 = vmul.f32 %v4934_v4, %v1037_v33 }
  0xc1   : > { %v1137_v54 = vmul.f32 %v4934_v4, %v1032_v34 }
  0xc2   : > { %vm1415_vm4 = vcmp.gt.f32.partialorder %v1393_v35, 0.0  ;;  %v1437_v39 = vmul.f32 0.2, %v1393_v35  ;;  %vm1414_vm5 = vcmp.gt.f32.partialorder %v1392_v36, 0.0  ;;  %v1436_v40 = vmul.f32 0.2, %v1392_v36 }
  0xc3   : > { %v4956_v41 = vpop.permute.xlu1 %634  ;;  %v4958_v42 = vpop.permute.xlu0 %629  ;;  %v1160_v61 = vadd.f32 %v1138_v53, %v954_v56  ;;  %v1159_v62 = vadd.f32 %v1137_v54, %v953_v57 }
  0xc4   : > { %v1459_v43 = vsel %vm1415_vm4, %v1393_v35, %v1437_v39  ;;  %v1458_v44 = vsel %vm1414_vm5, %v1392_v36, %v1436_v40  ;;  %1116 = vperm.xlu1 %4575, %v1012_v37   ;;  %1111 = vperm.xlu0 %4574, %v1010_v38   ;;  %v728_v30 = vmul.f32 %v4929_v0, %v4956_v41 }
  0xc5   : > { %1481 = vst.msk [vmem:[#allocation3 + $0xa] sm:$0xff] %vm431_vm1, %v1459_v43  ;;  %1480 = vst.msk [vmem:[#allocation3 + $0x2] sm:$0xff] %vm431_vm1, %v1458_v44  ;;  %v727_v31 = vmul.f32 %v4929_v0, %v4958_v42 }
  0xc7   : > { %v841_v49 = vpop.permute.xlu1 %840  ;;  %v836_v50 = vpop.permute.xlu0 %835 }
  0xc8   : > { %714 = vperm.xlu1 %4575, %v605_v45   ;;  %709 = vperm.xlu0 %4574, %v603_v48   ;;  %v934_v25 = vmul.f32 %v4924_v63, %v841_v49 }
  0xca   : > { %v956_v34 = vadd.f32 %v934_v25, %v728_v30 }
  0xcb   : > { %v1243_v59 = vpop.permute.xlu1 %1242  ;;  %v1238_v60 = vpop.permute.xlu0 %1237 }
  0xcc   : > { %v1344_v5 = vmul.f32 %v4945_v18, %v1243_v59  ;;  %v1343_v1 = vmul.f32 %v4945_v18, %v1238_v60  ;;  %920 = vperm.xlu1 %4575, %v810_v55   ;;  %v1527_v3 = vld [vmem:[#allocation3 + $0x1] ss:$2 sm:$0xff]  ;;  %915 = vperm.xlu0 %4574, %v808_v58   ;;  %v3866_v58 = vld [vmem:[%s5730_s3 + $0x38] sm:$0xff] }
  0xcd   : > { %4164 = vmatmul.mubr.msk.f32.vlgmr.msra.gmra.mxu0 %vm431_vm1, %v1527_v3 }
  0xce   : > { %v1366_v7 = vadd.f32 %v1344_v5, %v1160_v61  ;;  %v1365_v8 = vadd.f32 %v1343_v1, %v1159_v62  ;;  %4166 = vmatprep.mubr.msk.f32.mxu0 %vm4586_vm3, %v4585_v2  ;;  %4197 = vmatpush3.msra.mxu0 %v4910_v11  ;;  %v3865_v61 = vld [vmem:[%s5730_s3 + $0x30] sm:$0xff] }
  0xcf   : > { %v1047_v10 = vpop.permute.xlu1 %1046  ;;  %v1042_v13 = vpop.permute.xlu0 %1041  ;;  %4198 = vmatprep.subr.mxu0 %v4585_v2 }
  0xd0   : > { %v1395_v14 = vadd.f32 %v4952_v28, %v1366_v7  ;;  %v1394_v15 = vadd.f32 %v4952_v28, %v1365_v8  ;;  %1322 = vperm.xlu1 %4575, %v1218_v6   ;;  %1317 = vperm.xlu0 %4574, %v1216_v9   ;;  %v1140_v32 = vmul.f32 %v4934_v4, %v1047_v10 }
  0xd1   : > { %4199 = vmatpush3.msra.mxu0 %v4916_v12  ;;  %v933_v12 = vmul.f32 %v4924_v63, %v836_v50  ;;  %v1139_v33 = vmul.f32 %v4934_v4, %v1042_v13 }
  0xd2   : > { %vm1417_vm6 = vcmp.gt.f32.partialorder %v1395_v14, 0.0  ;;  %v1439_v19 = vmul.f32 0.2, %v1395_v14  ;;  %vm1416_vm7 = vcmp.gt.f32.partialorder %v1394_v15, 0.0  ;;  %v1438_v20 = vmul.f32 0.2, %v1394_v15  ;;  %4233 = vmatprep.subr.mxu0 %v4585_v2 }
  0xd3   : > { %v645_v11 = vpop.permute.xlu1 %644  ;;  %v640_v21 = vpop.permute.xlu0 %639  ;;  %v955_v35 = vadd.f32 %v933_v12, %v727_v31  ;;  %v1162_v38 = vadd.f32 %v1140_v32, %v956_v34 }
  0xd4   : > { %v1461_v22 = vsel %vm1417_vm6, %v1395_v14, %v1439_v19  ;;  %v1460_v23 = vsel %vm1416_vm7, %v1394_v15, %v1438_v20  ;;  %1126 = vperm.xlu1 %4575, %v1016_v16   ;;  %1121 = vperm.xlu0 %4574, %v1014_v17   ;;  %v730_v62 = vmul.f32 %v4929_v0, %v645_v11 }
  0xd5   : > { %1483 = vst.msk [vmem:[#allocation3 + $0x1a] sm:$0xff] %vm431_vm1, %v1461_v22  ;;  %1482 = vst.msk [vmem:[#allocation3 + $0x12] sm:$0xff] %vm431_vm1, %v1460_v23  ;;  %v1161_v39 = vadd.f32 %v1139_v33, %v955_v35  ;;  %v729_v5 = vmul.f32 %v4929_v0, %v640_v21 }
  0xd7   : > { %v851_v27 = vpop.permute.xlu1 %850  ;;  %v846_v29 = vpop.permute.xlu0 %845 }
  0xd8   : > { %1332 = vperm.xlu1 %4575, %v1222_v24   ;;  %1327 = vperm.xlu0 %4574, %v1220_v26   ;;  %v936_v56 = vmul.f32 %v4924_v63, %v851_v27  ;;  %v935_v57 = vmul.f32 %v4924_v63, %v846_v29 }
  0xda   : > { %v958_v6 = vadd.f32 %v936_v56, %v730_v62  ;;  %v957_v7 = vadd.f32 %v935_v57, %v729_v5 }
  0xdb   : > { %v1253_v36 = vpop.permute.xlu1 %1252  ;;  %v1248_v37 = vpop.permute.xlu0 %1247 }
  0xdc   : > { %v1346_v40 = vmul.f32 %v4945_v18, %v1253_v36  ;;  %v1345_v43 = vmul.f32 %v4945_v18, %v1248_v37  ;;  %v1529_v41 = vld [vmem:[#allocation3 + $0x11] ss:$2 sm:$0xff]  ;;  %v1505_v44 = vld [vmem:[#allocation3 + $0x10] ss:$2 sm:$0xff] }
  0xdd   : > { %4167 = vmatmul.mubr.msk.f32.gmra.mxu0 %vm431_vm1, %v1529_v41  ;;  %4204 = vmatmul.mubr.msk.f32.vlgmr.msra.gmra.mxu1 %vm431_vm1, %v1505_v44 }
  0xde   : > { %v1368_v42 = vadd.f32 %v1346_v40, %v1162_v38  ;;  %v1367_v45 = vadd.f32 %v1345_v43, %v1161_v39  ;;  %4169 = vmatprep.mubr.msk.f32.mxu0 %vm4586_vm3, %v4585_v2  ;;  %4206 = vmatprep.mubr.msk.f32.mxu1 %vm4586_vm3, %v4585_v2 }
  0xdf   : > { %v1057_v46 = vpop.permute.xlu1 %1056  ;;  %v1052_v47 = vpop.permute.xlu0 %1051  ;;  %4271 = vmatpush3.msra.mxu1 %v3866_v58 }
  0xe0   : > { %v1397_v48 = vadd.f32 %v4952_v28, %v1368_v42  ;;  %v1396_v49 = vadd.f32 %v4952_v28, %v1367_v45  ;;  %v1142_v1 = vmul.f32 %v4934_v4, %v1057_v46  ;;  %v1141_v3 = vmul.f32 %v4934_v4, %v1052_v47  ;;  %4272 = vmatprep.subr.mxu1 %v4585_v2 }
  0xe1   : > { %4273 = vmatpush3.msra.mxu1 %v3865_v61 }
  0xe2   : > { %vm1419_vm9 = vcmp.gt.f32.partialorder %v1397_v48, 0.0  ;;  %v1441_v50 = vmul.f32 0.2, %v1397_v48  ;;  %vm1418_vm10 = vcmp.gt.f32.partialorder %v1396_v49, 0.0  ;;  %v1440_v51 = vmul.f32 0.2, %v1396_v49 }
  0xe3   : > { %v655_v52 = vpop.permute.xlu1 %654  ;;  %v650_v53 = vpop.permute.xlu0 %649  ;;  %v1164_v10 = vadd.f32 %v1142_v1, %v958_v6  ;;  %v1163_v13 = vadd.f32 %v1141_v3, %v957_v7 }
  0xe4   : > { %v1463_v54 = vsel %vm1419_vm9, %v1397_v48, %v1441_v50  ;;  %v1462_v55 = vsel %vm1418_vm10, %v1396_v49, %v1440_v51  ;;  %v732_v34 = vmul.f32 %v4929_v0, %v655_v52  ;;  %v731_v35 = vmul.f32 %v4929_v0, %v650_v53 }
  0xe5   : > { %1485 = vst.msk [vmem:[#allocation3 + $0x2a] sm:$0xff] %vm431_vm1, %v1463_v54  ;;  %1484 = vst.msk [vmem:[#allocation3 + $0x22] sm:$0xff] %vm431_vm1, %v1462_v55 }
  0xe7   : > { %v861_v59 = vpop.permute.xlu1 %860  ;;  %v856_v60 = vpop.permute.xlu0 %855 }
  0xe8   : > { %v938_v30 = vmul.f32 %v4924_v63, %v861_v59  ;;  %v937_v31 = vmul.f32 %v4924_v63, %v856_v60 }
  0xea   : > { %v960_v38 = vadd.f32 %v938_v30, %v732_v34  ;;  %v959_v39 = vadd.f32 %v937_v31, %v731_v35 }
  0xeb   : > { %v1263_v8 = vpop.permute.xlu1 %1262  ;;  %v1258_v9 = vpop.permute.xlu0 %1257 }
  0xec   : > { %v1348_v14 = vmul.f32 %v4945_v18, %v1263_v8  ;;  %v1347_v15 = vmul.f32 %v4945_v18, %v1258_v9  ;;  %v1531_v16 = vld [vmem:[#allocation3 + $0x21] ss:$2 sm:$0xff]  ;;  %v1507_v17 = vld [vmem:[#allocation3 + $0x20] ss:$2 sm:$0xff] }
  0xed   : > { %4170 = vmatmul.mubr.msk.f32.gmra.mxu0 %vm431_vm1, %v1531_v16  ;;  %4207 = vmatmul.mubr.msk.f32.gmra.mxu1 %vm431_vm1, %v1507_v17 }
  0xee   : > { %v1370_v19 = vadd.f32 %v1348_v14, %v1164_v10  ;;  %v1369_v20 = vadd.f32 %v1347_v15, %v1163_v13  ;;  %4172 = vmatprep.mubr.msk.f32.mxu0 %vm4586_vm3, %v4585_v2  ;;  %4209 = vmatprep.mubr.msk.f32.mxu1 %vm4586_vm3, %v4585_v2 }
  0xef   : > { %v1067_v11 = vpop.permute.xlu1 %1066  ;;  %v1062_v21 = vpop.permute.xlu0 %1061 }
  0xf0   : > { %v1399_v22 = vadd.f32 %v4952_v28, %v1370_v19  ;;  %v1398_v23 = vadd.f32 %v4952_v28, %v1369_v20  ;;  %v1144_v36 = vmul.f32 %v4934_v4, %v1067_v11  ;;  %v1143_v37 = vmul.f32 %v4934_v4, %v1062_v21 }
  0xf2   : > { %vm1421_vm11 = vcmp.gt.f32.partialorder %v1399_v22, 0.0  ;;  %v1443_v24 = vmul.f32 0.2, %v1399_v22  ;;  %vm1420_vm12 = vcmp.gt.f32.partialorder %v1398_v23, 0.0  ;;  %v1442_v25 = vmul.f32 0.2, %v1398_v23 }
  0xf3   : > { %v665_v12 = vpop.permute.xlu1 %664  ;;  %v660_v26 = vpop.permute.xlu0 %659  ;;  %v1166_v41 = vadd.f32 %v1144_v36, %v960_v38  ;;  %v1165_v44 = vadd.f32 %v1143_v37, %v959_v39 }
  0xf4   : > { %v1465_v27 = vsel %vm1421_vm11, %v1399_v22, %v1443_v24  ;;  %v1464_v29 = vsel %vm1420_vm12, %v1398_v23, %v1442_v25  ;;  %v734_v1 = vmul.f32 %v4929_v0, %v665_v12  ;;  %v733_v3 = vmul.f32 %v4929_v0, %v660_v26 }
  0xf5   : > { %1487 = vst.msk [vmem:[#allocation3 + $0x3a] sm:$0xff] %vm431_vm1, %v1465_v27  ;;  %1486 = vst.msk [vmem:[#allocation3 + $0x32] sm:$0xff] %vm431_vm1, %v1464_v29  ;;  %vm1501_vm11 = vcmask 126976  }
  0xf7   : > { %v871_v32 = vpop.permute.xlu1 %870  ;;  %v866_v33 = vpop.permute.xlu0 %865 }
  0xf8   : > { %v940_v60 = vmul.f32 %v4924_v63, %v871_v32  ;;  %v939_v61 = vmul.f32 %v4924_v63, %v866_v33 }
  0xfa   : > { %v962_v8 = vadd.f32 %v940_v60, %v734_v1  ;;  %v961_v9 = vadd.f32 %v939_v61, %v733_v3 }
  0xfb   : > { %v1273_v40 = vpop.permute.xlu1 %1272  ;;  %v1268_v43 = vpop.permute.xlu0 %1267 }
  0xfc   : > { %v1350_v42 = vmul.f32 %v4945_v18, %v1273_v40  ;;  %v1349_v45 = vmul.f32 %v4945_v18, %v1268_v43  ;;  %v1533_v46 = vld [vmem:[#allocation3 + $0x31] ss:$2 sm:$0xff]  ;;  %v1509_v47 = vld [vmem:[#allocation3 + $0x30] ss:$2 sm:$0xff] }
  0xfd   : > { %4173 = vmatmul.mubr.msk.f32.gmra.mxu0 %vm431_vm1, %v1533_v46  ;;  %4210 = vmatmul.mubr.msk.f32.gmra.mxu1 %vm431_vm1, %v1509_v47 }
  0xfe   : > { %v1372_v48 = vadd.f32 %v1350_v42, %v1166_v41  ;;  %v1371_v49 = vadd.f32 %v1349_v45, %v1165_v44  ;;  %4175 = vmatprep.mubr.msk.f32.mxu0 %vm4586_vm3, %v4585_v2  ;;  %4212 = vmatprep.mubr.msk.f32.mxu1 %vm4586_vm3, %v4585_v2 }
  0xff   : > { %v1077_v50 = vpop.permute.xlu1 %1076  ;;  %v1072_v51 = vpop.permute.xlu0 %1071 }
 0x100   : > { %v1401_v52 = vadd.f32 %v4952_v28, %v1372_v48  ;;  %v1400_v53 = vadd.f32 %v4952_v28, %v1371_v49  ;;  %v1146_v6 = vmul.f32 %v4934_v4, %v1077_v50  ;;  %v1145_v7 = vmul.f32 %v4934_v4, %v1072_v51 }
 0x102   : > { %vm1423_vm13 = vcmp.gt.f32.partialorder %v1401_v52, 0.0  ;;  %v1445_v54 = vmul.f32 0.2, %v1401_v52  ;;  %vm1422_vm14 = vcmp.gt.f32.partialorder %v1400_v53, 0.0  ;;  %v1444_v55 = vmul.f32 0.2, %v1400_v53 }
 0x103   : > { %v675_v56 = vpop.permute.xlu1 %674  ;;  %v670_v57 = vpop.permute.xlu0 %669  ;;  %v1168_v14 = vadd.f32 %v1146_v6, %v962_v8  ;;  %v1167_v15 = vadd.f32 %v1145_v7, %v961_v9 }
 0x104   : > { %v1467_v58 = vsel %vm1423_vm13, %v1401_v52, %v1445_v54  ;;  %v1466_v59 = vsel %vm1422_vm14, %v1400_v53, %v1444_v55  ;;  %v736_v36 = vmul.f32 %v4929_v0, %v675_v56  ;;  %v735_v37 = vmul.f32 %v4929_v0, %v670_v57 }
 0x105   : > { %1489 = vst.msk [vmem:[#allocation3 + $0x4a] sm:$0xff] %vm431_vm1, %v1467_v58  ;;  %1488 = vst.msk [vmem:[#allocation3 + $0x42] sm:$0xff] %vm431_vm1, %v1466_v59  ;;  %vm456_vm14 = vcmask 261120  }
 0x106   : > { %457 = vst.msk [vmem:[#allocation4] sm:$0xff] %vm456_vm14, %v4585_v2  ;;  %458 = vst.msk [vmem:[#allocation4 + $0x8] sm:$0xff] %vm456_vm14, %v4585_v2 }
 0x107   : > { %v881_v62 = vpop.permute.xlu1 %880  ;;  %v876_v5 = vpop.permute.xlu0 %875  ;;  %459 = vst.msk [vmem:[#allocation4 + $0x10] sm:$0xff] %vm456_vm14, %v4585_v2  ;;  %460 = vst.msk [vmem:[#allocation4 + $0x18] sm:$0xff] %vm456_vm14, %v4585_v2 }
 0x108   : > { %v942_v32 = vmul.f32 %v4924_v63, %v881_v62  ;;  %v941_v33 = vmul.f32 %v4924_v63, %v876_v5  ;;  %461 = vst.msk [vmem:[#allocation4 + $0x20] sm:$0xff] %vm456_vm14, %v4585_v2  ;;  %462 = vst.msk [vmem:[#allocation4 + $0x28] sm:$0xff] %vm456_vm14, %v4585_v2 }
 0x109   : > { %463 = vst.msk [vmem:[#allocation4 + $0x30] sm:$0xff] %vm456_vm14, %v4585_v2  ;;  %464 = vst.msk [vmem:[#allocation4 + $0x38] sm:$0xff] %vm456_vm14, %v4585_v2 }
 0x10a   : > { %v964_v40 = vadd.f32 %v942_v32, %v736_v36  ;;  %v963_v43 = vadd.f32 %v941_v33, %v735_v37  ;;  %465 = vst.msk [vmem:[#allocation4 + $0x40] sm:$0xff] %vm456_vm14, %v4585_v2  ;;  %466 = vst.msk [vmem:[#allocation4 + $0x48] sm:$0xff] %vm456_vm14, %v4585_v2 }
 0x10b   : > { %v1283_v10 = vpop.permute.xlu1 %1282  ;;  %v1278_v13 = vpop.permute.xlu0 %1277  ;;  %467 = vst.msk [vmem:[#allocation4 + $0x50] sm:$0xff] %vm456_vm14, %v4585_v2 }
 0x10c   : > { %v1352_v16 = vmul.f32 %v4945_v18, %v1283_v10  ;;  %v1351_v17 = vmul.f32 %v4945_v18, %v1278_v13  ;;  %v1535_v19 = vld [vmem:[#allocation3 + $0x41] ss:$2 sm:$0xff]  ;;  %v1511_v20 = vld [vmem:[#allocation3 + $0x40] ss:$2 sm:$0xff] }
 0x10d   : > { %4176 = vmatmul.mubr.msk.f32.gmra.mxu0 %vm431_vm1, %v1535_v19  ;;  %4213 = vmatmul.mubr.msk.f32.gmra.mxu1 %vm431_vm1, %v1511_v20 }
 0x10e   : > { %v1374_v11 = vadd.f32 %v1352_v16, %v1168_v14  ;;  %v1373_v21 = vadd.f32 %v1351_v17, %v1167_v15  ;;  %4178 = vmatprep.mubr.msk.f32.mxu0 %vm4586_vm3, %v4585_v2  ;;  %4215 = vmatprep.mubr.msk.f32.mxu1 %vm4586_vm3, %v4585_v2 }
 0x10f   : > { %v1087_v22 = vpop.permute.xlu1 %1086  ;;  %v1082_v23 = vpop.permute.xlu0 %1081 }
 0x110   : > { %v1403_v24 = vadd.f32 %v4952_v28, %v1374_v11  ;;  %v1402_v25 = vadd.f32 %v4952_v28, %v1373_v21  ;;  %v1148_v38 = vmul.f32 %v4934_v4, %v1087_v22  ;;  %v1147_v39 = vmul.f32 %v4934_v4, %v1082_v23 }
 0x112   : > { %vm1425_vm15 = vcmp.gt.f32.partialorder %v1403_v24, 0.0  ;;  %v1447_v12 = vmul.f32 0.2, %v1403_v24  ;;  %vm1424_vm0 = vcmp.gt.f32.partialorder %v1402_v25, 0.0  ;;  %v1446_v26 = vmul.f32 0.2, %v1402_v25 }
 0x113   : > { %v685_v27 = vpop.permute.xlu1 %684  ;;  %v680_v29 = vpop.permute.xlu0 %679  ;;  %v1170_v42 = vadd.f32 %v1148_v38, %v964_v40  ;;  %v1169_v45 = vadd.f32 %v1147_v39, %v963_v43 }
 0x114   : > { %v1469_v30 = vsel %vm1425_vm15, %v1403_v24, %v1447_v12  ;;  %v1468_v31 = vsel %vm1424_vm0, %v1402_v25, %v1446_v26  ;;  %v738_v6 = vmul.f32 %v4929_v0, %v685_v27  ;;  %v737_v7 = vmul.f32 %v4929_v0, %v680_v29 }
 0x115   : > { %1491 = vst.msk [vmem:[#allocation3 + $0x5a] sm:$0xff] %vm431_vm1, %v1469_v30  ;;  %1490 = vst.msk [vmem:[#allocation3 + $0x52] sm:$0xff] %vm431_vm1, %v1468_v31 }
 0x117   : > { %v891_v34 = vpop.permute.xlu1 %890  ;;  %v886_v35 = vpop.permute.xlu0 %885 }
 0x118   : > { %v944_v62 = vmul.f32 %v4924_v63, %v891_v34  ;;  %v943_v5 = vmul.f32 %v4924_v63, %v886_v35 }
 0x11a   : > { %v966_v10 = vadd.f32 %v944_v62, %v738_v6  ;;  %v965_v13 = vadd.f32 %v943_v5, %v737_v7 }
 0x11b   : > { %v1293_v41 = vpop.permute.xlu1 %1292  ;;  %v1288_v44 = vpop.permute.xlu0 %1287 }
 0x11c   : > { %v1354_v46 = vmul.f32 %v4945_v18, %v1293_v41  ;;  %v1353_v47 = vmul.f32 %v4945_v18, %v1288_v44  ;;  %v1537_v48 = vld [vmem:[#allocation3 + $0x51] ss:$2 sm:$0xff]  ;;  %v1513_v49 = vld [vmem:[#allocation3 + $0x50] ss:$2 sm:$0xff] }
 0x11d   : > { %4179 = vmatmul.mubr.msk.f32.gmra.mxu0 %vm431_vm1, %v1537_v48  ;;  %4216 = vmatmul.mubr.msk.f32.gmra.mxu1 %vm431_vm1, %v1513_v49 }
 0x11e   : > { %v1376_v50 = vadd.f32 %v1354_v46, %v1170_v42  ;;  %v1375_v51 = vadd.f32 %v1353_v47, %v1169_v45  ;;  %4181 = vmatprep.mubr.msk.f32.mxu0 %vm4586_vm3, %v4585_v2  ;;  %4218 = vmatprep.mubr.msk.f32.mxu1 %vm4586_vm3, %v4585_v2 }
 0x11f   : > { %v1097_v52 = vpop.permute.xlu1 %1096  ;;  %v1092_v53 = vpop.permute.xlu0 %1091 }
 0x120   : > { %v1405_v54 = vadd.f32 %v4952_v28, %v1376_v50  ;;  %v1404_v55 = vadd.f32 %v4952_v28, %v1375_v51  ;;  %v1150_v8 = vmul.f32 %v4934_v4, %v1097_v52  ;;  %v1149_v9 = vmul.f32 %v4934_v4, %v1092_v53 }
 0x122   : > { %vm1427_vm2 = vcmp.gt.f32.partialorder %v1405_v54, 0.0  ;;  %v1449_v56 = vmul.f32 0.2, %v1405_v54  ;;  %vm1426_vm4 = vcmp.gt.f32.partialorder %v1404_v55, 0.0  ;;  %v1448_v57 = vmul.f32 0.2, %v1404_v55 }
 0x123   : > { %v695_v58 = vpop.permute.xlu1 %694  ;;  %v690_v59 = vpop.permute.xlu0 %689  ;;  %v1172_v16 = vadd.f32 %v1150_v8, %v966_v10  ;;  %v1171_v17 = vadd.f32 %v1149_v9, %v965_v13 }
 0x124   : > { %v1471_v60 = vsel %vm1427_vm2, %v1405_v54, %v1449_v56  ;;  %v1470_v61 = vsel %vm1426_vm4, %v1404_v55, %v1448_v57  ;;  %v740_v38 = vmul.f32 %v4929_v0, %v695_v58  ;;  %v739_v40 = vmul.f32 %v4929_v0, %v690_v59 }
 0x125   : > { %1493 = vst.msk [vmem:[#allocation3 + $0x6a] sm:$0xff] %vm431_vm1, %v1471_v60  ;;  %1492 = vst.msk [vmem:[#allocation3 + $0x62] sm:$0xff] %vm431_vm1, %v1470_v61 }
 0x127   : > { %v901_v1 = vpop.permute.xlu1 %900  ;;  %v896_v3 = vpop.permute.xlu0 %895 }
 0x128   : > { %v946_v34 = vmul.f32 %v4924_v63, %v901_v1  ;;  %v945_v35 = vmul.f32 %v4924_v63, %v896_v3 }
 0x12a   : > { %v968_v41 = vadd.f32 %v946_v34, %v740_v38  ;;  %v967_v44 = vadd.f32 %v945_v35, %v739_v40 }
 0x12b   : > { %v1303_v14 = vpop.permute.xlu1 %1302  ;;  %v1298_v15 = vpop.permute.xlu0 %1297 }
 0x12c   : > { %v1356_v19 = vmul.f32 %v4945_v18, %v1303_v14  ;;  %v1355_v20 = vmul.f32 %v4945_v18, %v1298_v15  ;;  %v1539_v11 = vld [vmem:[#allocation3 + $0x61] ss:$2 sm:$0xff]  ;;  %v1515_v21 = vld [vmem:[#allocation3 + $0x60] ss:$2 sm:$0xff] }
 0x12d   : > { %4182 = vmatmul.mubr.msk.f32.gmra.mxu0 %vm431_vm1, %v1539_v11  ;;  %4219 = vmatmul.mubr.msk.f32.gmra.mxu1 %vm431_vm1, %v1515_v21 }
 0x12e   : > { %v1378_v22 = vadd.f32 %v1356_v19, %v1172_v16  ;;  %v1377_v23 = vadd.f32 %v1355_v20, %v1171_v17  ;;  %4184 = vmatprep.mubr.msk.f32.mxu0 %vm4586_vm3, %v4585_v2  ;;  %4221 = vmatprep.mubr.msk.f32.mxu1 %vm4586_vm3, %v4585_v2 }
 0x12f   : > { %v1107_v24 = vpop.permute.xlu1 %1106  ;;  %v1102_v25 = vpop.permute.xlu0 %1101 }
 0x130   : > { %v1407_v12 = vadd.f32 %v4952_v28, %v1378_v22  ;;  %v1406_v26 = vadd.f32 %v4952_v28, %v1377_v23  ;;  %v1152_v39 = vmul.f32 %v4934_v4, %v1107_v24  ;;  %v1151_v43 = vmul.f32 %v4934_v4, %v1102_v25 }
 0x132   : > { %vm1429_vm5 = vcmp.gt.f32.partialorder %v1407_v12, 0.0  ;;  %v1451_v27 = vmul.f32 0.2, %v1407_v12  ;;  %vm1428_vm6 = vcmp.gt.f32.partialorder %v1406_v26, 0.0  ;;  %v1450_v29 = vmul.f32 0.2, %v1406_v26 }
 0x133   : > { %v705_v30 = vpop.permute.xlu1 %704  ;;  %v700_v31 = vpop.permute.xlu0 %699  ;;  %v1174_v45 = vadd.f32 %v1152_v39, %v968_v41  ;;  %v1173_v50 = vadd.f32 %v1151_v43, %v967_v44 }
 0x134   : > { %v1473_v32 = vsel %vm1429_vm5, %v1407_v12, %v1451_v27  ;;  %v1472_v33 = vsel %vm1428_vm6, %v1406_v26, %v1450_v29  ;;  %v742_v7 = vmul.f32 %v4929_v0, %v705_v30  ;;  %v741_v10 = vmul.f32 %v4929_v0, %v700_v31 }
 0x135   : > { %1495 = vst.msk [vmem:[#allocation3 + $0x7a] sm:$0xff] %vm431_vm1, %v1473_v32  ;;  %1494 = vst.msk [vmem:[#allocation3 + $0x72] sm:$0xff] %vm431_vm1, %v1472_v33 }
 0x137   : > { %v911_v36 = vpop.permute.xlu1 %910  ;;  %v906_v37 = vpop.permute.xlu0 %905 }
 0x138   : > { %v948_v1 = vmul.f32 %v4924_v63, %v911_v36  ;;  %v947_v3 = vmul.f32 %v4924_v63, %v906_v37 }
 0x13a   : > { %v970_v14 = vadd.f32 %v948_v1, %v742_v7  ;;  %v969_v15 = vadd.f32 %v947_v3, %v741_v10  ;;  %v2051_v1 = vld [vmem:[#allocation3 + $0x23] ss:$2 sm:$0xff]  ;;  %v1862_v3 = vld [vmem:[#allocation3 + $0x22] ss:$2 sm:$0xff]  ;;  %v1864_v7 = vld [vmem:[#allocation3 + $0x32] ss:$2 sm:$0xff] }
 0x13b   : > { %v1313_v42 = vpop.permute.xlu1 %1312  ;;  %v1308_v47 = vpop.permute.xlu0 %1307  ;;  %v2057_v10 = vld [vmem:[#allocation3 + $0x53] ss:$2 sm:$0xff] }
 0x13c   : > { %v1358_v46 = vmul.f32 %v4945_v18, %v1313_v42  ;;  %v1541_v48 = vld [vmem:[#allocation3 + $0x71] ss:$2 sm:$0xff]  ;;  %v1517_v49 = vld [vmem:[#allocation3 + $0x70] ss:$2 sm:$0xff]  ;;  %v1357_v51 = vmul.f32 %v4945_v18, %v1308_v47 }
 0x13d   : > { %4185 = vmatmul.mubr.msk.f32.gmra.mxu0 %vm431_vm1, %v1541_v48  ;;  %4222 = vmatmul.mubr.msk.f32.gmra.mxu1 %vm431_vm1, %v1517_v49 }
 0x13e   : > { %v1380_v52 = vadd.f32 %v1358_v46, %v1174_v45  ;;  %4187 = vmatprep.mubr.msk.f32.mxu0 %vm4586_vm3, %v4585_v2  ;;  %4224 = vmatprep.mubr.msk.f32.mxu1 %vm4586_vm3, %v4585_v2  ;;  %v1379_v53 = vadd.f32 %v1357_v51, %v1173_v50 }
 0x13f   : > { %v1117_v54 = vpop.permute.xlu1 %1116  ;;  %v1112_v56 = vpop.permute.xlu0 %1111 }
 0x140   : > { %v1409_v55 = vadd.f32 %v4952_v28, %v1380_v52  ;;  %v1408_v57 = vadd.f32 %v4952_v28, %v1379_v53  ;;  %v1154_v8 = vmul.f32 %v4934_v4, %v1117_v54  ;;  %v1153_v13 = vmul.f32 %v4934_v4, %v1112_v56  ;;  %v1503_v56 = vld [vmem:[#allocation3] ss:$2 sm:$0xff] }
 0x142   : > { %vm1431_vm7 = vcmp.gt.f32.partialorder %v1409_v55, 0.0  ;;  %v1453_v58 = vmul.f32 0.2, %v1409_v55  ;;  %vm1430_vm8 = vcmp.gt.f32.partialorder %v1408_v57, 0.0  ;;  %v1452_v59 = vmul.f32 0.2, %v1408_v57 }
 0x143   : > { %v715_v60 = vpop.permute.xlu1 %714  ;;  %v710_v62 = vpop.permute.xlu0 %709  ;;  %v1176_v17 = vadd.f32 %v1154_v8, %v970_v14  ;;  %v1175_v11 = vadd.f32 %v1153_v13, %v969_v15  ;;  %v2055_v8 = vld [vmem:[#allocation3 + $0x43] ss:$2 sm:$0xff]  ;;  %v1868_v13 = vld [vmem:[#allocation3 + $0x52] ss:$2 sm:$0xff]  ;;  %v1870_v15 = vld [vmem:[#allocation3 + $0x62] ss:$2 sm:$0xff] }
 0x144   : > { %v1475_v61 = vsel %vm1431_vm7, %v1409_v55, %v1453_v58  ;;  %v1474_v5 = vsel %vm1430_vm8, %v1408_v57, %v1452_v59  ;;  %v744_v29 = vmul.f32 %v4929_v0, %v715_v60  ;;  %v743_v33 = vmul.f32 %v4929_v0, %v710_v62  ;;  %v3853_v55 = vld [vmem:[%s5730_s3 + $0x28] sm:$0xff]  ;;  %v3852_v58 = vld [vmem:[%s5730_s3 + $0x20] sm:$0xff] }
 0x145   : > { %1497 = vst.msk [vmem:[#allocation3 + $0x8a] sm:$0xff] %vm431_vm1, %v1475_v61  ;;  %1496 = vst.msk [vmem:[#allocation3 + $0x82] sm:$0xff] %vm431_vm1, %v1474_v5  ;;  %v2047_v57 = vld [vmem:[#allocation3 + $0x3] ss:$2 sm:$0xff]  ;;  %v1858_v60 = vld [vmem:[#allocation3 + $0x2] ss:$2 sm:$0xff] }
 0x146   : > { %v3879_v59 = vld [vmem:[%s5730_s3 + $0x48] sm:$0xff]  ;;  %v2049_v61 = vld [vmem:[#allocation3 + $0x13] ss:$2 sm:$0xff]  ;;  %v1860_v62 = vld [vmem:[#allocation3 + $0x12] ss:$2 sm:$0xff] }
 0x147   : > { %v921_v6 = vpop.permute.xlu1 %920  ;;  %v916_v9 = vpop.permute.xlu0 %915  ;;  %v3878_v5 = vld [vmem:[%s5730_s3 + $0x40] sm:$0xff] }
 0x148   : > { %v950_v24 = vmul.f32 %v4924_v63, %v921_v6  ;;  %v949_v12 = vmul.f32 %v4924_v63, %v916_v9  ;;  %v2053_v6 = vld [vmem:[#allocation3 + $0x33] ss:$2 sm:$0xff]  ;;  %v1866_v9 = vld [vmem:[#allocation3 + $0x42] ss:$2 sm:$0xff]  ;;  %v2059_v14 = vld [vmem:[#allocation3 + $0x63] ss:$2 sm:$0xff] }
 0x14a   : > { %v972_v35 = vadd.f32 %v950_v24, %v744_v29  ;;  %v971_v37 = vadd.f32 %v949_v12, %v743_v33  ;;  %v2236_v12 = vld [vmem:[#allocation3 + $0x4] ss:$2 sm:$0xff]  ;;  %v2238_v29 = vld [vmem:[#allocation3 + $0x14] ss:$2 sm:$0xff] }
 0x14b   : > { %v1323_v16 = vpop.permute.xlu1 %1322  ;;  %v1318_v20 = vpop.permute.xlu0 %1317  ;;  %v2240_v33 = vld [vmem:[#allocation3 + $0x24] ss:$2 sm:$0xff] }
 0x14c   : > { %v1360_v19 = vmul.f32 %v4945_v18, %v1323_v16  ;;  %v1359_v21 = vmul.f32 %v4945_v18, %v1318_v20  ;;  %v1543_v22 = vld [vmem:[#allocation3 + $0x81] ss:$2 sm:$0xff]  ;;  %v1519_v23 = vld [vmem:[#allocation3 + $0x80] ss:$2 sm:$0xff] }
 0x14d   : > { %4188 = vmatmul.mubr.msk.f32.gmra.mxu0 %vm431_vm1, %v1543_v22  ;;  %4225 = vmatmul.mubr.msk.f32.gmra.mxu1 %vm431_vm1, %v1519_v23  ;;  %v2061_v16 = vld [vmem:[#allocation3 + $0x73] ss:$2 sm:$0xff] }
 0x14e   : > { %v1382_v25 = vadd.f32 %v1360_v19, %v1176_v17  ;;  %v1381_v26 = vadd.f32 %v1359_v21, %v1175_v11  ;;  %4190 = vmatprep.mubr.msk.f32.mxu0 %vm4586_vm3, %v4585_v2  ;;  %4227 = vmatprep.mubr.msk.f32.mxu1 %vm4586_vm3, %v4585_v2  ;;  %v1872_v17 = vld [vmem:[#allocation3 + $0x72] ss:$2 sm:$0xff]  ;;  %v2063_v19 = vld [vmem:[#allocation3 + $0x83] ss:$2 sm:$0xff]  ;;  %v1874_v11 = vld [vmem:[#allocation3 + $0x82] ss:$2 sm:$0xff] }
 0x14f   : > { %v1127_v27 = vpop.permute.xlu1 %1126  ;;  %v1122_v32 = vpop.permute.xlu0 %1121 }
 0x150   : > { %v1411_v30 = vadd.f32 %v4952_v28, %v1382_v25  ;;  %v1156_v31 = vmul.f32 %v4934_v4, %v1127_v27  ;;  %v1410_v34 = vadd.f32 %v4952_v28, %v1381_v26  ;;  %v1155_v63 = vmul.f32 %v4934_v4, %v1122_v32 }
 0x152   : > { %vm1433_vm9 = vcmp.gt.f32.partialorder %v1411_v30, 0.0  ;;  %v1455_v36 = vmul.f32 0.2, %v1411_v30  ;;  %vm1432_vm10 = vcmp.gt.f32.partialorder %v1410_v34, 0.0  ;;  %v1454_v38 = vmul.f32 0.2, %v1410_v34 }
 0x153   : > { %v1333_v39 = vpop.permute.xlu1 %1332  ;;  %v1178_v43 = vadd.f32 %v1156_v31, %v972_v35  ;;  %v1328_v44 = vpop.permute.xlu0 %1327  ;;  %v1177_v0 = vadd.f32 %v1155_v63, %v971_v37  ;;  %v2244_v63 = vld [vmem:[#allocation3 + $0x44] ss:$2 sm:$0xff]  ;;  %v2246_v37 = vld [vmem:[#allocation3 + $0x54] ss:$2 sm:$0xff] }
 0x154   : > { %v1477_v40 = vsel %vm1433_vm9, %v1411_v30, %v1455_v36  ;;  %v1362_v41 = vmul.f32 %v4945_v18, %v1333_v39  ;;  %v1476_v42 = vsel %vm1432_vm10, %v1410_v34, %v1454_v38  ;;  %v1361_v45 = vmul.f32 %v4945_v18, %v1328_v44  ;;  %v2242_v34 = vld [vmem:[#allocation3 + $0x34] ss:$2 sm:$0xff] }
 0x155   : > { %1499 = vst.msk [vmem:[#allocation3 + $0x9a] sm:$0xff] %vm431_vm1, %v1477_v40  ;;  %1498 = vst.msk [vmem:[#allocation3 + $0x92] sm:$0xff] %vm431_vm1, %v1476_v42 }
 0x156   : > { %v1384_v4 = vadd.f32 %v1362_v41, %v1178_v43  ;;  %v1383_v46 = vadd.f32 %v1361_v45, %v1177_v0  ;;  %v2248_v43 = vld [vmem:[#allocation3 + $0x64] ss:$2 sm:$0xff]  ;;  %v2250_v41 = vld [vmem:[#allocation3 + $0x74] ss:$2 sm:$0xff] }
 0x158   : > { %v1413_v47 = vadd.f32 %v4952_v28, %v1384_v4  ;;  %v1412_v48 = vadd.f32 %v4952_v28, %v1383_v46 }
 0x15a   : > { %vm1435_vm12 = vcmp.gt.f32.partialorder %v1413_v47, 0.0  ;;  %v1457_v49 = vmul.f32 0.2, %v1413_v47  ;;  %vm1434_vm13 = vcmp.gt.f32.partialorder %v1412_v48, 0.0  ;;  %v1456_v50 = vmul.f32 0.2, %v1412_v48 }
 0x15c   : > { %v1479_v51 = vsel %vm1435_vm12, %v1413_v47, %v1457_v49  ;;  %v1478_v52 = vsel %vm1434_vm13, %v1412_v48, %v1456_v50  ;;  %v1545_v53 = vld [vmem:[#allocation3 + $0x91] ss:$2 sm:$0xff]  ;;  %v1521_v54 = vld [vmem:[#allocation3 + $0x90] ss:$2 sm:$0xff]  ;;  %vm2485_vm12 = vcmask 260096   ;;  %vm470_vm13 = vcmask 523264  }
 0x15d   : > { %1502 = vst.msk [vmem:[#allocation3 + $0xaa] sm:$0x1f] %vm1501_vm11, %v1479_v51  ;;  %4191 = vmatmul.mubr.msk.f32.gmra.mxu0 %vm431_vm1, %v1545_v53  ;;  %4228 = vmatmul.mubr.msk.f32.gmra.mxu1 %vm431_vm1, %v1521_v54  ;;  %v2065_v21 = vld [vmem:[#allocation3 + $0x93] ss:$2 sm:$0xff]  ;;  %v1876_v23 = vld [vmem:[#allocation3 + $0x92] ss:$2 sm:$0xff] }
 0x15e   : > { %1500 = vst.msk [vmem:[#allocation3 + $0xa2] sm:$0xff] %vm431_vm1, %v1478_v52  ;;  %4193 = vmatprep.mubr.msk.f32.mxu0 %vm4586_vm3, %v4585_v2  ;;  %4230 = vmatprep.mubr.msk.f32.mxu1 %vm4586_vm3, %v4585_v2  ;;  %v2252_v44 = vld [vmem:[#allocation3 + $0x84] ss:$2 sm:$0xff] }
 0x15f   : > { %472 = vst.msk [vmem:[#allocation5 + $0x8] sm:$0xff] %vm470_vm13, %v4585_v2  ;;  %473 = vst.msk [vmem:[#allocation5 + $0x10] sm:$0xff] %vm470_vm13, %v4585_v2 }
 0x160   : > { %471 = vst.msk [vmem:[#allocation5] sm:$0xff] %vm470_vm13, %v4585_v2  ;;  %474 = vst.msk [vmem:[#allocation5 + $0x18] sm:$0xff] %vm470_vm13, %v4585_v2 }
 0x161   : > { %475 = vst.msk [vmem:[#allocation5 + $0x20] sm:$0xff] %vm470_vm13, %v4585_v2  ;;  %476 = vst.msk [vmem:[#allocation5 + $0x28] sm:$0xff] %vm470_vm13, %v4585_v2 }
 0x165   : > { %v1547_v18 = vld [vmem:[#allocation3 + $0xa1] ss:$2 sm:$0x7f]  ;;  %v1523_v28 = vld [vmem:[#allocation3 + $0xa0] ss:$2 sm:$0x7f] }
 0x166   : > { %4194 = vmatmul.mubr.msk.f32.gmra.mxu0 %vm431_vm1, %v1547_v18  ;;  %4231 = vmatmul.mubr.msk.f32.gmra.mxu1 %vm431_vm1, %v1523_v28  ;;  %v2067_v24 = vld [vmem:[#allocation3 + $0xa3] ss:$2 sm:$0x7f]  ;;  %v1878_v25 = vld [vmem:[#allocation3 + $0xa2] ss:$2 sm:$0x7f] }
 0x167   : > { %4200 = vmatprep.mubr.msk.f32.mxu0 %vm4586_vm3, %v4585_v2  ;;  %4274 = vmatprep.mubr.msk.f32.mxu1 %vm4586_vm3, %v4585_v2  ;;  %v2254_v45 = vld [vmem:[#allocation3 + $0x94] ss:$2 sm:$0xff]  ;;  %v2256_v48 = vld [vmem:[#allocation3 + $0xa4] ss:$2 sm:$0x7f] }
 0x16a   : > { %4201 = vmatmul.mubr.msk.f32.vlgmr.msra.gmra.mxu0 %vm431_vm1, %v1503_v56  ;;  %4275 = vmatmul.mubr.msk.f32.vlgmr.msra.gmra.mxu1 %vm431_vm1, %v2047_v57  ;;  %v3895_v57 = vld [vmem:[%s5732_s5 + $0x38] sm:$0xff] }
 0x16b   : > { %4234 = vmatpush3.msra.mxu0 %v3853_v55  ;;  %4237 = vmatprep.mubr.msk.f32.mxu0 %vm4586_vm3, %v4585_v2 }
 0x16c   : > { %4235 = vmatprep.subr.mxu0 %v4585_v2  ;;  %4277 = vmatprep.mubr.msk.f32.mxu1 %vm4586_vm3, %v4585_v2 }
 0x16d   : > { %4236 = vmatpush3.msra.mxu0 %v3852_v58  ;;  %4344 = vmatprep.subr.mxu1 %v3895_v57 }
 0x16e   : > { %4307 = vmatprep.subr.mxu0 %v4585_v2  ;;  %4238 = vmatmul.mubr.msk.f32.vlgmr.msra.gmra.mxu0 %vm431_vm1, %v1858_v60 }
 0x16f   : > { %4278 = vmatmul.mubr.msk.f32.gmra.mxu1 %vm431_vm1, %v2049_v61  ;;  %4308 = vmatpush3.msra.mxu0 %v3879_v59  ;;  %v3894_v61 = vld [vmem:[%s5732_s5 + $0x30] sm:$0xff] }
 0x170   : > { %4240 = vmatprep.mubr.msk.f32.mxu0 %vm4586_vm3, %v4585_v2  ;;  %4280 = vmatprep.mubr.msk.f32.mxu1 %vm4586_vm3, %v4585_v2 }
 0x171   : > { %4309 = vmatprep.subr.mxu0 %v4585_v2  ;;  %4345 = vmatpush3.msra.mxu1 %v3895_v57 }
 0x172   : > { %4241 = vmatmul.mubr.msk.f32.gmra.mxu0 %vm431_vm1, %v1860_v62  ;;  %4346 = vmatprep.subr.mxu1 %v3894_v61 }
 0x173   : > { %4281 = vmatmul.mubr.msk.f32.gmra.mxu1 %vm431_vm1, %v2051_v1  ;;  %4243 = vmatprep.mubr.msk.f32.mxu0 %vm4586_vm3, %v4585_v2  ;;  %v3893_v1 = vld [vmem:[%s5732_s5 + $0x28] sm:$0xff] }
 0x174   : > { %4283 = vmatprep.mubr.msk.f32.mxu1 %vm4586_vm3, %v4585_v2  ;;  %4310 = vmatpush3.msra.mxu0 %v3878_v5 }
 0x175   : > { %4347 = vmatpush3.msra.mxu1 %v3894_v61 }
 0x176   : > { %4244 = vmatmul.mubr.msk.f32.gmra.mxu0 %vm431_vm1, %v1862_v3  ;;  %v3931_v3 = vld [vmem:[%s5732_s5 + $0x98] sm:$0xff]  ;;  %4348 = vmatprep.subr.mxu1 %v3893_v1 }
 0x177   : > { %4284 = vmatmul.mubr.msk.f32.gmra.mxu1 %vm431_vm1, %v2053_v6  ;;  %4246 = vmatprep.mubr.msk.f32.mxu0 %vm4586_vm3, %v4585_v2  ;;  %v3892_v6 = vld [vmem:[%s5732_s5 + $0x20] sm:$0xff] }
 0x178   : > { %4286 = vmatprep.mubr.msk.f32.mxu1 %vm4586_vm3, %v4585_v2  ;;  %4412 = vmatprep.subr.mxu0 %v3931_v3 }
 0x179   : > { %4349 = vmatpush3.msra.mxu1 %v3893_v1 }
 0x17a   : > { %4247 = vmatmul.mubr.msk.f32.gmra.mxu0 %vm431_vm1, %v1864_v7  ;;  %v3930_v7 = vld [vmem:[%s5732_s5 + $0x90] sm:$0xff]  ;;  %4350 = vmatprep.subr.mxu1 %v3892_v6 }
 0x17b   : > { %4287 = vmatmul.mubr.msk.f32.gmra.mxu1 %vm431_vm1, %v2055_v8  ;;  %4249 = vmatprep.mubr.msk.f32.mxu0 %vm4586_vm3, %v4585_v2  ;;  %v3929_v8 = vld [vmem:[%s5732_s5 + $0x88] sm:$0xff] }
 0x17c   : > { %4289 = vmatprep.mubr.msk.f32.mxu1 %vm4586_vm3, %v4585_v2  ;;  %4351 = vmatpush3.msra.mxu1 %v3892_v6 }
 0x17e   : > { %4250 = vmatmul.mubr.msk.f32.gmra.mxu0 %vm431_vm1, %v1866_v9  ;;  %v3928_v9 = vld [vmem:[%s5732_s5 + $0x80] sm:$0xff] }
 0x17f   : > { %4290 = vmatmul.mubr.msk.f32.gmra.mxu1 %vm431_vm1, %v2057_v10  ;;  %4252 = vmatprep.mubr.msk.f32.mxu0 %vm4586_vm3, %v4585_v2 }
 0x180   : > { %4292 = vmatprep.mubr.msk.f32.mxu1 %vm4586_vm3, %v4585_v2 }
 0x182   : > { %4253 = vmatmul.mubr.msk.f32.gmra.mxu0 %vm431_vm1, %v1868_v13 }
 0x183   : > { %4293 = vmatmul.mubr.msk.f32.gmra.mxu1 %vm431_vm1, %v2059_v14  ;;  %4255 = vmatprep.mubr.msk.f32.mxu0 %vm4586_vm3, %v4585_v2 }
 0x184   : > { %4295 = vmatprep.mubr.msk.f32.mxu1 %vm4586_vm3, %v4585_v2 }
 0x186   : > { %4256 = vmatmul.mubr.msk.f32.gmra.mxu0 %vm431_vm1, %v1870_v15 }
 0x187   : > { %4296 = vmatmul.mubr.msk.f32.gmra.mxu1 %vm431_vm1, %v2061_v16  ;;  %4258 = vmatprep.mubr.msk.f32.mxu0 %vm4586_vm3, %v4585_v2 }
 0x188   : > { %4298 = vmatprep.mubr.msk.f32.mxu1 %vm4586_vm3, %v4585_v2 }
 0x18a   : > { %4259 = vmatmul.mubr.msk.f32.gmra.mxu0 %vm431_vm1, %v1872_v17  ;;  %v5338_v17 = vld [vmem:[%s5732_s5 + $0x18] sm:$0xff] }
 0x18b   : > { %4299 = vmatmul.mubr.msk.f32.gmra.mxu1 %vm431_vm1, %v2063_v19  ;;  %4261 = vmatprep.mubr.msk.f32.mxu0 %vm4586_vm3, %v4585_v2 }
 0x18c   : > { %4301 = vmatprep.mubr.msk.f32.mxu1 %vm4586_vm3, %v4585_v2  ;;  %4361 = vmatprep.subr.mxu1 %v5338_v17 }
 0x18d   : > { %v5227_v20 = vpop.f32.mrf.mxu0 }
 0x18e   : > { %4262 = vmatmul.mubr.msk.f32.gmra.mxu0 %vm431_vm1, %v1874_v11 }
 0x18f   : > { %4302 = vmatmul.mubr.msk.f32.gmra.mxu1 %vm431_vm1, %v2065_v21  ;;  %v4165_v22 = vpop.f32.mrf.mxu0  ;;  %4264 = vmatprep.mubr.msk.f32.mxu0 %vm4586_vm3, %v4585_v2 }
 0x190   : > { %4304 = vmatprep.mubr.msk.f32.mxu1 %vm4586_vm3, %v4585_v2 }
 0x192   : > { %4265 = vmatmul.mubr.msk.f32.gmra.mxu0 %vm431_vm1, %v1876_v23 }
 0x193   : > { %4305 = vmatmul.mubr.msk.f32.gmra.mxu1 %vm431_vm1, %v2067_v24  ;;  %4267 = vmatprep.mubr.msk.f32.mxu0 %vm4586_vm3, %v4585_v2 }
 0x196   : > { %4268 = vmatmul.mubr.msk.f32.gmra.mxu0 %vm431_vm1, %v1878_v25 }
 0x197   : > { %4311 = vmatprep.mubr.msk.f32.mxu0 %vm4586_vm3, %v4585_v2 }
 0x19a   : > { %4312 = vmatmul.mubr.msk.f32.vlgmr.msra.gmra.mxu0 %vm431_vm1, %v2236_v12 }
 0x19b   : > { %4314 = vmatprep.mubr.msk.f32.mxu0 %vm4586_vm3, %v4585_v2  ;;  %4413 = vmatpush3.msra.mxu0 %v3931_v3 }
 0x19c   : > { %4414 = vmatprep.subr.mxu0 %v3930_v7 }
 0x19d   : > { %v1655_v26 = vpop.f32.mrf.mxu0  ;;  %v1808_v27 = vpop.f32.mrf.mxu1  ;;  %4415 = vmatpush3.msra.mxu0 %v3930_v7 }
 0x19e   : > { %v5245_v30 = vadd.f32 %v1808_v27, %v1655_v26  ;;  %4315 = vmatmul.mubr.msk.f32.gmra.mxu0 %vm431_vm1, %v2238_v29  ;;  %4416 = vmatprep.subr.mxu0 %v3929_v8 }
 0x19f   : > { %v4168_v31 = vpop.f32.mrf.mxu0  ;;  %v4205_v32 = vpop.f32.mrf.mxu1  ;;  %4317 = vmatprep.mubr.msk.f32.mxu0 %vm4586_vm3, %v4585_v2  ;;  %4417 = vmatpush3.msra.mxu0 %v3929_v8 }
 0x1a0   : > { %4418 = vmatprep.subr.mxu0 %v3928_v9 }
 0x1a1   : > { %4419 = vmatpush3.msra.mxu0 %v3928_v9 }
 0x1a2   : > { %4318 = vmatmul.mubr.msk.f32.gmra.mxu0 %vm431_vm1, %v2240_v33  ;;  %4454 = vmatprep.subr.mxu0 %v4585_v2 }
 0x1a3   : > { %4320 = vmatprep.mubr.msk.f32.mxu0 %vm4586_vm3, %v4585_v2 }
 0x1a6   : > { %4321 = vmatmul.mubr.msk.f32.gmra.mxu0 %vm431_vm1, %v2242_v34 }
 0x1a7   : > { %4323 = vmatprep.mubr.msk.f32.mxu0 %vm4586_vm3, %v4585_v2 }
 0x1aa   : > { %4324 = vmatmul.mubr.msk.f32.gmra.mxu0 %vm431_vm1, %v2244_v63 }
 0x1ab   : > { %4326 = vmatprep.mubr.msk.f32.mxu0 %vm4586_vm3, %v4585_v2 }
 0x1ad   : > { %v1660_v35 = vpop.f32.mrf.mxu0  ;;  %v1813_v36 = vpop.f32.mrf.mxu1 }
 0x1ae   : > { %v5259_v38 = vadd.f32 %v1813_v36, %v1660_v35  ;;  %4327 = vmatmul.mubr.msk.f32.gmra.mxu0 %vm431_vm1, %v2246_v37 }
 0x1af   : > { %v4171_v39 = vpop.f32.mrf.mxu0  ;;  %v4208_v40 = vpop.f32.mrf.mxu1  ;;  %4329 = vmatprep.mubr.msk.f32.mxu0 %vm4586_vm3, %v4585_v2 }
 0x1b2   : > { %4330 = vmatmul.mubr.msk.f32.gmra.mxu0 %vm431_vm1, %v2248_v43 }
 0x1b3   : > { %4332 = vmatprep.mubr.msk.f32.mxu0 %vm4586_vm3, %v4585_v2 }
 0x1b6   : > { %4333 = vmatmul.mubr.msk.f32.gmra.mxu0 %vm431_vm1, %v2250_v41 }
 0x1b7   : > { %4335 = vmatprep.mubr.msk.f32.mxu0 %vm4586_vm3, %v4585_v2 }
 0x1ba   : > { %4336 = vmatmul.mubr.msk.f32.gmra.mxu0 %vm431_vm1, %v2252_v44 }
 0x1bb   : > { %4338 = vmatprep.mubr.msk.f32.mxu0 %vm4586_vm3, %v4585_v2 }
 0x1bd   : > { %v1665_v42 = vpop.f32.mrf.mxu0  ;;  %v1818_v0 = vpop.f32.mrf.mxu1 }
 0x1be   : > { %v5273_v4 = vadd.f32 %v1818_v0, %v1665_v42  ;;  %4339 = vmatmul.mubr.msk.f32.gmra.mxu0 %vm431_vm1, %v2254_v45 }
 0x1bf   : > { %v4174_v46 = vpop.f32.mrf.mxu0  ;;  %v4211_v47 = vpop.f32.mrf.mxu1  ;;  %4341 = vmatprep.mubr.msk.f32.mxu0 %vm4586_vm3, %v4585_v2 }
 0x1c2   : > { %4342 = vmatmul.mubr.msk.f32.gmra.mxu0 %vm431_vm1, %v2256_v48  ;;  %vm468_vm1 = vcmask 256000  }
 0x1c3   : > { %469 = vst.msk [vmem:[#allocation4 + $0x58] sm:$0x7] %vm468_vm1, %v4585_v2 }
 0x1cd   : > { %v1670_v49 = vpop.f32.mrf.mxu0  ;;  %v1823_v50 = vpop.f32.mrf.mxu1 }
 0x1ce   : > { %v5279_v51 = vadd.f32 %v1823_v50, %v1670_v49 }
 0x1cf   : > { %v4177_v52 = vpop.f32.mrf.mxu0  ;;  %v4214_v53 = vpop.f32.mrf.mxu1 }
 0x1dd   : > { %v1675_v54 = vpop.f32.mrf.mxu0  ;;  %v1828_v18 = vpop.f32.mrf.mxu1 }
 0x1de   : > { %v5303_v28 = vadd.f32 %v1828_v18, %v1675_v54 }
 0x1df   : > { %v4180_v55 = vpop.f32.mrf.mxu0  ;;  %v4217_v56 = vpop.f32.mrf.mxu1 }
 0x1ed   : > { %v1680_v58 = vpop.f32.mrf.mxu0  ;;  %v1833_v59 = vpop.f32.mrf.mxu1 }
 0x1ee   : > { %v5308_v60 = vadd.f32 %v1833_v59, %v1680_v58 }
 0x1ef   : > { %v4183_v62 = vpop.f32.mrf.mxu0  ;;  %v4220_v5 = vpop.f32.mrf.mxu1 }
 0x1fd   : > { %v1685_v10 = vpop.f32.mrf.mxu0  ;;  %v1838_v13 = vpop.f32.mrf.mxu1 }
 0x1fe   : > { %v5332_v14 = vadd.f32 %v1838_v13, %v1685_v10 }
 0x1ff   : > { %v4186_v15 = vpop.f32.mrf.mxu0  ;;  %v4223_v16 = vpop.f32.mrf.mxu1 }
 0x20d   : > { %v1690_v19 = vpop.f32.mrf.mxu0  ;;  %v1843_v11 = vpop.f32.mrf.mxu1 }
 0x20e   : > { %v5341_v21 = vadd.f32 %v1843_v11, %v1690_v19 }
 0x20f   : > { %v4189_v22 = vpop.f32.mrf.mxu0  ;;  %v4226_v23 = vpop.f32.mrf.mxu1 }
 0x21d   : > { %v1695_v24 = vpop.f32.mrf.mxu0  ;;  %v1848_v25 = vpop.f32.mrf.mxu1 }
 0x21e   : > { %v5343_v12 = vadd.f32 %v1848_v25, %v1695_v24 }
 0x21f   : > { %v4192_v26 = vpop.f32.mrf.mxu0  ;;  %v4229_v27 = vpop.f32.mrf.mxu1 }
 0x226   : > { %v1700_v29 = vpop.f32.mrf.mxu0  ;;  %v1853_v31 = vpop.f32.mrf.mxu1 }
 0x227   : > { %v5345_v32 = vadd.f32 %v1853_v31, %v1700_v29 }
 0x228   : > { %v4195_v33 = vpop.f32.mrf.mxu0  ;;  %v4232_v34 = vpop.f32.mrf.mxu1 }
 0x22a   : > { %v1803_v63 = vpop.f32.mrf.mxu0  ;;  %v2170_v35 = vpop.f32.mrf.mxu1 }
 0x22b   : > { %v1804_v22 = vadd.f32 %v1803_v63, %v5227_v20 }
 0x22c   : > { %v4202_v36 = vpop.f32.mrf.mxu0  ;;  %v4276_v37 = vpop.f32.mrf.mxu1 }
 0x22d   : > { %v5376_v36 = vld [vmem:[%s5731_s4] ss:$0 sm:$0xff] }
 0x22e   : > { %v1981_v39 = vpop.f32.mrf.mxu0 }
 0x22f   : > { %v2175_v40 = vpop.f32.mrf.mxu1  ;;  %v2035_v25 = vadd.f32 %v1981_v39, %v1804_v22 }
 0x230   : > { %v4239_v43 = vpop.f32.mrf.mxu0 }
 0x231   : > { %v4279_v41 = vpop.f32.mrf.mxu1  ;;  %v2224_v33 = vadd.f32 %v2170_v35, %v2035_v25 }
 0x232   : > { %v1986_v44 = vpop.f32.mrf.mxu0 }
 0x233   : > { %v2180_v42 = vpop.f32.mrf.mxu1  ;;  %v2036_v31 = vadd.f32 %v1986_v44, %v5245_v30 }
 0x234   : > { %v4242_v0 = vpop.f32.mrf.mxu0 }
 0x235   : > { %v4282_v45 = vpop.f32.mrf.mxu1  ;;  %v2225_v39 = vadd.f32 %v2175_v40, %v2036_v31 }
 0x236   : > { %v1991_v46 = vpop.f32.mrf.mxu0 }
 0x237   : > { %v2185_v47 = vpop.f32.mrf.mxu1  ;;  %v2037_v20 = vadd.f32 %v1991_v46, %v5259_v38 }
 0x238   : > { %v4245_v48 = vpop.f32.mrf.mxu0 }
 0x239   : > { %v4285_v49 = vpop.f32.mrf.mxu1 }
 0x23a   : > { %v1996_v50 = vpop.f32.mrf.mxu0  ;;  %v2226_v49 = vadd.f32 %v2180_v42, %v2037_v20 }
 0x23b   : > { %v5347_v52 = vpop.f32.mrf.mxu1  ;;  %v2038_v30 = vadd.f32 %v1996_v50, %v5273_v4 }
 0x23c   : > { %v4248_v53 = vpop.f32.mrf.mxu0 }
 0x23d   : > { %v4288_v54 = vpop.f32.mrf.mxu1 }
 0x23e   : > { %v2001_v18 = vpop.f32.mrf.mxu0 }
 0x23f   : > { %v5349_v55 = vpop.f32.mrf.mxu1  ;;  %v2039_v40 = vadd.f32 %v2001_v18, %v5279_v51 }
 0x240   : > { %v4251_v56 = vpop.f32.mrf.mxu0 }
 0x241   : > { %v4291_v57 = vpop.f32.mrf.mxu1 }
 0x242   : > { %v2006_v58 = vpop.f32.mrf.mxu0 }
 0x243   : > { %v5351_v59 = vpop.f32.mrf.mxu1 }
 0x244   : > { %v4254_v61 = vpop.f32.mrf.mxu0 }
 0x245   : > { %v4294_v62 = vpop.f32.mrf.mxu1  ;;  %v2227_v61 = vadd.f32 %v2185_v47, %v2038_v30 }
 0x246   : > { %v5353_v5 = vpop.f32.mrf.mxu0 }
 0x247   : > { %v5355_v1 = vpop.f32.mrf.mxu1 }
 0x248   : > { %v4257_v3 = vpop.f32.mrf.mxu0 }
 0x249   : > { %v4297_v6 = vpop.f32.mrf.mxu1  ;;  %v2040_v3 = vadd.f32 %v2006_v58, %v5303_v28 }
 0x24a   : > { %v5357_v7 = vpop.f32.mrf.mxu0 }
 0x24b   : > { %v5359_v8 = vpop.f32.mrf.mxu1  ;;  %v2229_v28 = vadd.f32 %v5349_v55, %v2040_v3  ;;  %v2042_v31 = vadd.f32 %v5357_v7, %v5332_v14 }
 0x24c   : > { %v4260_v9 = vpop.f32.mrf.mxu0 }
 0x24d   : > { %v4300_v10 = vpop.f32.mrf.mxu1  ;;  %v2231_v7 = vadd.f32 %v5355_v1, %v2042_v31 }
 0x24e   : > { %v5361_v13 = vpop.f32.mrf.mxu0  ;;  %v2228_v10 = vadd.f32 %v5347_v52, %v2039_v40 }
 0x24f   : > { %v5363_v15 = vpop.f32.mrf.mxu1 }
 0x250   : > { %v4263_v16 = vpop.f32.mrf.mxu0 }
 0x251   : > { %v4303_v19 = vpop.f32.mrf.mxu1 }
 0x252   : > { %v5365_v11 = vpop.f32.mrf.mxu0  ;;  %v2041_v19 = vadd.f32 %v5353_v5, %v5308_v60 }
 0x253   : > { %v5368_v23 = vpop.f32.mrf.mxu1 }
 0x254   : > { %v4266_v24 = vpop.f32.mrf.mxu0  ;;  %v2230_v5 = vadd.f32 %v5351_v59, %v2041_v19  ;;  %v2500_v59 = vld [vmem:[%s5732_s5 + $0x10] sm:$0xff] }
 0x255   : > { %v4306_v26 = vpop.f32.mrf.mxu1 }
 0x256   : > { %v5370_v27 = vpop.f32.mrf.mxu0 }
 0x258   : > { %v4269_v29 = vpop.f32.mrf.mxu0 }
 0x25a   : > { %v2359_v34 = vpop.f32.mrf.mxu0 }
 0x25b   : > { %v2413_v37 = vadd.f32 %v2359_v34, %v2224_v33 }
 0x25c   : > { %v4313_v43 = vpop.f32.mrf.mxu0 }
 0x25d   : > { %v2431_v63 = vadd.f32 %v5376_v36, %v2413_v37 }
 0x25e   : > { %v2364_v41 = vpop.f32.mrf.mxu0 }
 0x25f   : > { %vm2442_vm15 = vcmp.gt.f32.partialorder %v2431_v63, 0.0  ;;  %v2453_v0 = vmul.f32 0.2, %v2431_v63  ;;  %v2414_v45 = vadd.f32 %v2364_v41, %v2225_v39 }
 0x260   : > { %v4316_v48 = vpop.f32.mrf.mxu0 }
 0x261   : > { %v2464_v35 = vsel %vm2442_vm15, %v2431_v63, %v2453_v0  ;;  %v2432_v44 = vadd.f32 %v5376_v36, %v2414_v45  ;;  %v2043_v63 = vadd.f32 %v5361_v13, %v5341_v21  ;;  %v2499_v21 = vld [vmem:[%s5732_s5 + $0x8] sm:$0xff]  ;;  %v2044_v13 = vadd.f32 %v5365_v11, %v5343_v12 }
 0x262   : > { %2475 = vst.msk [vmem:[#allocation4 + $0x2] sm:$0xff] %vm456_vm14, %v2464_v35  ;;  %v2369_v53 = vpop.f32.mrf.mxu0 }
 0x263   : > { %vm2443_vm0 = vcmp.gt.f32.partialorder %v2432_v44, 0.0  ;;  %v2454_v54 = vmul.f32 0.2, %v2432_v44  ;;  %v2415_v38 = vadd.f32 %v2369_v53, %v2226_v49 }
 0x264   : > { %v4319_v46 = vpop.f32.mrf.mxu0 }
 0x265   : > { %v2465_v56 = vsel %vm2443_vm0, %v2432_v44, %v2454_v54  ;;  %v2433_v57 = vadd.f32 %v5376_v36, %v2415_v38  ;;  %v2232_v44 = vadd.f32 %v5359_v8, %v2043_v63  ;;  %v3911_v8 = vld [vmem:[%s5732_s5 + $0x58] sm:$0xff]  ;;  %v2045_v38 = vadd.f32 %v5370_v27, %v5345_v32  ;;  %v3919_v63 = vld [vmem:[%s5732_s5 + $0x68] sm:$0xff] }
 0x266   : > { %2476 = vst.msk [vmem:[#allocation4 + $0xa] sm:$0xff] %vm456_vm14, %v2465_v56  ;;  %v2374_v4 = vpop.f32.mrf.mxu0  ;;  %v2233_v56 = vadd.f32 %v5363_v15, %v2044_v13  ;;  %v3946_v13 = vld [vmem:[%s5734_s7 + $0x78] sm:$0xff] }
 0x267   : > { %vm2444_vm2 = vcmp.gt.f32.partialorder %v2433_v57, 0.0  ;;  %v2455_v50 = vmul.f32 0.2, %v2433_v57  ;;  %v2416_v62 = vadd.f32 %v2374_v4, %v2227_v61  ;;  %v2234_v27 = vadd.f32 %v5368_v23, %v2045_v38  ;;  %v3198_v38 = vld [vmem:[%s5734_s7 + $0x10] sm:$0xff] }
 0x268   : > { %v4322_v42 = vpop.f32.mrf.mxu0 }
 0x269   : > { %v2466_v6 = vsel %vm2444_vm2, %v2433_v57, %v2455_v50  ;;  %v2434_v9 = vadd.f32 %v5376_v36, %v2416_v62 }
 0x26a   : > { %2477 = vst.msk [vmem:[#allocation4 + $0x12] sm:$0xff] %vm456_vm14, %v2466_v6  ;;  %v2379_v51 = vpop.f32.mrf.mxu0 }
 0x26b   : > { %vm2445_vm4 = vcmp.gt.f32.partialorder %v2434_v9, 0.0  ;;  %v2456_v18 = vmul.f32 0.2, %v2434_v9  ;;  %v2417_v47 = vadd.f32 %v2379_v51, %v2228_v10 }
 0x26c   : > { %v4325_v16 = vpop.f32.mrf.mxu0 }
 0x26d   : > { %v2467_v22 = vsel %vm2445_vm4, %v2434_v9, %v2456_v18  ;;  %v2435_v24 = vadd.f32 %v5376_v36, %v2417_v47  ;;  %v2503_v58 = vld [vmem:[#allocation4 + $0x1] ss:$2 sm:$0xff]  ;;  %vm3189_vm4 = vcmask 519168  }
 0x26e   : > { %2478 = vst.msk [vmem:[#allocation4 + $0x1a] sm:$0xff] %vm456_vm14, %v2467_v22  ;;  %v2384_v25 = vpop.f32.mrf.mxu0  ;;  %4352 = vmatprep.mubr.msk.f32.mxu1 %vm456_vm14, %v2503_v58 }
 0x26f   : > { %vm2446_vm5 = vcmp.gt.f32.partialorder %v2435_v24, 0.0  ;;  %v2457_v52 = vmul.f32 0.2, %v2435_v24  ;;  %v2418_v26 = vadd.f32 %v2384_v25, %v2229_v28 }
 0x270   : > { %v4328_v29 = vpop.f32.mrf.mxu0 }
 0x271   : > { %v2468_v33 = vsel %vm2446_vm5, %v2435_v24, %v2457_v52  ;;  %v2436_v60 = vadd.f32 %v5376_v36, %v2418_v26  ;;  %v3018_v34 = vld [vmem:[#allocation4 + $0x4] ss:$2 sm:$0xff]  ;;  %v3910_v52 = vld [vmem:[%s5732_s5 + $0x50] sm:$0xff] }
 0x272   : > { %2479 = vst.msk [vmem:[#allocation4 + $0x22] sm:$0xff] %vm456_vm14, %v2468_v33  ;;  %v2389_v55 = vpop.f32.mrf.mxu0  ;;  %4420 = vmatprep.mubr.msk.f32.mxu0 %vm456_vm14, %v3018_v34  ;;  %v3909_v29 = vld [vmem:[%s5732_s5 + $0x48] sm:$0xff]  ;;  %v3908_v33 = vld [vmem:[%s5732_s5 + $0x40] sm:$0xff] }
 0x273   : > { %vm2447_vm6 = vcmp.gt.f32.partialorder %v2436_v60, 0.0  ;;  %v2458_v37 = vmul.f32 0.2, %v2436_v60  ;;  %v2419_v43 = vadd.f32 %v2389_v55, %v2230_v5  ;;  %v3921_v5 = vld [vmem:[%s5732_s5 + $0x78] sm:$0xff] }
 0x274   : > { %v4331_v20 = vpop.f32.mrf.mxu0  ;;  %v2746_v55 = vld [vmem:[#allocation4 + $0x2] ss:$2 sm:$0xff] }
 0x275   : > { %v2469_v39 = vsel %vm2447_vm6, %v2436_v60, %v2458_v37  ;;  %v2437_v14 = vadd.f32 %v5376_v36, %v2419_v43  ;;  %v2505_v41 = vld [vmem:[#allocation4 + $0x11] ss:$2 sm:$0xff]  ;;  %v2489_v25 = vld [vmem:[#allocation4 + $0x10] ss:$2 sm:$0xff] }
 0x276   : > { %2480 = vst.msk [vmem:[#allocation4 + $0x2a] sm:$0xff] %vm456_vm14, %v2469_v39  ;;  %v2394_v0 = vpop.f32.mrf.mxu0  ;;  %4353 = vmatmul.mubr.msk.f32.vlgmr.msra.gmra.mxu1 %vm456_vm14, %v2505_v41  ;;  %v2748_v37 = vld [vmem:[#allocation4 + $0x12] ss:$2 sm:$0xff] }
 0x277   : > { %vm2448_vm7 = vcmp.gt.f32.partialorder %v2437_v14, 0.0  ;;  %v2459_v45 = vmul.f32 0.2, %v2437_v14  ;;  %v2420_v48 = vadd.f32 %v2394_v0, %v2231_v7  ;;  %4362 = vmatpush3.msra.mxu1 %v5338_v17  ;;  %v2498_v17 = vld [vmem:[%s5732_s5] sm:$0xff]  ;;  %v3920_v43 = vld [vmem:[%s5732_s5 + $0x70] sm:$0xff] }
 0x278   : > { %v4334_v1 = vpop.f32.mrf.mxu0  ;;  %4363 = vmatprep.subr.mxu1 %v2500_v59  ;;  %v2884_v0 = vld [vmem:[#allocation4 + $0x13] ss:$2 sm:$0xff] }
 0x279   : > { %v2470_v30 = vsel %vm2448_vm7, %v2437_v14, %v2459_v45  ;;  %v2438_v35 = vadd.f32 %v5376_v36, %v2420_v48  ;;  %v3020_v49 = vld [vmem:[#allocation4 + $0x14] ss:$2 sm:$0xff]  ;;  %4364 = vmatpush3.msra.mxu1 %v2500_v59  ;;  %v3918_v14 = vld [vmem:[%s5732_s5 + $0x60] sm:$0xff] }
 0x27a   : > { %2481 = vst.msk [vmem:[#allocation4 + $0x32] sm:$0xff] %vm456_vm14, %v2470_v30  ;;  %v2399_v53 = vpop.f32.mrf.mxu0  ;;  %4421 = vmatmul.mubr.msk.f32.vlgmr.msra.gmra.mxu0 %vm456_vm14, %v3020_v49  ;;  %4365 = vmatprep.subr.mxu1 %v2499_v21  ;;  %v2882_v59 = vld [vmem:[#allocation4 + $0x3] ss:$2 sm:$0xff] }
 0x27b   : > { %vm2449_vm8 = vcmp.gt.f32.partialorder %v2438_v35, 0.0  ;;  %v2460_v54 = vmul.f32 0.2, %v2438_v35  ;;  %v2421_v12 = vadd.f32 %v2399_v53, %v2232_v44  ;;  %4366 = vmatpush3.msra.mxu1 %v2499_v21  ;;  %v3203_v30 = vld [vmem:[%s5734_s7 + $0x38] sm:$0xff]  ;;  %v3202_v44 = vld [vmem:[%s5734_s7 + $0x30] sm:$0xff]  ;;  %v3944_v49 = vld [vmem:[%s5734_s7 + $0x68] sm:$0xff] }
 0x27c   : > { %v4337_v11 = vpop.f32.mrf.mxu0  ;;  %4367 = vmatprep.subr.mxu1 %v2498_v17  ;;  %4455 = vmatpush3.msra.mxu0 %v3203_v30  ;;  %v3943_v53 = vld [vmem:[%s5734_s7 + $0x60] sm:$0xff] }
 0x27d   : > { %v2471_v46 = vsel %vm2449_vm8, %v2438_v35, %v2460_v54  ;;  %v2439_v40 = vadd.f32 %v5376_v36, %v2421_v12  ;;  %v2507_v57 = vld [vmem:[#allocation4 + $0x21] ss:$2 sm:$0xff]  ;;  %4368 = vmatpush3.msra.mxu1 %v2498_v17  ;;  %v2491_v26 = vld [vmem:[#allocation4 + $0x20] ss:$2 sm:$0xff]  ;;  %4456 = vmatprep.subr.mxu0 %v4585_v2  ;;  %v3945_v35 = vld [vmem:[%s5734_s7 + $0x70] sm:$0xff]  ;;  %vm3750_vm8 = vcmask 1045504  }
 0x27e   : > { %2482 = vst.msk [vmem:[#allocation4 + $0x3a] sm:$0xff] %vm456_vm14, %v2471_v46  ;;  %v2404_v61 = vpop.f32.mrf.mxu0  ;;  %4355 = vmatprep.mubr.msk.f32.mxu1 %vm456_vm14, %v2507_v57  ;;  %4378 = vmatprep.subr.mxu1 %v3911_v8  ;;  %v2750_v20 = vld [vmem:[#allocation4 + $0x22] ss:$2 sm:$0xff]  ;;  %v2886_v45 = vld [vmem:[#allocation4 + $0x23] ss:$2 sm:$0xff]  ;;  %v3941_v11 = vld [vmem:[%s5734_s7 + $0x50] sm:$0xff] }
 0x27f   : > { %vm2450_vm9 = vcmp.gt.f32.partialorder %v2439_v40, 0.0  ;;  %v2461_v4 = vmul.f32 0.2, %v2439_v40  ;;  %v2422_v50 = vadd.f32 %v2404_v61, %v2233_v56  ;;  %4457 = vmatpush3.msra.mxu0 %v3202_v44  ;;  %v3201_v17 = vld [vmem:[%s5734_s7 + $0x28] sm:$0xff]  ;;  %v3200_v54 = vld [vmem:[%s5734_s7 + $0x20] sm:$0xff]  ;;  %v3942_v12 = vld [vmem:[%s5734_s7 + $0x58] sm:$0xff] }
 0x280   : > { %v4340_v62 = vpop.f32.mrf.mxu0  ;;  %4458 = vmatprep.subr.mxu0 %v4585_v2  ;;  %v3940_v46 = vld [vmem:[%s5734_s7 + $0x48] sm:$0xff]  ;;  %v3939_v56 = vld [vmem:[%s5734_s7 + $0x40] sm:$0xff] }
 0x281   : > { %v2472_v42 = vsel %vm2450_vm9, %v2439_v40, %v2461_v4  ;;  %v2440_v32 = vadd.f32 %v5376_v36, %v2422_v50  ;;  %v3022_v3 = vld [vmem:[#allocation4 + $0x24] ss:$2 sm:$0xff]  ;;  %4459 = vmatpush3.msra.mxu0 %v3201_v17 }
 0x282   : > { %2483 = vst.msk [vmem:[#allocation4 + $0x42] sm:$0xff] %vm456_vm14, %v2472_v42  ;;  %v2409_v15 = vpop.f32.mrf.mxu0  ;;  %4423 = vmatprep.mubr.msk.f32.mxu0 %vm456_vm14, %v3022_v3  ;;  %4460 = vmatprep.subr.mxu0 %v4585_v2  ;;  %v3197_v40 = vld [vmem:[%s5734_s7 + $0x8] sm:$0xff]  ;;  %v3196_v57 = vld [vmem:[%s5734_s7] sm:$0xff] }
 0x283   : > { %vm2451_vm10 = vcmp.gt.f32.partialorder %v2440_v32, 0.0  ;;  %v2462_v6 = vmul.f32 0.2, %v2440_v32  ;;  %v2423_v9 = vadd.f32 %v2409_v15, %v2234_v27  ;;  %4461 = vmatpush3.msra.mxu0 %v3200_v54 }
 0x284   : > { %v4343_v10 = vpop.f32.mrf.mxu0  ;;  %4462 = vmatprep.subr.mxu0 %v4585_v2 }
 0x285   : > { %v2473_v51 = vsel %vm2451_vm10, %v2440_v32, %v2462_v6  ;;  %v2441_v18 = vadd.f32 %v5376_v36, %v2423_v9  ;;  %v2509_v47 = vld [vmem:[#allocation4 + $0x31] ss:$2 sm:$0xff]  ;;  %v2487_v36 = vld [vmem:[#allocation4] ss:$2 sm:$0xff]  ;;  %v2493_v31 = vld [vmem:[#allocation4 + $0x30] ss:$2 sm:$0xff] }
 0x286   : > { %2484 = vst.msk [vmem:[#allocation4 + $0x4a] sm:$0xff] %vm456_vm14, %v2473_v51  ;;  %4356 = vmatmul.mubr.msk.f32.gmra.mxu1 %vm456_vm14, %v2509_v47  ;;  %v2752_v39 = vld [vmem:[#allocation4 + $0x32] ss:$2 sm:$0xff]  ;;  %v2888_v48 = vld [vmem:[#allocation4 + $0x33] ss:$2 sm:$0xff] }
 0x287   : > { %vm2452_vm11 = vcmp.gt.f32.partialorder %v2441_v18, 0.0  ;;  %v2463_v23 = vmul.f32 0.2, %v2441_v18 }
 0x289   : > { %v2474_v16 = vsel %vm2452_vm11, %v2441_v18, %v2463_v23  ;;  %v3024_v19 = vld [vmem:[#allocation4 + $0x34] ss:$2 sm:$0xff] }
 0x28a   : > { %2486 = vst.msk [vmem:[#allocation4 + $0x52] sm:$0x7f] %vm2485_vm12, %v2474_v16  ;;  %4424 = vmatmul.mubr.msk.f32.gmra.mxu0 %vm456_vm14, %v3024_v19 }
 0x28d   : > { %v2511_v22 = vld [vmem:[#allocation4 + $0x41] ss:$2 sm:$0xff]  ;;  %v2495_v60 = vld [vmem:[#allocation4 + $0x40] ss:$2 sm:$0xff] }
 0x28e   : > { %4358 = vmatprep.mubr.msk.f32.mxu1 %vm456_vm14, %v2511_v22  ;;  %v2754_v7 = vld [vmem:[#allocation4 + $0x42] ss:$2 sm:$0xff]  ;;  %v2890_v21 = vld [vmem:[#allocation4 + $0x43] ss:$2 sm:$0xff] }
 0x291   : > { %v2513_v24 = vld [vmem:[#allocation4 + $0x51] ss:$2 sm:$0xf]  ;;  %v3026_v28 = vld [vmem:[#allocation4 + $0x44] ss:$2 sm:$0xff] }
 0x292   : > { %4359 = vmatmul.mubr.msk.f32.gmra.mxu1 %vm456_vm14, %v2513_v24  ;;  %4426 = vmatprep.mubr.msk.f32.mxu0 %vm456_vm14, %v3026_v28  ;;  %v3028_v58 = vld [vmem:[#allocation4 + $0x54] ss:$2 sm:$0xf]  ;;  %v2892_v1 = vld [vmem:[#allocation4 + $0x53] ss:$2 sm:$0xf] }
 0x293   : > { %4369 = vmatprep.mubr.msk.f32.mxu1 %vm456_vm14, %v2487_v36  ;;  %4427 = vmatmul.mubr.msk.f32.gmra.mxu0 %vm456_vm14, %v3028_v58  ;;  %v2497_v34 = vld [vmem:[#allocation4 + $0x50] ss:$2 sm:$0xf] }
 0x294   : > { %4470 = vmatprep.mubr.msk.f32.mxu0 %vm4586_vm3, %v4585_v2  ;;  %v2756_v41 = vld [vmem:[#allocation4 + $0x52] ss:$2 sm:$0xf] }
 0x296   : > { %4370 = vmatmul.mubr.msk.f32.vlgmr.msra.gmra.mxu1 %vm456_vm14, %v2489_v25 }
 0x297   : > { %4379 = vmatpush3.msra.mxu1 %v3911_v8  ;;  %4372 = vmatprep.mubr.msk.f32.mxu1 %vm456_vm14, %v2491_v26  ;;  %v3199_v8 = vld [vmem:[%s5734_s7 + $0x18] sm:$0xff] }
 0x298   : > { %4380 = vmatprep.subr.mxu1 %v3910_v52  ;;  %4463 = vmatpush3.msra.mxu0 %v3199_v8 }
 0x299   : > { %4381 = vmatpush3.msra.mxu1 %v3910_v52  ;;  %4464 = vmatprep.subr.mxu0 %v4585_v2 }
 0x29a   : > { %4373 = vmatmul.mubr.msk.f32.gmra.mxu1 %vm456_vm14, %v2493_v31  ;;  %4382 = vmatprep.subr.mxu1 %v3909_v29 }
 0x29b   : > { %4375 = vmatprep.mubr.msk.f32.mxu1 %vm456_vm14, %v2495_v60  ;;  %4383 = vmatpush3.msra.mxu1 %v3909_v29 }
 0x29c   : > { %4384 = vmatprep.subr.mxu1 %v3908_v33  ;;  %4465 = vmatpush3.msra.mxu0 %v3198_v38 }
 0x29d   : > { %4385 = vmatpush3.msra.mxu1 %v3908_v33  ;;  %4466 = vmatprep.subr.mxu0 %v4585_v2  ;;  %v3938_v33 = vld [vmem:[%s5733_s6] ss:$0 sm:$0xff] }
 0x29e   : > { %4376 = vmatmul.mubr.msk.f32.gmra.mxu1 %vm456_vm14, %v2497_v34  ;;  %4395 = vmatprep.subr.mxu1 %v3921_v5 }
 0x29f   : > { %4386 = vmatprep.mubr.msk.f32.mxu1 %vm456_vm14, %v2746_v55  ;;  %4467 = vmatpush3.msra.mxu0 %v3197_v40 }
 0x2a0   : > { %4468 = vmatprep.subr.mxu0 %v4585_v2 }
 0x2a1   : > { %4469 = vmatpush3.msra.mxu0 %v3196_v57 }
 0x2a2   : > { %4387 = vmatmul.mubr.msk.f32.vlgmr.msra.gmra.mxu1 %vm456_vm14, %v2748_v37  ;;  %4504 = vmatprep.subr.mxu0 %v4585_v2 }
 0x2a3   : > { %4396 = vmatpush3.msra.mxu1 %v3921_v5  ;;  %4389 = vmatprep.mubr.msk.f32.mxu1 %vm456_vm14, %v2750_v20 }
 0x2a4   : > { %4397 = vmatprep.subr.mxu1 %v3920_v43 }
 0x2a5   : > { %4398 = vmatpush3.msra.mxu1 %v3920_v43 }
 0x2a6   : > { %4390 = vmatmul.mubr.msk.f32.gmra.mxu1 %vm456_vm14, %v2752_v39  ;;  %4399 = vmatprep.subr.mxu1 %v3919_v63 }
 0x2a7   : > { %4392 = vmatprep.mubr.msk.f32.mxu1 %vm456_vm14, %v2754_v7  ;;  %4400 = vmatpush3.msra.mxu1 %v3919_v63 }
 0x2a8   : > { %4401 = vmatprep.subr.mxu1 %v3918_v14 }
 0x2a9   : > { %4402 = vmatpush3.msra.mxu1 %v3918_v14 }
 0x2aa   : > { %4393 = vmatmul.mubr.msk.f32.gmra.mxu1 %vm456_vm14, %v2756_v41  ;;  %4429 = vmatprep.subr.mxu1 %v4585_v2 }
 0x2ab   : > { %4403 = vmatprep.mubr.msk.f32.mxu1 %vm456_vm14, %v2882_v59 }
 0x2ae   : > { %4404 = vmatmul.mubr.msk.f32.vlgmr.msra.gmra.mxu1 %vm456_vm14, %v2884_v0 }
 0x2af   : > { %4406 = vmatprep.mubr.msk.f32.mxu1 %vm456_vm14, %v2886_v45  ;;  %4430 = vmatpush3.msra.mxu1 %v3946_v13 }
 0x2b0   : > { %4431 = vmatprep.subr.mxu1 %v4585_v2 }
 0x2b1   : > { %4432 = vmatpush3.msra.mxu1 %v3945_v35 }
 0x2b2   : > { %4407 = vmatmul.mubr.msk.f32.gmra.mxu1 %vm456_vm14, %v2888_v48  ;;  %4433 = vmatprep.subr.mxu1 %v4585_v2 }
 0x2b3   : > { %4409 = vmatprep.mubr.msk.f32.mxu1 %vm456_vm14, %v2890_v21  ;;  %4434 = vmatpush3.msra.mxu1 %v3944_v49 }
 0x2b4   : > { %4435 = vmatprep.subr.mxu1 %v4585_v2 }
 0x2b5   : > { %4436 = vmatpush3.msra.mxu1 %v3943_v53 }
 0x2b6   : > { %4410 = vmatmul.mubr.msk.f32.gmra.mxu1 %vm456_vm14, %v2892_v1  ;;  %4437 = vmatprep.subr.mxu1 %v4585_v2 }
 0x2b7   : > { %4445 = vmatprep.mubr.msk.f32.mxu1 %vm4586_vm3, %v4585_v2  ;;  %4438 = vmatpush3.msra.mxu1 %v3942_v12 }
 0x2b8   : > { %4439 = vmatprep.subr.mxu1 %v4585_v2 }
 0x2b9   : > { %4440 = vmatpush3.msra.mxu1 %v3941_v11 }
 0x2ba   : > { %4441 = vmatprep.subr.mxu1 %v4585_v2 }
 0x2bb   : > { %4442 = vmatpush3.msra.mxu1 %v3940_v46 }
 0x2bc   : > { %4443 = vmatprep.subr.mxu1 %v4585_v2 }
 0x2bd   : > { %4444 = vmatpush3.msra.mxu1 %v3939_v56 }
 0x2be   : > { %4479 = vmatprep.subr.mxu1 %v4585_v2 }
 0x336   : > { %v4354_v61 = vpop.f32.mrf.mxu1 }
 0x338   : > { %v2603_v4 = vpop.f32.mrf.mxu1 }
 0x33a   : > { %v4422_v16 = vpop.f32.mrf.mxu0 }
 0x33c   : > { %v3118_v58 = vpop.f32.mrf.mxu0 }
 0x346   : > { %v4357_v50 = vpop.f32.mrf.mxu1 }
 0x348   : > { %v2613_v62 = vpop.f32.mrf.mxu1 }
 0x34a   : > { %v4425_v31 = vpop.f32.mrf.mxu0 }
 0x34c   : > { %v3128_v14 = vpop.f32.mrf.mxu0 }
 0x352   : > { %v4360_v42 = vpop.f32.mrf.mxu1 }
 0x353   : > { %v4428_v1 = vpop.f32.mrf.mxu0 }
 0x354   : > { %v2623_v32 = vpop.f32.mrf.mxu1 }
 0x355   : > { %v3138_v40 = vpop.f32.mrf.mxu0 }
 0x356   : > { %v4371_v27 = vpop.f32.mrf.mxu1 }
 0x357   : > { %v2722_v22 = vadd.f32 %v4371_v27, %v4354_v61 }
 0x358   : > { %v2716_v3 = vpop.f32.mrf.mxu1 }
 0x359   : > { %v2717_v28 = vadd.f32 %v2716_v3, %v2603_v4 }
 0x35a   : > { %v4374_v15 = vpop.f32.mrf.mxu1 }
 0x35b   : > { %v2732_v52 = vadd.f32 %v4374_v15, %v4357_v50 }
 0x35c   : > { %v2726_v6 = vpop.f32.mrf.mxu1 }
 0x35d   : > { %v2727_v37 = vadd.f32 %v2726_v6, %v2613_v62  ;;  %v3960_v6 = vld [vmem:[%s5734_s7 + $0xb8] sm:$0xff] }
 0x35e   : > { %v4377_v9 = vpop.f32.mrf.mxu1 }
 0x35f   : > { %v2742_v7 = vadd.f32 %v4377_v9, %v4360_v42  ;;  %v3971_v9 = vld [vmem:[%s5734_s7 + $0xf8] sm:$0xff] }
 0x360   : > { %v2736_v10 = vpop.f32.mrf.mxu1 }
 0x361   : > { %v2737_v41 = vadd.f32 %v2736_v10, %v2623_v32 }
 0x362   : > { %v4388_v51 = vpop.f32.mrf.mxu1 }
 0x363   : > { %v2876_v36 = vadd.f32 %v4388_v51, %v2722_v22 }
 0x364   : > { %v2846_v18 = vpop.f32.mrf.mxu1 }
 0x365   : > { %v2875_v26 = vadd.f32 %v2846_v18, %v2717_v28  ;;  %v3957_v28 = vld [vmem:[%s5734_s7 + $0xa0] sm:$0xff] }
 0x366   : > { %v4391_v47 = vpop.f32.mrf.mxu1 }
 0x367   : > { %v2878_v5 = vadd.f32 %v4391_v47, %v2732_v52  ;;  %v3959_v47 = vld [vmem:[%s5734_s7 + $0xb0] sm:$0xff]  ;;  %v3956_v52 = vld [vmem:[%s5734_s7 + $0x98] sm:$0xff] }
 0x368   : > { %v2856_v23 = vpop.f32.mrf.mxu1 }
 0x369   : > { %v2877_v59 = vadd.f32 %v2856_v23, %v2727_v37  ;;  %v3970_v23 = vld [vmem:[%s5734_s7 + $0xf0] sm:$0xff] }
 0x36a   : > { %v4394_v19 = vpop.f32.mrf.mxu1 }
 0x36b   : > { %v2880_v13 = vadd.f32 %v4394_v19, %v2742_v7  ;;  %v3979_v7 = vld [vmem:[%s5734_s7 + $0x120] sm:$0xff] }
 0x36c   : > { %v2866_v24 = vpop.f32.mrf.mxu1 }
 0x36d   : > { %v2879_v30 = vadd.f32 %v2866_v24, %v2737_v41  ;;  %v3969_v24 = vld [vmem:[%s5734_s7 + $0xe8] sm:$0xff] }
 0x36e   : > { %v4405_v25 = vpop.f32.mrf.mxu1 }
 0x36f   : > { %v3012_v29 = vadd.f32 %v4405_v25, %v2876_v36  ;;  %v3968_v36 = vld [vmem:[%s5734_s7 + $0xe0] sm:$0xff] }
 0x370   : > { %v2982_v60 = vpop.f32.mrf.mxu1 }
 0x371   : > { %v3148_v34 = vadd.f32 %v4422_v16, %v3012_v29  ;;  %v3011_v55 = vadd.f32 %v2982_v60, %v2875_v26  ;;  %v3958_v16 = vld [vmem:[%s5734_s7 + $0xa8] sm:$0xff]  ;;  %v3967_v26 = vld [vmem:[%s5734_s7 + $0xd8] sm:$0xff]  ;;  %v3955_v29 = vld [vmem:[%s5734_s7 + $0x90] sm:$0xff] }
 0x372   : > { %v4408_v43 = vpop.f32.mrf.mxu1  ;;  %v3965_v60 = vld [vmem:[%s5734_s7 + $0xc8] sm:$0xff] }
 0x373   : > { %v3161_v20 = vadd.f32 %v3938_v33, %v3148_v34  ;;  %v3147_v63 = vadd.f32 %v3118_v58, %v3011_v55  ;;  %v3014_v39 = vadd.f32 %v4408_v43, %v2878_v5  ;;  %v3953_v5 = vld [vmem:[%s5734_s7 + $0x80] sm:$0xff]  ;;  %v3982_v43 = vld [vmem:[%s5734_s7 + $0x138] sm:$0xff] }
 0x374   : > { %v2992_v0 = vpop.f32.mrf.mxu1  ;;  %v3964_v34 = vld [vmem:[%s5734_s7 + $0xc0] sm:$0xff] }
 0x375   : > { %vm3167_vm14 = vcmp.gt.f32.partialorder %v3161_v20, 0.0  ;;  %v3173_v45 = vmul.f32 0.2, %v3161_v20  ;;  %v3160_v48 = vadd.f32 %v3938_v33, %v3147_v63  ;;  %v3150_v21 = vadd.f32 %v4425_v31, %v3014_v39  ;;  %v3966_v31 = vld [vmem:[%s5734_s7 + $0xd0] sm:$0xff]  ;;  %v3980_v39 = vld [vmem:[%s5734_s7 + $0x128] sm:$0xff] }
 0x376   : > { %v3013_v35 = vadd.f32 %v2992_v0, %v2877_v59  ;;  %v4411_v44 = vpop.f32.mrf.mxu1  ;;  %v3978_v59 = vld [vmem:[%s5734_s7 + $0x118] sm:$0xff] }
 0x377   : > { %v3179_v49 = vsel %vm3167_vm14, %v3161_v20, %v3173_v45  ;;  %vm3166_vm1 = vcmp.gt.f32.partialorder %v3160_v48, 0.0  ;;  %v3172_v17 = vmul.f32 0.2, %v3160_v48  ;;  %v3163_v53 = vadd.f32 %v3938_v33, %v3150_v21  ;;  %v3981_v20 = vld [vmem:[%s5734_s7 + $0x130] sm:$0xff]  ;;  %v3975_v21 = vld [vmem:[%s5734_s7 + $0x100] sm:$0xff] }
 0x378   : > { %3185 = vst.msk [vmem:[#allocation5 + $0xa] sm:$0xff] %vm470_vm13, %v3179_v49  ;;  %v3149_v54 = vadd.f32 %v3128_v14, %v3013_v35  ;;  %v3016_v12 = vadd.f32 %v4411_v44, %v2880_v13  ;;  %v3002_v8 = vpop.f32.mrf.mxu1  ;;  %v3977_v45 = vld [vmem:[%s5734_s7 + $0x110] sm:$0xff] }
 0x379   : > { %v3178_v11 = vsel %vm3166_vm1, %v3160_v48, %v3172_v17  ;;  %vm3169_vm15 = vcmp.gt.f32.partialorder %v3163_v53, 0.0  ;;  %v3175_v38 = vmul.f32 0.2, %v3163_v53  ;;  %v3015_v46 = vadd.f32 %v3002_v8, %v2879_v30  ;;  %v3976_v48 = vld [vmem:[%s5734_s7 + $0x108] sm:$0xff] }
 0x37a   : > { %3184 = vst.msk [vmem:[#allocation5 + $0x2] sm:$0xff] %vm470_vm13, %v3178_v11  ;;  %v3162_v56 = vadd.f32 %v3938_v33, %v3149_v54  ;;  %v3152_v57 = vadd.f32 %v4428_v1, %v3016_v12 }
 0x37b   : > { %v3181_v61 = vsel %vm3169_vm15, %v3163_v53, %v3175_v38  ;;  %v3151_v4 = vadd.f32 %v3138_v40, %v3015_v46 }
 0x37c   : > { %3187 = vst.msk [vmem:[#allocation5 + $0x1a] sm:$0xff] %vm470_vm13, %v3181_v61  ;;  %vm3168_vm0 = vcmp.gt.f32.partialorder %v3162_v56, 0.0  ;;  %v3174_v50 = vmul.f32 0.2, %v3162_v56  ;;  %v3165_v62 = vadd.f32 %v3938_v33, %v3152_v57 }
 0x37d   : > { %v3164_v42 = vadd.f32 %v3938_v33, %v3151_v4  ;;  %v3954_v33 = vld [vmem:[%s5734_s7 + $0x88] sm:$0xff] }
 0x37e   : > { %v3180_v32 = vsel %vm3168_vm0, %v3162_v56, %v3174_v50  ;;  %vm3171_vm2 = vcmp.gt.f32.partialorder %v3165_v62, 0.0  ;;  %v3177_v27 = vmul.f32 0.2, %v3165_v62 }
 0x37f   : > { %3186 = vst.msk [vmem:[#allocation5 + $0x12] sm:$0xff] %vm470_vm13, %v3180_v32  ;;  %vm3170_vm5 = vcmp.gt.f32.partialorder %v3164_v42, 0.0  ;;  %v3176_v3 = vmul.f32 0.2, %v3164_v42 }
 0x380   : > { %v3183_v15 = vsel %vm3171_vm2, %v3165_v62, %v3177_v27 }
 0x381   : > { %3190 = vst.msk [vmem:[#allocation5 + $0x2a] sm:$0xf] %vm3189_vm4, %v3183_v15  ;;  %v3182_v10 = vsel %vm3170_vm5, %v3164_v42, %v3176_v3  ;;  %v3205_v51 = vld [vmem:[#allocation5 + $0x1] ss:$2 sm:$0xff]  ;;  %v3191_v18 = vld [vmem:[#allocation5] ss:$2 sm:$0xff] }
 0x382   : > { %3188 = vst.msk [vmem:[#allocation5 + $0x22] sm:$0xff] %vm470_vm13, %v3182_v10  ;;  %4446 = vmatmul.mubr.msk.f32.vlgmr.msra.gmra.mxu1 %vm470_vm13, %v3205_v51  ;;  %4471 = vmatmul.mubr.msk.f32.vlgmr.msra.gmra.mxu0 %vm470_vm13, %v3191_v18  ;;  %v3398_v55 = vld [vmem:[#allocation5 + $0x2] ss:$2 sm:$0xff]  ;;  %v3505_v37 = vld [vmem:[#allocation5 + $0x3] ss:$2 sm:$0xff] }
 0x383   : > { %4480 = vmatpush3.msra.mxu1 %v3960_v6  ;;  %4505 = vmatpush3.msra.mxu0 %v3971_v9 }
 0x384   : > { %4481 = vmatprep.subr.mxu1 %v4585_v2  ;;  %4506 = vmatprep.subr.mxu0 %v4585_v2 }
 0x385   : > { %4482 = vmatpush3.msra.mxu1 %v3959_v47  ;;  %4507 = vmatpush3.msra.mxu0 %v3970_v23  ;;  %v3986_v23 = vld [vmem:[%s5735_s8] ss:$0 sm:$0xff] }
 0x386   : > { %4448 = vmatprep.mubr.msk.f32.mxu1 %vm4586_vm3, %v4585_v2  ;;  %4473 = vmatprep.mubr.msk.f32.mxu0 %vm4586_vm3, %v4585_v2  ;;  %v3207_v19 = vld [vmem:[#allocation5 + $0x11] ss:$2 sm:$0xff]  ;;  %v3193_v22 = vld [vmem:[#allocation5 + $0x10] ss:$2 sm:$0xff] }
 0x387   : > { %4483 = vmatprep.subr.mxu1 %v4585_v2  ;;  %4508 = vmatprep.subr.mxu0 %v4585_v2  ;;  %v3507_v63 = vld [vmem:[#allocation5 + $0x13] ss:$2 sm:$0xff]  ;;  %v3400_v14 = vld [vmem:[#allocation5 + $0x12] ss:$2 sm:$0xff] }
 0x388   : > { %4449 = vmatmul.mubr.msk.f32.gmra.mxu1 %vm470_vm13, %v3207_v19  ;;  %4474 = vmatmul.mubr.msk.f32.gmra.mxu0 %vm470_vm13, %v3193_v22  ;;  %v3612_v1 = vld [vmem:[#allocation5 + $0x4] ss:$2 sm:$0xff] }
 0x389   : > { %4484 = vmatpush3.msra.mxu1 %v3958_v16  ;;  %4509 = vmatpush3.msra.mxu0 %v3969_v24  ;;  %v3209_v58 = vld [vmem:[#allocation5 + $0x21] ss:$2 sm:$0x3f]  ;;  %v3195_v25 = vld [vmem:[#allocation5 + $0x20] ss:$2 sm:$0x3f] }
 0x38a   : > { %4485 = vmatprep.subr.mxu1 %v4585_v2  ;;  %4510 = vmatprep.subr.mxu0 %v4585_v2  ;;  %v3509_v41 = vld [vmem:[#allocation5 + $0x23] ss:$2 sm:$0x3f]  ;;  %v3402_v0 = vld [vmem:[#allocation5 + $0x22] ss:$2 sm:$0x3f] }
 0x38b   : > { %4486 = vmatpush3.msra.mxu1 %v3957_v28  ;;  %4511 = vmatpush3.msra.mxu0 %v3968_v36  ;;  %v3614_v13 = vld [vmem:[#allocation5 + $0x14] ss:$2 sm:$0xff]  ;;  %v3616_v30 = vld [vmem:[#allocation5 + $0x24] ss:$2 sm:$0x3f] }
 0x38c   : > { %4451 = vmatprep.mubr.msk.f32.mxu1 %vm4586_vm3, %v4585_v2  ;;  %4476 = vmatprep.mubr.msk.f32.mxu0 %vm4586_vm3, %v4585_v2 }
 0x38d   : > { %4487 = vmatprep.subr.mxu1 %v4585_v2  ;;  %4512 = vmatprep.subr.mxu0 %v4585_v2 }
 0x38e   : > { %4452 = vmatmul.mubr.msk.f32.gmra.mxu1 %vm470_vm13, %v3209_v58  ;;  %4477 = vmatmul.mubr.msk.f32.gmra.mxu0 %vm470_vm13, %v3195_v25 }
 0x38f   : > { %4488 = vmatpush3.msra.mxu1 %v3956_v52  ;;  %4513 = vmatpush3.msra.mxu0 %v3967_v26 }
 0x390   : > { %4489 = vmatprep.subr.mxu1 %v4585_v2  ;;  %4514 = vmatprep.subr.mxu0 %v4585_v2 }
 0x391   : > { %4490 = vmatpush3.msra.mxu1 %v3955_v29  ;;  %4515 = vmatpush3.msra.mxu0 %v3966_v31 }
 0x392   : > { %4491 = vmatprep.subr.mxu1 %v4585_v2  ;;  %4516 = vmatprep.subr.mxu0 %v4585_v2 }
 0x393   : > { %4492 = vmatpush3.msra.mxu1 %v3954_v33  ;;  %4517 = vmatpush3.msra.mxu0 %v3965_v60 }
 0x394   : > { %4493 = vmatprep.subr.mxu1 %v4585_v2  ;;  %4518 = vmatprep.subr.mxu0 %v4585_v2 }
 0x395   : > { %4494 = vmatpush3.msra.mxu1 %v3953_v5  ;;  %4495 = vmatprep.mubr.msk.f32.mxu1 %vm4586_vm3, %v4585_v2 }
 0x396   : > { %4519 = vmatpush3.msra.mxu0 %v3964_v34  ;;  %4520 = vmatprep.mubr.msk.f32.mxu0 %vm4586_vm3, %v4585_v2 }
 0x397   : > { %4496 = vmatmul.mubr.msk.f32.vlgmr.msra.gmra.mxu1 %vm470_vm13, %v3398_v55  ;;  %4521 = vmatmul.mubr.msk.f32.vlgmr.msra.gmra.mxu0 %vm470_vm13, %v3505_v37 }
 0x398   : > { %4529 = vmatprep.subr.mxu1 %v4585_v2  ;;  %4498 = vmatprep.mubr.msk.f32.mxu1 %vm4586_vm3, %v4585_v2 }
 0x399   : > { %4530 = vmatpush3.msra.mxu1 %v3982_v43  ;;  %4523 = vmatprep.mubr.msk.f32.mxu0 %vm4586_vm3, %v4585_v2 }
 0x39a   : > { %4531 = vmatprep.subr.mxu1 %v4585_v2 }
 0x39b   : > { %4532 = vmatpush3.msra.mxu1 %v3981_v20  ;;  %4524 = vmatmul.mubr.msk.f32.gmra.mxu0 %vm470_vm13, %v3507_v63 }
 0x39c   : > { %4499 = vmatmul.mubr.msk.f32.gmra.mxu1 %vm470_vm13, %v3400_v14  ;;  %4533 = vmatprep.subr.mxu1 %v4585_v2  ;;  %v3743_v14 = vld [vmem:[%s5736_s9] sm:$0xff] }
 0x39d   : > { %4534 = vmatpush3.msra.mxu1 %v3980_v39  ;;  %4501 = vmatprep.mubr.msk.f32.mxu1 %vm4586_vm3, %v4585_v2  ;;  %v3744_v39 = vld [vmem:[%s5736_s9 + $0x8] sm:$0xff] }
 0x39e   : > { %4535 = vmatprep.subr.mxu1 %v4585_v2  ;;  %4526 = vmatprep.mubr.msk.f32.mxu0 %vm4586_vm3, %v4585_v2 }
 0x39f   : > { %4536 = vmatpush3.msra.mxu1 %v3979_v7  ;;  %4527 = vmatmul.mubr.msk.f32.gmra.mxu0 %vm470_vm13, %v3509_v41  ;;  %v3745_v7 = vld [vmem:[%s5736_s9 + $0x10] sm:$0x3f] }
 0x3a0   : > { %4502 = vmatmul.mubr.msk.f32.gmra.mxu1 %vm470_vm13, %v3402_v0  ;;  %4537 = vmatprep.subr.mxu1 %v4585_v2 }
 0x3a1   : > { %4538 = vmatpush3.msra.mxu1 %v3978_v59  ;;  %4545 = vmatprep.mubr.msk.f32.mxu1 %vm4586_vm3, %v4585_v2 }
 0x3a2   : > { %4539 = vmatprep.subr.mxu1 %v4585_v2 }
 0x3a3   : > { %4540 = vmatpush3.msra.mxu1 %v3977_v45 }
 0x3a4   : > { %4541 = vmatprep.subr.mxu1 %v4585_v2 }
 0x3a5   : > { %4542 = vmatpush3.msra.mxu1 %v3976_v48 }
 0x3a6   : > { %4543 = vmatprep.subr.mxu1 %v4585_v2 }
 0x3a7   : > { %4544 = vmatpush3.msra.mxu1 %v3975_v21 }
 0x3a8   : > { %4546 = vmatmul.mubr.msk.f32.vlgmr.msra.gmra.mxu1 %vm470_vm13, %v3612_v1 }
 0x3a9   : > { %4548 = vmatprep.mubr.msk.f32.mxu1 %vm4586_vm3, %v4585_v2 }
 0x3ac   : > { %4549 = vmatmul.mubr.msk.f32.gmra.mxu1 %vm470_vm13, %v3614_v13 }
 0x3ad   : > { %4551 = vmatprep.mubr.msk.f32.mxu1 %vm4586_vm3, %v4585_v2 }
 0x3b0   : > { %4552 = vmatmul.mubr.msk.f32.gmra.mxu1 %vm470_vm13, %v3616_v30 }
 0x442   : > { %v3294_v35 = vpop.f32.mrf.mxu1  ;;  %v3383_v44 = vpop.f32.mrf.mxu0 }
 0x443   : > { %v3384_v3 = vadd.f32 %v3383_v44, %v3294_v35 }
 0x444   : > { %v4447_v49 = vpop.f32.mrf.mxu1  ;;  %v4472_v17 = vpop.f32.mrf.mxu0 }
 0x448   : > { %v3299_v53 = vpop.f32.mrf.mxu1  ;;  %v3388_v54 = vpop.f32.mrf.mxu0 }
 0x449   : > { %v3389_v10 = vadd.f32 %v3388_v54, %v3299_v53  ;;  %v3762_v54 = vld [vmem:[#allocation7] sm:$0x1] }
 0x44a   : > { %v4450_v12 = vpop.f32.mrf.mxu1  ;;  %v4475_v8 = vpop.f32.mrf.mxu0 }
 0x44e   : > { %v3304_v11 = vpop.f32.mrf.mxu1  ;;  %v3393_v38 = vpop.f32.mrf.mxu0 }
 0x44f   : > { %v3394_v16 = vadd.f32 %v3393_v38, %v3304_v11 }
 0x450   : > { %v4453_v46 = vpop.f32.mrf.mxu1  ;;  %v4478_v40 = vpop.f32.mrf.mxu0 }
 0x457   : > { %v3487_v56 = vpop.f32.mrf.mxu1  ;;  %v3594_v57 = vpop.f32.mrf.mxu0 }
 0x458   : > { %v3501_v9 = vadd.f32 %v3487_v56, %v3384_v3 }
 0x459   : > { %v4497_v61 = vpop.f32.mrf.mxu1  ;;  %v4522_v4 = vpop.f32.mrf.mxu0 }
 0x45a   : > { %v3608_v51 = vadd.f32 %v3594_v57, %v3501_v9 }
 0x45b   : > { %v3599_v2 = vpop.f32.mrf.mxu0 }
 0x45c   : > { %v3492_v50 = vpop.f32.mrf.mxu1 }
 0x45d   : > { %v4525_v62 = vpop.f32.mrf.mxu0  ;;  %v3502_v18 = vadd.f32 %v3492_v50, %v3389_v10 }
 0x45e   : > { %v4500_v42 = vpop.f32.mrf.mxu1 }
 0x45f   : > { %v3604_v32 = vpop.f32.mrf.mxu0  ;;  %v3609_v24 = vadd.f32 %v3599_v2, %v3502_v18 }
 0x460   : > { %v3497_v27 = vpop.f32.mrf.mxu1 }
 0x461   : > { %v4528_v15 = vpop.f32.mrf.mxu0  ;;  %v3503_v28 = vadd.f32 %v3497_v27, %v3394_v16 }
 0x462   : > { %v4503_v6 = vpop.f32.mrf.mxu1 }
 0x463   : > { %v3610_v29 = vadd.f32 %v3604_v32, %v3503_v28 }
 0x468   : > { %v3701_v47 = vpop.f32.mrf.mxu1 }
 0x469   : > { %v3715_v19 = vadd.f32 %v3701_v47, %v3608_v51 }
 0x46a   : > { %v4547_v22 = vpop.f32.mrf.mxu1 }
 0x46b   : > { %v3725_v36 = vadd.f32 %v3986_v23, %v3715_v19 }
 0x46c   : > { %v3706_v58 = vpop.f32.mrf.mxu1 }
 0x46d   : > { %vm3728_vm3 = vcmp.gt.f32.partialorder %v3725_v36, 0.0  ;;  %v3731_v25 = vmul.f32 0.2, %v3725_v36  ;;  %v3716_v52 = vadd.f32 %v3706_v58, %v3609_v24 }
 0x46e   : > { %v4550_v26 = vpop.f32.mrf.mxu1 }
 0x46f   : > { %v3734_v31 = vsel %vm3728_vm3, %v3725_v36, %v3731_v25  ;;  %v3726_v33 = vadd.f32 %v3986_v23, %v3716_v52 }
 0x470   : > { %v3711_v60 = vpop.f32.mrf.mxu1  ;;  %v3746_v0 = vmul.f32 %v3743_v14, %v3734_v31 }
 0x471   : > { %vm3729_vm6 = vcmp.gt.f32.partialorder %v3726_v33, 0.0  ;;  %v3732_v5 = vmul.f32 0.2, %v3726_v33  ;;  %v3717_v34 = vadd.f32 %v3711_v60, %v3610_v29 }
 0x472   : > { %v4553_v55 = vpop.f32.mrf.mxu1 }
 0x473   : > { %v3735_v37 = vsel %vm3729_vm6, %v3726_v33, %v3732_v5  ;;  %v3727_v43 = vadd.f32 %v3986_v23, %v3717_v34 }
 0x474   : > { %v3747_v41 = vmul.f32 %v3744_v39, %v3735_v37 }
 0x475   : > { %vm3730_vm7 = vcmp.gt.f32.partialorder %v3727_v43, 0.0  ;;  %v3733_v20 = vmul.f32 0.2, %v3727_v43 }
 0x476   : > { %v3749_v48 = vadd.f32 %v3747_v41, %v3746_v0 }
 0x477   : > { %v3736_v63 = vsel %vm3730_vm7, %v3727_v43, %v3733_v20 }
 0x478   : > { %3739 = vst [vmem:[#allocation6 + $0x8] sm:$0x3f] %v3736_v63 }
 0x47f   : > { %v3742_v59 = vld [vmem:[#allocation6 + $0x8] sm:$0x3f] }
 0x480   : > { %v3748_v45 = vmul.f32 %v3745_v7, %v3742_v59 }
 0x482   : > { %v3751_v21 = vsel %vm3750_vm8, %v3748_v45, 0.0 }
 0x483   : > { %v3752_v1 = vadd.f32 %v3751_v21, %v3749_v48 }
 0x485   : > { %3753 = vadd.xlane.f32.xlu0 %v3752_v1 }
 0x50e   : > { %v3754_v13 = vpop.xlane.xlu0 %3753 }
 0x50f   : > { %v3755_v30 = vrot.slane %v3754_v13, 4 }
 0x511   : > { %v3756_v35 = vadd.f32 %v3755_v30, %v3754_v13 }
 0x513   : > { %v3757_v44 = vrot.slane %v3756_v35, 2 }
 0x515   : > { %v3758_v49 = vadd.f32 %v3757_v44, %v3756_v35 }
 0x517   : > { %v3759_v17 = vrot.slane %v3758_v49, 1 }
 0x519   : > { %v3760_v53 = vadd.f32 %v3759_v17, %v3758_v49 }
 0x51b   : > { %4559 = vpush %v3760_v53 }
 0x51c   : > { %4561 = vpush %v3762_v54 }
 0x54c   : > { %s4560_s25 = spop %4559 }
 0x54d   : > { %s4562_s26 = spop %4561 }
 0x54e   : > { %s3764_s30 = sadd.f32 %s4562_s26, %s4560_s25 }
 0x550   : > { %v3765_v12 = vstv %s3764_s30 }
 0x551   : > { %3766 = vst [vmem:[%s384_s29] sm:$0x1] %v3765_v12 }
 0x552 PF: > { %s23_s19 = sadd.s32 1, %s4582_s19  }
 0x553   : > { %p20_p4 = scmp.ge.s32.totalorder %s23_s19, 4  }
 0x555   :  { %22 = sbr.rel (!%p20_p4) target bundleno = 3 (0x3), region = 293 }

</bundles_post_ra>
